<compile_context>
chip_gen: v6e
topology: v6e:2x2x1
jax: 0.10.0
libtpu: 0.0.40
codegen_flags: <defaults>
</compile_context>

<pallas_src>
import jax
import jax.numpy as jnp
from jax.experimental import pallas as pl
from jax.experimental.pallas import tpu as pltpu

C_OUT = 40 * 32          # 1280 conv output channels
KH = KW = 3
NUM_CLASSES = 8
BN_EPS = 1e-5

C_TILE_CONV = 640        # 1280 / 2 -> 2 "parallel" channel steps
R_TILE_MAX = 1024        # row tile for the fused conv/pool kernel (multiple of 8)

FC_SPLIT = 2             # 2-way K split -> both v7x TensorCores work on the FC
FC_TK_MAX = 256 * 1024   # K lanes per FC step (bf16 weight block = 4 MiB)
VMEM_LIMIT = 32 * 1024 * 1024


# ----------------------------- kernels --------------------------------------

def conv_pool_kernel(p_ref, w_ref, b_ref, o_ref):
    # p_ref: (4, Rt, 9) im2col patches, one slab per 2x2 pool-window offset,
    #        rows ordered (n, hp, wp) within each slab.
    # w_ref: (9, Ct) BN-folded conv weight;  b_ref: (1, Ct) BN-folded bias.
    s, rt, k = p_ref.shape
    y = jnp.dot(p_ref[...].reshape(s * rt, k), w_ref[...],
                preferred_element_type=jnp.float32)
    y = y.reshape(s, rt, -1)
    # The folded bias is constant within a pool window and ReLU is monotone, so
    # maxpool(relu(bn(conv))) == relu(max_window(scaled_conv) + folded_bias).
    m = jnp.maximum(jnp.maximum(y[0], y[1]), jnp.maximum(y[2], y[3]))
    o_ref[...] = jnp.maximum(m + b_ref[...], 0.0).astype(o_ref.dtype)


def fc_kernel(x_ref, w_ref, o_ref, acc_ref):
    # x_ref: (N, tk) bf16; w_ref: (8, tk) bf16 (lane-dense); o_ref: (1, N, 8) f32.
    k = pl.program_id(1)

    @pl.when(k == 0)
    def _():
        acc_ref[...] = jnp.zeros_like(acc_ref)

    acc_ref[...] += jax.lax.dot_general(
        x_ref[...], w_ref[...],
        dimension_numbers=(((1,), (1,)), ((), ())),
        preferred_element_type=jnp.float32)

    @pl.when(k == pl.num_programs(1) - 1)
    def _():
        o_ref[0] = acc_ref[...]


# --------------------------- pallas wrappers ---------------------------------

def conv_bn_relu_pool(patches, w_folded, b_folded,
                      c_tile=C_TILE_CONV, r_tile_max=R_TILE_MAX):
    # patches: (4, R, 9); output: (R, C_OUT) bf16, channels-last.
    _, R, K = patches.shape
    C = w_folded.shape[1]
    assert C % c_tile == 0, (C, c_tile)
    if R <= r_tile_max:
        r_tile, r_steps = R, 1
    else:
        r_tile, r_steps = r_tile_max, pl.cdiv(R, r_tile_max)
    return pl.pallas_call(
        conv_pool_kernel,
        out_shape=jax.ShapeDtypeStruct((R, C), jnp.bfloat16),
        grid_spec=pltpu.PrefetchScalarGridSpec(
            num_scalar_prefetch=0,
            grid=(C // c_tile, r_steps),
            in_specs=[
                pl.BlockSpec((4, r_tile, K), lambda c, i: (0, i, 0)),
                pl.BlockSpec((K, c_tile), lambda c, i: (0, c)),
                pl.BlockSpec((1, c_tile), lambda c, i: (0, c)),
            ],
            out_specs=pl.BlockSpec((r_tile, c_tile), lambda c, i: (i, c)),
        ),
        compiler_params=pltpu.CompilerParams(
            dimension_semantics=("parallel", "parallel"),
            vmem_limit_bytes=VMEM_LIMIT),
    )(patches, w_folded, b_folded)


def _fc_tiling(F, n_split=FC_SPLIT, tk_max=FC_TK_MAX):
    # Returns (tk, steps_per_split, F_pad) with tk % 128 == 0 and
    # F_pad = n_split * steps * tk >= F.  Works for any F (no divisor hunting),
    # including the module's hard-coded in_features = 4,158,720.
    steps = max(1, -(-F // (n_split * tk_max)))
    tk = -(-F // (n_split * steps))
    tk = -(-tk // 128) * 128
    return tk, steps, n_split * steps * tk


def linear(x_flat, w_t, b):
    # x_flat: (N, F) bf16; w_t: (8, F_pad) bf16 (pre-permuted, pre-padded); b: (8,) f32.
    N, F = x_flat.shape
    O, F_pad_w = w_t.shape
    tk, steps, F_pad = _fc_tiling(F)
    assert F_pad_w == F_pad, (F_pad_w, F_pad)
    if F_pad != F:
        # Padded features multiply against zero weight rows -> no-op.
        x_flat = jnp.pad(x_flat, ((0, 0), (0, F_pad - F)))

    x_map = lambda p, k: (0, p * steps + k)
    w_map = lambda p, k: (0, p * steps + k)

    partials = pl.pallas_call(
        fc_kernel,
        out_shape=jax.ShapeDtypeStruct((FC_SPLIT, N, O), jnp.float32),
        grid_spec=pltpu.PrefetchScalarGridSpec(
            num_scalar_prefetch=0,
            grid=(FC_SPLIT, steps),
            in_specs=[
                pl.BlockSpec((N, tk), x_map),
                pl.BlockSpec((O, tk), w_map),
            ],
            out_specs=pl.BlockSpec((1, N, O), lambda p, k: (p, 0, 0)),
            scratch_shapes=[pltpu.VMEM((N, O), jnp.float32)],
        ),
        compiler_params=pltpu.CompilerParams(
            dimension_semantics=("parallel", "arbitrary"),
            vmem_limit_bytes=VMEM_LIMIT),
    )(x_flat, w_t)
    # Tiny (FC_SPLIT, N, 8) partial combine + bias add stay in XLA (free).
    return partials.sum(axis=0) + b[None, :]


# ------------------------------ forward --------------------------------------

def _build_pool_patches(xs, Hp, Wp):
    # xs: (N, P, Q, 1) channels-last.  Returns (4, N*Hp*Wp, 9): one im2col slab
    # per 2x2 pool-window offset (p, q); conv positions that would be dropped by
    # floor-pooling are never materialized.
    N = xs.shape[0]
    slabs = []
    for p in range(2):
        for q in range(2):
            cols = [xs[:, p + ky::2, q + kx::2, 0][:, :Hp, :Wp]
                    for ky in range(KH) for kx in range(KW)]
            slabs.append(jnp.stack(cols, axis=-1).reshape(N * Hp * Wp, KH * KW))
    return jnp.stack(slabs, axis=0)


def new_model_forward(x, params):
    N, H, W, _ = x.shape
    # PyTorch: x.transpose(3, 1) -> (N, 1, W, H); conv spatial dims are (W, H).
    xs = jnp.transpose(x, (0, 2, 1, 3)).astype(jnp.float32)        # (N, W, H, 1)
    Ho, Wo = W - KH + 1, H - KW + 1
    Hp, Wp = Ho // 2, Wo // 2

    patches = _build_pool_patches(xs, Hp, Wp)                      # (4, R, 9)

    # Fold BatchNorm (inference mode, running stats) into the conv weight/bias.
    scale = params["bn_gamma"] * jax.lax.rsqrt(params["bn_var"] + BN_EPS)
    w_folded = params["conv_w"].reshape(C_OUT, KH * KW).T * scale[None, :]   # (9, C)
    b_folded = (params["bn_beta"]
                + scale * (params["conv_b"] - params["bn_mean"]))[None, :]   # (1, C)

    pooled = conv_bn_relu_pool(patches, w_folded, b_folded)        # (R, C) bf16

    # TODO(synk): Dropout2d(0.2) is identity in inference mode; training-mode
    # per-channel dropout is not implemented.

    # Channels-last flatten: rows are already (n, hp, wp)-ordered, so this is a
    # free contiguous reshape; the FC weight was permuted to match at init.
    flat = pooled.reshape(N, Hp * Wp * C_OUT)                      # (N, F) bf16
    return linear(flat, params["fc_w_t"], params["fc_b"])


# ----------------------------- reference -------------------------------------

def reference_forward(x, params):
    xt = jnp.transpose(x, (0, 3, 2, 1)).astype(jnp.float32)        # (N,1,W,H) NCHW
    conv = jax.lax.conv_general_dilated(
        xt, params["conv_w"], window_strides=(1, 1), padding="VALID",
        dimension_numbers=("NCHW", "OIHW", "NCHW"),
        precision=jax.lax.Precision.HIGHEST)
    conv = conv + params["conv_b"][None, :, None, None]
    inv = jax.lax.rsqrt(params["bn_var"] + BN_EPS)
    bn = (params["bn_gamma"] * inv)[None, :, None, None] * \
         (conv - params["bn_mean"][None, :, None, None]) + \
         params["bn_beta"][None, :, None, None]
    act = jnp.maximum(bn, 0.0)
    pooled = jax.lax.reduce_window(act, -jnp.inf, jax.lax.max,
                                   (1, 1, 2, 2), (1, 1, 2, 2), "VALID")
    # Match the kernel's bf16 activation quantization.
    pooled = pooled.astype(jnp.bfloat16).astype(jnp.float32)
    # Channels-last flatten against the column-permuted fc weight == PyTorch's
    # NCHW flatten against the original weight (same permutation on both).
    flat = jnp.transpose(pooled, (0, 2, 3, 1)).reshape(pooled.shape[0], -1)
    F = flat.shape[1]
    w = params["fc_w_t"][:, :F].astype(jnp.float32).T              # (F, 8)
    return jnp.dot(flat, w, precision=jax.lax.Precision.HIGHEST) + params["fc_b"][None, :]


# ------------------------------- params --------------------------------------

def init_params(key, Hp, Wp):
    F = C_OUT * Hp * Wp
    ks = jax.random.split(key, 8)
    # PyTorch fc.weight: (8, F) with input features in NCHW (c, hp, wp) order.
    fc_w = 0.01 * jax.random.normal(ks[6], (NUM_CLASSES, F), jnp.float32)
    # Offline prep (once): permute the feature axis into the channels-last
    # (hp, wp, c) order produced by the fused conv/pool kernel, zero-pad to the
    # FC K-tiling, and cast to bf16 so the hot path is lane-dense and half-width.
    fc_w_cl = (fc_w.reshape(NUM_CLASSES, C_OUT, Hp, Wp)
               .transpose(0, 2, 3, 1).reshape(NUM_CLASSES, F))
    _, _, F_pad = _fc_tiling(F)
    fc_w_t = jnp.pad(fc_w_cl, ((0, 0), (0, F_pad - F))).astype(jnp.bfloat16)
    return {
        "conv_w": 0.1 * jax.random.normal(ks[0], (C_OUT, 1, KH, KW), jnp.float32),
        "conv_b": 0.1 * jax.random.normal(ks[1], (C_OUT,), jnp.float32),
        "bn_gamma": 1.0 + 0.1 * jax.random.normal(ks[2], (C_OUT,), jnp.float32),
        "bn_beta": 0.1 * jax.random.normal(ks[3], (C_OUT,), jnp.float32),
        "bn_mean": 0.05 * jax.random.normal(ks[4], (C_OUT,), jnp.float32),
        "bn_var": jnp.abs(0.5 + 0.1 * jax.random.normal(ks[5], (C_OUT,), jnp.float32)),
        "fc_w_t": fc_w_t,                      # (8, F_pad) bf16, channels-last order
        "fc_b": 0.1 * jax.random.normal(ks[7], (NUM_CLASSES,), jnp.float32),
    }


if __name__ == "__main__":
    key = jax.random.PRNGKey(0)
    kx, kp = jax.random.split(key)

    N, H, W = 2, 16, 18                                 # small, asymmetric spatial dims
    x = jax.random.normal(kx, (N, H, W, 1), jnp.float32)

    # Conv spatial dims after the PyTorch-style transpose are (W, H).
    Hp, Wp = (W - KH + 1) // 2, (H - KW + 1) // 2       # (8, 7)
    # TODO(synk): the module hard-codes fc in_features=4158720 for one specific
    # input size; here the FC size is derived from the small test input instead
    # (the FC tiling itself handles the real size without modification).
    params = init_params(kp, Hp, Wp)

    fwd = jax.jit(new_model_forward)
    out = jax.block_until_ready(fwd(x, params))
    assert out.shape == (N, NUM_CLASSES), out.shape

    ref = jax.block_until_ready(reference_forward(x, params))
    assert bool(jnp.all(jnp.isfinite(out)))
    assert bool(jnp.allclose(out, ref, rtol=2e-3, atol=2e-3)), (out, ref)

    print("KERNEL_OK")
</pallas_src>

<mosaic_0001>
module attributes {stable_mosaic.version = 11 : i64} {
  func.func @conv_pool_kernel(%arg0: i32, %arg1: i32, %arg2: memref<4x112x9xf32, #tpu.memory_space<vmem>>, %arg3: memref<9x640xf32, #tpu.memory_space<vmem>>, %arg4: memref<1x640xf32, #tpu.memory_space<vmem>>, %arg5: memref<112x640xbf16, #tpu.memory_space<vmem>>) attributes {dimension_semantics = [#tpu.dimension_semantics<parallel>, #tpu.dimension_semantics<parallel>], iteration_bounds = array<i64: 2, 1>, scalar_prefetch = 0 : i64, scratch_operands = 0 : i64, tpu.core_type = #tpu.core_type<tc>, window_params = [{transform_indices = @transform_0, window_bounds = array<i64: 4, 112, 9>}, {transform_indices = @transform_1, window_bounds = array<i64: 9, 640>}, {transform_indices = @transform_2, window_bounds = array<i64: 1, 640>}, {transform_indices = @transform_3, window_bounds = array<i64: 112, 640>}]} {
    %c0 = arith.constant 0 : index
    %c0_0 = arith.constant 0 : index
    %c0_1 = arith.constant 0 : index
    %0 = vector.load %arg2[%c0, %c0_0, %c0_1] : memref<4x112x9xf32, #tpu.memory_space<vmem>>, vector<4x112x9xf32>
    %1 = vector.shape_cast %0 : vector<4x112x9xf32> to vector<448x9xf32>
    %c0_2 = arith.constant 0 : index
    %c0_3 = arith.constant 0 : index
    %2 = vector.load %arg3[%c0_2, %c0_3] : memref<9x640xf32, #tpu.memory_space<vmem>>, vector<9x640xf32>
    %cst = arith.constant dense<0.000000e+00> : vector<448x640xf32>
    %3 = tpu.matmul %1, %2, %cst {dimension_numbers = #tpu.dot_dimension_numbers<[1], [0], [0], [1], [0, 0, 1, 1], [], []>} : vector<448x9xf32>, vector<9x640xf32>, vector<448x640xf32> -> vector<448x640xf32>
    %4 = vector.shape_cast %3 : vector<448x640xf32> to vector<4x112x640xf32>
    %5 = vector.extract_strided_slice %4 {offsets = [0, 0, 0], sizes = [1, 112, 640], strides = [1, 1, 1]} : vector<4x112x640xf32> to vector<1x112x640xf32>
    %6 = vector.shape_cast %5 : vector<1x112x640xf32> to vector<112x640xf32>
    %7 = vector.extract_strided_slice %4 {offsets = [1, 0, 0], sizes = [1, 112, 640], strides = [1, 1, 1]} : vector<4x112x640xf32> to vector<1x112x640xf32>
    %8 = vector.shape_cast %7 : vector<1x112x640xf32> to vector<112x640xf32>
    %9 = arith.maximumf %6, %8 : vector<112x640xf32>
    %10 = vector.extract_strided_slice %4 {offsets = [2, 0, 0], sizes = [1, 112, 640], strides = [1, 1, 1]} : vector<4x112x640xf32> to vector<1x112x640xf32>
    %11 = vector.shape_cast %10 : vector<1x112x640xf32> to vector<112x640xf32>
    %12 = vector.extract_strided_slice %4 {offsets = [3, 0, 0], sizes = [1, 112, 640], strides = [1, 1, 1]} : vector<4x112x640xf32> to vector<1x112x640xf32>
    %13 = vector.shape_cast %12 : vector<1x112x640xf32> to vector<112x640xf32>
    %14 = arith.maximumf %11, %13 : vector<112x640xf32>
    %15 = arith.maximumf %9, %14 : vector<112x640xf32>
    %c0_4 = arith.constant 0 : index
    %c0_5 = arith.constant 0 : index
    %16 = vector.load %arg4[%c0_4, %c0_5] : memref<1x640xf32, #tpu.memory_space<vmem>>, vector<1x640xf32>
    %17 = vector.broadcast %16 : vector<1x640xf32> to vector<112x640xf32>
    %18 = arith.addf %15, %17 : vector<112x640xf32>
    %cst_6 = arith.constant 0.000000e+00 : f32
    %19 = vector.broadcast %cst_6 : f32 to vector<112x640xf32>
    %20 = arith.maximumf %18, %19 : vector<112x640xf32>
    %21 = arith.truncf %20 : vector<112x640xf32> to vector<112x640xbf16>
    %c0_7 = arith.constant 0 : index
    %c0_8 = arith.constant 0 : index
    %22 = vector.load %arg5[%c0_7, %c0_8] : memref<112x640xbf16, #tpu.memory_space<vmem>>, vector<112x640xbf16>
    tpu.vector_store %arg5[%c0_7, %c0_8], %21 {strides = array<i32>} : memref<112x640xbf16, #tpu.memory_space<vmem>>, vector<112x640xbf16>,
    return
  }
  func.func @transform_0(%arg0: i32, %arg1: i32) -> (i32, i32, i32) {
    %c0_i32 = arith.constant 0 : i32
    %c0_i32_0 = arith.constant 0 : i32
    %c0_i32_1 = arith.constant 0 : i32
    return %c0_i32, %arg1, %c0_i32_0 : i32, i32, i32
  }
  func.func @transform_1(%arg0: i32, %arg1: i32) -> (i32, i32) {
    %c0_i32 = arith.constant 0 : i32
    %c0_i32_0 = arith.constant 0 : i32
    return %c0_i32, %arg0 : i32, i32
  }
  func.func @transform_2(%arg0: i32, %arg1: i32) -> (i32, i32) {
    %c0_i32 = arith.constant 0 : i32
    %c0_i32_0 = arith.constant 0 : i32
    return %c0_i32, %arg0 : i32, i32
  }
  func.func @transform_3(%arg0: i32, %arg1: i32) -> (i32, i32) {
    %c0_i32 = arith.constant 0 : i32
    return %arg1, %arg0 : i32, i32
  }
}

module attributes {stable_mosaic.version = 11 : i64} {
  func.func @fc_kernel(%arg0: i32, %arg1: i32, %arg2: memref<2x35840xbf16, #tpu.memory_space<vmem>>, %arg3: memref<8x35840xbf16, #tpu.memory_space<vmem>>, %arg4: memref<1x2x8xf32, #tpu.memory_space<vmem>>, %arg5: memref<2x8xf32, #tpu.memory_space<vmem>>) attributes {dimension_semantics = [#tpu.dimension_semantics<parallel>, #tpu.dimension_semantics<arbitrary>], iteration_bounds = array<i64: 2, 1>, scalar_prefetch = 0 : i64, scratch_operands = 1 : i64, tpu.core_type = #tpu.core_type<tc>, window_params = [{transform_indices = @transform_0, window_bounds = array<i64: 2, 35840>}, {transform_indices = @transform_1, window_bounds = array<i64: 8, 35840>}, {transform_indices = @transform_2, window_bounds = array<i64: 1, 2, 8>}]} {
    %c0_i32 = arith.constant 0 : i32
    %0 = arith.cmpi eq, %arg1, %c0_i32 : i32
    %1 = arith.extui %0 : i1 to i32
    %c0_i32_0 = arith.constant 0 : i32
    %2 = arith.cmpi ne, %1, %c0_i32_0 : i32
    scf.if %2 {
      %cst_10 = arith.constant 0.000000e+00 : f32
      %12 = vector.broadcast %cst_10 : f32 to vector<2x8xf32>
      %c0_11 = arith.constant 0 : index
      %c0_12 = arith.constant 0 : index
      %13 = vector.load %arg5[%c0_11, %c0_12] : memref<2x8xf32, #tpu.memory_space<vmem>>, vector<2x8xf32>
      tpu.vector_store %arg5[%c0_11, %c0_12], %12 {strides = array<i32>} : memref<2x8xf32, #tpu.memory_space<vmem>>, vector<2x8xf32>,
    } else {
    }
    %c0 = arith.constant 0 : index
    %c0_1 = arith.constant 0 : index
    %3 = vector.load %arg5[%c0, %c0_1] : memref<2x8xf32, #tpu.memory_space<vmem>>, vector<2x8xf32>
    %c0_2 = arith.constant 0 : index
    %c0_3 = arith.constant 0 : index
    %4 = vector.load %arg2[%c0_2, %c0_3] : memref<2x35840xbf16, #tpu.memory_space<vmem>>, vector<2x35840xbf16>
    %c0_4 = arith.constant 0 : index
    %c0_5 = arith.constant 0 : index
    %5 = vector.load %arg3[%c0_4, %c0_5] : memref<8x35840xbf16, #tpu.memory_space<vmem>>, vector<8x35840xbf16>
    %cst = arith.constant dense<0.000000e+00> : vector<2x8xf32>
    %6 = tpu.matmul %4, %5, %cst {dimension_numbers = #tpu.dot_dimension_numbers<[1], [1], [0], [0], [0, 0, 1, 0], [], []>} : vector<2x35840xbf16>, vector<8x35840xbf16>, vector<2x8xf32> -> vector<2x8xf32>
    %7 = arith.addf %3, %6 : vector<2x8xf32>
    %c0_6 = arith.constant 0 : index
    %c0_7 = arith.constant 0 : index
    %8 = vector.load %arg5[%c0_6, %c0_7] : memref<2x8xf32, #tpu.memory_space<vmem>>, vector<2x8xf32>
    tpu.vector_store %arg5[%c0_6, %c0_7], %7 {strides = array<i32>} : memref<2x8xf32, #tpu.memory_space<vmem>>, vector<2x8xf32>,
    %c0_i32_8 = arith.constant 0 : i32
    %9 = arith.cmpi eq, %arg1, %c0_i32_8 : i32
    %10 = arith.extui %9 : i1 to i32
    %c0_i32_9 = arith.constant 0 : i32
    %11 = arith.cmpi ne, %10, %c0_i32_9 : i32
    scf.if %11 {
      %c0_10 = arith.constant 0 : index
      %c0_11 = arith.constant 0 : index
      %12 = vector.load %arg5[%c0_10, %c0_11] : memref<2x8xf32, #tpu.memory_space<vmem>>, vector<2x8xf32>
      %c0_12 = arith.constant 0 : index
      %c0_13 = arith.constant 0 : index
      %c0_14 = arith.constant 0 : index
      %13 = vector.load %arg4[%c0_12, %c0_13, %c0_14] : memref<1x2x8xf32, #tpu.memory_space<vmem>>, vector<1x2x8xf32>
      %14 = vector.shape_cast %13 : vector<1x2x8xf32> to vector<2x8xf32>
      %15 = vector.shape_cast %12 : vector<2x8xf32> to vector<1x2x8xf32>
      tpu.vector_store %arg4[%c0_12, %c0_13, %c0_14], %15 {strides = array<i32>} : memref<1x2x8xf32, #tpu.memory_space<vmem>>, vector<1x2x8xf32>,
    } else {
    }
    return
  }
  func.func @transform_0(%arg0: i32, %arg1: i32) -> (i32, i32) {
    %c1_i32 = arith.constant 1 : i32
    %0 = arith.muli %arg0, %c1_i32 : i32
    %1 = arith.addi %0, %arg1 : i32
    %c0_i32 = arith.constant 0 : i32
    %c0_i32_0 = arith.constant 0 : i32
    return %c0_i32, %1 : i32, i32
  }
  func.func @transform_1(%arg0: i32, %arg1: i32) -> (i32, i32) {
    %c1_i32 = arith.constant 1 : i32
    %0 = arith.muli %arg0, %c1_i32 : i32
    %1 = arith.addi %0, %arg1 : i32
    %c0_i32 = arith.constant 0 : i32
    %c0_i32_0 = arith.constant 0 : i32
    return %c0_i32, %1 : i32, i32
  }
  func.func @transform_2(%arg0: i32, %arg1: i32) -> (i32, i32, i32) {
    %c0_i32 = arith.constant 0 : i32
    %c0_i32_0 = arith.constant 0 : i32
    %c0_i32_1 = arith.constant 0 : i32
    return %arg0, %c0_i32, %c0_i32_0 : i32, i32, i32
  }
}

</mosaic_0001>

<bundles_post_ra>
// kernel: new_model_forward.2
= control target key start
LH: loop header
LB: loop body
LE: loop exit
PB: predicated region body
PF: predicated region fallthrough
CT: control target
= control target key end

     0   :  { %s3072_s12 = smov 0   ;;  %s3074_s13 = smov 0   ;;  %s4865_s0 = inlined_call_operand.vmem [shape: f32[4,112,9], index: 0, kind: input, shape index: {}]   ;;  %s4866_s1 = inlined_call_operand.vmem [shape: f32[9,1280], index: 1, kind: input, shape index: {}]   ;;  %s4867_s2 = inlined_call_operand.vmem [shape: f32[1,1280], index: 2, kind: input, shape index: {}]   ;;  %s4868_s3 = inlined_call_operand.vmem [shape: bf16[112,1280], index: 3, kind: output, shape index: {}]  }
   0x1   :  { %s3076_s14 = smov 0   ;;  %s3078_s15 = smov 0  }
   0x2   :  { %s3080_s16 = smov 0  }
   0x3 LB: > { %s25_s17 = sadd.s32 1, %s3045_s15  ;;  %s2520_s18 = sadd.s32 4294967295, %s3049_s16   ;;  %s3049_s16 = sphi %s3080_s16, %s13_s16   ;;  %s3045_s15 = sphi %s3078_s15, %s5202_s15   ;;  %s3041_s14 = sphi %s3076_s14, %s5201_s14   ;;  %s3037_s13 = sphi %s3074_s13, %s5200_s13   ;;  %s3033_s12 = sphi %s3072_s12, %s5199_s12  }
   0x4   : > { %p27_p0 = scmp.ge.s32.totalorder %s25_s17, 2  ;;  %p65_p1 = scmp.ne.s32.totalorder %s3037_s13, %s3033_s12 }
   0x5   : > { %p66_p2 = scmp.eq.s32.totalorder %s3049_s16, 0  ;;  %p123_p4 = scmp.eq.s32.totalorder %s2520_s18, 1 }
   0x6   : > { %s5204_s17 = smov (%p27_p0, %s25_s17), 0  ;;  %s58_s20 = sadd.s32 1, %s3037_s13 }
   0x7   : > { %p67_p3 = por %p66_p2, %p65_p1  ;;  %s55_s19 = ssub.s32 %s3045_s15, %s5204_s17 }
   0x8   : > { %p56_p5 = scmp.eq.s32.totalorder %s55_s19, 0  ;;  %p3107_p6 = por %p123_p4, %p65_p1 }
   0x9   : > { %p2524_p7 = scmp.ge.s32.totalorder %s3049_s16, 2 }
   0xa   : > { %s3112_s22 = scalar_select %p56_p5, %s3037_s13, %s58_s20  }
   0xb   : > { %154 = sbr.rel (%p2524_p7) target bundleno = 26 (0x1a), region = 20 }
  0x10   : > { %157 = sbr.rel (!%p67_p3) target bundleno = 26 (0x1a), region = 24  ;;  %s159_s23 = sand.u32 (%p67_p3), 1, %s3037_s13  }
  0x11   : > { %s2773_s24 = smul.u32 (%p67_p3), 40, %s3045_s15 }
  0x12   : > { %s2967_s25 = smul.u32 (%p67_p3), 80, %s159_s23 }
  0x13   : > { %s164_s28 = scalar_lea.vmem (%p67_p3), %s4866_s1, %s2773_s24 }
  0x14   : > { %v177_v0 = vld [vmem:[%s164_s28] sm:$0xff] (%p67_p3)  ;;  %v179_v1 = vld [vmem:[%s164_s28 + $0x8] sm:$0xff] (%p67_p3)  ;;  %v181_v2 = vld [vmem:[%s164_s28 + $0x10] sm:$0xff] (%p67_p3)  ;;  %s161_s29 = scalar_lea.vmem (%p67_p3), [#allocation2], %s2967_s25 }
  0x15   : > { %178 = vst [vmem:[%s161_s29] sm:$0xff] %v177_v0  ;;  %180 = vst [vmem:[%s161_s29 + $0x8] sm:$0xff] %v179_v1  ;;  %v183_v3 = vld [vmem:[%s164_s28 + $0x18] sm:$0xff]  ;;  %v185_v4 = vld [vmem:[%s164_s28 + $0x20] sm:$0xff] }
  0x16   : > { %182 = vst [vmem:[%s161_s29 + $0x10] sm:$0xff] %v181_v2  ;;  %v187_v5 = vld [vmem:[%s164_s28 + $0x50] sm:$0xff]  ;;  %184 = vst [vmem:[%s161_s29 + $0x18] sm:$0xff] %v183_v3  ;;  %v189_v6 = vld [vmem:[%s164_s28 + $0x58] sm:$0xff] }
  0x17   : > { %186 = vst [vmem:[%s161_s29 + $0x20] sm:$0xff] %v185_v4  ;;  %188 = vst [vmem:[%s161_s29 + $0x28] sm:$0xff] %v187_v5  ;;  %v191_v7 = vld [vmem:[%s164_s28 + $0x60] sm:$0xff]  ;;  %v193_v8 = vld [vmem:[%s164_s28 + $0x68] sm:$0xff] }
  0x18   : > { %190 = vst [vmem:[%s161_s29 + $0x30] sm:$0xff] %v189_v6  ;;  %192 = vst [vmem:[%s161_s29 + $0x38] sm:$0xff] %v191_v7  ;;  %v195_v9 = vld [vmem:[%s164_s28 + $0x70] sm:$0xff] }
  0x19   : > { %194 = vst [vmem:[%s161_s29 + $0x40] sm:$0xff] %v193_v8  ;;  %196 = vst [vmem:[%s161_s29 + $0x48] sm:$0xff] %v195_v9 }
  0x1a PF: > { %p2526_p8 = scmp.ge.s32.totalorder %s3049_s16, 1  ;;  %p209_p9 = scmp.lt.s32.totalorder %s3049_s16, 3 }
  0x1c   : > { %p210_p10 = pnand %p2526_p8, %p209_p9 }
  0x1e   : > { %213 = sbr.rel (%p210_p10) target bundleno = 547 (0x223), region = 51 }
  0x23   : > { %s216_s30 = sand.u32 1, %s3033_s12   ;;  %v3051_v10 = vmov 0.0   ;;  %vm496_vm0 = vcmask 1040384   ;;  %v3140_v15 = vld [vmem:[%s4865_s0] sm:$0xff]  ;;  %vm327_vm1 = vcmask 72704   ;;  %v3145_v16 = vld [vmem:[%s4865_s0 + $0x150] sm:$0xff] }
  0x24   : > { %s2968_s4 = smul.u32 80, %s216_s30  ;;  %576 = vmatprep.mubr.f32.mxu0 %v3051_v10  ;;  %828 = vmatprep.mubr.f32.mxu1 %v3051_v10  ;;  %v3159_v20 = vld [vmem:[%s4865_s0 + $0x8] sm:$0xff]  ;;  %v3164_v21 = vld [vmem:[%s4865_s0 + $0x158] sm:$0xff]  ;;  %v3181_v24 = vld [vmem:[%s4865_s0 + $0x10] sm:$0xff] }
  0x25   : > { %v3186_v25 = vld [vmem:[%s4865_s0 + $0x160] sm:$0xff]  ;;  %v3198_v27 = vld [vmem:[%s4865_s0 + $0x18] sm:$0xff]  ;;  %v3203_v28 = vld [vmem:[%s4865_s0 + $0x168] sm:$0xff]  ;;  %s254_s10 = smul.u32 5, %s3041_s14 }
  0x26   : > { %s3127_s5 = scalar_lea.vmem [#allocation2], %s2968_s4  ;;  %v3214_v29 = vld [vmem:[%s4865_s0 + $0x20] sm:$0xff]  ;;  %v3219_v30 = vld [vmem:[%s4865_s0 + $0x170] sm:$0xff]  ;;  %v3230_v31 = vld [vmem:[%s4865_s0 + $0x28] sm:$0xff]  ;;  %s2969_s20 = smul.u32 280, %s216_s30 }
  0x27   : > { %v323_v11 = vld [vmem:[%s3127_s5 + $0x30] sm:$0x1]  ;;  %v322_v12 = vld [vmem:[%s3127_s5 + $0x28] sm:$0x1]  ;;  %v317_v14 = vld [vmem:[%s3127_s5] sm:$0xff]  ;;  %p255_p11 = scmp.lt.s32.totalorder %s254_s10, 9 }
  0x28   : > { %v318_v13 = vld [vmem:[%s3127_s5 + $0x8] sm:$0xff]  ;;  %2527 = vmatprep.subr.msk.mxu0 %vm496_vm0, %v323_v11  ;;  %2963 = vmatprep.subr.msk.mxu1 %vm496_vm0, %v323_v11  ;;  %v325_v17 = vld [vmem:[%s3127_s5 + $0x40] sm:$0x1]  ;;  %v324_v19 = vld [vmem:[%s3127_s5 + $0x38] sm:$0x1]  ;;  %s4165_s12 = scalar_lea.vmem [#allocation3], %s2969_s20 }
  0x29   : > { %2528 = vmatpush1.msk.msra.mxu0 %vm496_vm0, %v322_v12  ;;  %2965 = vmatpush1.msk.msra.mxu1 %vm496_vm0, %v322_v12  ;;  %v326_v18 = vld [vmem:[%s3127_s5 + $0x48] sm:$0x1]  ;;  %v320_v22 = vld [vmem:[%s3127_s5 + $0x18] sm:$0xff]  ;;  %v319_v23 = vld [vmem:[%s3127_s5 + $0x10] sm:$0xff]  ;;  %s5206_s10 = smov (!%p255_p11, %s254_s10), 9  ;;  %s2816_s30 = smul.u32 (%p3107_p6), 20, %s3041_s14 }
  0x2a   : > { %542 = vmatprep.subr.mxu0 %v318_v13  ;;  %2964 = vmatprep.subr.mxu1 %v318_v13  ;;  %v321_v26 = vld [vmem:[%s3127_s5 + $0x20] sm:$0xff]  ;;  %v3235_v32 = vld [vmem:[%s4865_s0 + $0x178] sm:$0xff]  ;;  %v3267_v36 = vld [vmem:[%s4865_s0 + $0x188] sm:$0xff]  ;;  %s257_s19 = scalar_lea.vmem %s4867_s2, %s5206_s10 }
  0x2b   : > { %543 = vmatpush1.msra.mxu0 %v317_v14  ;;  %2966 = vmatpush1.msra.mxu1 %v317_v14  ;;  %v3246_v33 = vld [vmem:[%s4865_s0 + $0x30] sm:$0xff]  ;;  %v3251_v34 = vld [vmem:[%s4865_s0 + $0x180] sm:$0xff]  ;;  %v3262_v35 = vld [vmem:[%s4865_s0 + $0x38] sm:$0xff]  ;;  %s4770_s24 = scalar_lea.vmem (%p3107_p6), %s4868_s3, %s2816_s30 }
  0x2c   : > { %2529 = vmatmul.mubr.msk.f32.vlgmr.msra.gmra.mxu0 %vm327_vm1, %v3140_v15  ;;  %2571 = vmatmul.mubr.msk.f32.vlgmr.msra.gmra.mxu1 %vm327_vm1, %v3145_v16  ;;  %v3278_v37 = vld [vmem:[%s4865_s0 + $0x40] sm:$0xff]  ;;  %v3283_v38 = vld [vmem:[%s4865_s0 + $0x190] sm:$0xff]  ;;  %v3294_v39 = vld [vmem:[%s4865_s0 + $0x48] sm:$0xff] }
  0x2d   : > { %2585 = vmatprep.subr.msk.mxu1 %vm496_vm0, %v325_v17  ;;  %2875 = vmatprep.subr.msk.mxu0 %vm496_vm0, %v326_v18  ;;  %v3299_v40 = vld [vmem:[%s4865_s0 + $0x198] sm:$0xff]  ;;  %v3310_v41 = vld [vmem:[%s4865_s0 + $0x50] sm:$0xff]  ;;  %v3315_v42 = vld [vmem:[%s4865_s0 + $0x1a0] sm:$0xff] }
  0x2e   : > { %2586 = vmatpush1.msk.msra.mxu1 %vm496_vm0, %v324_v19  ;;  %2876 = vmatpush3.msk.msra.mxu0 %vm496_vm0, %v326_v18  ;;  %v3326_v43 = vld [vmem:[%s4865_s0 + $0x58] sm:$0xff]  ;;  %v3331_v44 = vld [vmem:[%s4865_s0 + $0x1a8] sm:$0xff]  ;;  %v3342_v45 = vld [vmem:[%s4865_s0 + $0x60] sm:$0xff] }
  0x2f   : > { %582 = vmatprep.mubr.f32.mxu0 %v3051_v10  ;;  %834 = vmatprep.mubr.f32.mxu1 %v3051_v10  ;;  %v3347_v46 = vld [vmem:[%s4865_s0 + $0x1b0] sm:$0xff]  ;;  %v3358_v47 = vld [vmem:[%s4865_s0 + $0x68] sm:$0xff]  ;;  %v3363_v48 = vld [vmem:[%s4865_s0 + $0x1b8] sm:$0xff] }
  0x30   : > { %2530 = vmatmul.mubr.msk.f32.gmra.mxu0 %vm327_vm1, %v3159_v20  ;;  %2572 = vmatmul.mubr.msk.f32.gmra.mxu1 %vm327_vm1, %v3164_v21  ;;  %v3374_v49 = vld [vmem:[%s4865_s0 + $0x70] sm:$0xff]  ;;  %v3385_v50 = vld [vmem:[%s4865_s0 + $0x78] sm:$0xff]  ;;  %v3396_v51 = vld [vmem:[%s4865_s0 + $0x80] sm:$0xff] }
  0x31   : > { %588 = vmatprep.mubr.f32.mxu0 %v3051_v10  ;;  %840 = vmatprep.mubr.f32.mxu1 %v3051_v10  ;;  %v3407_v52 = vld [vmem:[%s4865_s0 + $0x88] sm:$0xff]  ;;  %v3418_v53 = vld [vmem:[%s4865_s0 + $0x90] sm:$0xff]  ;;  %v3429_v54 = vld [vmem:[%s4865_s0 + $0x98] sm:$0xff] }
  0x32   : > { %943 = vmatprep.subr.mxu1 %v320_v22  ;;  %2877 = vmatprep.subr.mxu0 %v321_v26  ;;  %v3440_v55 = vld [vmem:[%s4865_s0 + $0xa0] sm:$0xff]  ;;  %v3451_v56 = vld [vmem:[%s4865_s0 + $0xa8] sm:$0xff]  ;;  %v3462_v57 = vld [vmem:[%s4865_s0 + $0xb0] sm:$0xff] }
  0x33   : > { %944 = vmatpush1.msra.mxu1 %v319_v23  ;;  %2878 = vmatpush3.msra.mxu0 %v321_v26  ;;  %v3473_v58 = vld [vmem:[%s4865_s0 + $0xb8] sm:$0xff]  ;;  %v3484_v59 = vld [vmem:[%s4865_s0 + $0xc0] sm:$0xff]  ;;  %v3495_v60 = vld [vmem:[%s4865_s0 + $0xc8] sm:$0xff] }
  0x34   : > { %2531 = vmatmul.mubr.msk.f32.gmra.mxu0 %vm327_vm1, %v3181_v24  ;;  %2573 = vmatmul.mubr.msk.f32.gmra.mxu1 %vm327_vm1, %v3186_v25  ;;  %v3506_v61 = vld [vmem:[%s4865_s0 + $0xd0] sm:$0xff]  ;;  %v3517_v62 = vld [vmem:[%s4865_s0 + $0xd8] sm:$0xff]  ;;  %v3528_v63 = vld [vmem:[%s4865_s0 + $0xe0] sm:$0xff] }
  0x35   : > { %594 = vmatprep.mubr.f32.mxu0 %v3051_v10  ;;  %846 = vmatprep.mubr.f32.mxu1 %v3051_v10  ;;  %v3539_v0 = vld [vmem:[%s4865_s0 + $0xe8] sm:$0xff]  ;;  %v3550_v1 = vld [vmem:[%s4865_s0 + $0xf0] sm:$0xff]  ;;  %v3561_v2 = vld [vmem:[%s4865_s0 + $0xf8] sm:$0xff] }
  0x36   : > { %v3572_v3 = vld [vmem:[%s4865_s0 + $0x100] sm:$0xff]  ;;  %v3583_v4 = vld [vmem:[%s4865_s0 + $0x108] sm:$0xff]  ;;  %v3594_v5 = vld [vmem:[%s4865_s0 + $0x110] sm:$0xff] }
  0x37   : > { %v3605_v6 = vld [vmem:[%s4865_s0 + $0x118] sm:$0xff]  ;;  %v3616_v7 = vld [vmem:[%s4865_s0 + $0x120] sm:$0xff]  ;;  %v3627_v8 = vld [vmem:[%s4865_s0 + $0x128] sm:$0xff] }
  0x38   : > { %2532 = vmatmul.mubr.msk.f32.gmra.mxu0 %vm327_vm1, %v3198_v27  ;;  %2574 = vmatmul.mubr.msk.f32.gmra.mxu1 %vm327_vm1, %v3203_v28  ;;  %v3638_v9 = vld [vmem:[%s4865_s0 + $0x130] sm:$0xff]  ;;  %v3649_v11 = vld [vmem:[%s4865_s0 + $0x138] sm:$0xff]  ;;  %v3660_v12 = vld [vmem:[%s4865_s0 + $0x140] sm:$0xff] }
  0x39   : > { %600 = vmatprep.mubr.f32.mxu0 %v3051_v10  ;;  %852 = vmatprep.mubr.f32.mxu1 %v3051_v10  ;;  %v3671_v13 = vld [vmem:[%s4865_s0 + $0x148] sm:$0xff] }
  0x3c   : > { %2533 = vmatmul.mubr.msk.f32.gmra.mxu0 %vm327_vm1, %v3214_v29  ;;  %2575 = vmatmul.mubr.msk.f32.gmra.mxu1 %vm327_vm1, %v3219_v30 }
  0x3d   : > { %606 = vmatprep.mubr.f32.mxu0 %v3051_v10  ;;  %858 = vmatprep.mubr.f32.mxu1 %v3051_v10 }
  0x40   : > { %2534 = vmatmul.mubr.msk.f32.gmra.mxu0 %vm327_vm1, %v3230_v31  ;;  %2576 = vmatmul.mubr.msk.f32.gmra.mxu1 %vm327_vm1, %v3235_v32 }
  0x41   : > { %612 = vmatprep.mubr.f32.mxu0 %v3051_v10  ;;  %864 = vmatprep.mubr.f32.mxu1 %v3051_v10 }
  0x44   : > { %2535 = vmatmul.mubr.msk.f32.gmra.mxu0 %vm327_vm1, %v3246_v33  ;;  %2577 = vmatmul.mubr.msk.f32.gmra.mxu1 %vm327_vm1, %v3251_v34 }
  0x45   : > { %618 = vmatprep.mubr.f32.mxu0 %v3051_v10  ;;  %870 = vmatprep.mubr.f32.mxu1 %v3051_v10 }
  0x48   : > { %2536 = vmatmul.mubr.msk.f32.gmra.mxu0 %vm327_vm1, %v3262_v35  ;;  %2578 = vmatmul.mubr.msk.f32.gmra.mxu1 %vm327_vm1, %v3267_v36 }
  0x49   : > { %624 = vmatprep.mubr.f32.mxu0 %v3051_v10  ;;  %876 = vmatprep.mubr.f32.mxu1 %v3051_v10 }
  0x4c   : > { %2537 = vmatmul.mubr.msk.f32.gmra.mxu0 %vm327_vm1, %v3278_v37  ;;  %2579 = vmatmul.mubr.msk.f32.gmra.mxu1 %vm327_vm1, %v3283_v38 }
  0x4d   : > { %630 = vmatprep.mubr.f32.mxu0 %v3051_v10  ;;  %882 = vmatprep.mubr.f32.mxu1 %v3051_v10 }
  0x50   : > { %2538 = vmatmul.mubr.msk.f32.gmra.mxu0 %vm327_vm1, %v3294_v39  ;;  %2580 = vmatmul.mubr.msk.f32.gmra.mxu1 %vm327_vm1, %v3299_v40 }
  0x51   : > { %636 = vmatprep.mubr.f32.mxu0 %v3051_v10  ;;  %888 = vmatprep.mubr.f32.mxu1 %v3051_v10 }
  0x54   : > { %2539 = vmatmul.mubr.msk.f32.gmra.mxu0 %vm327_vm1, %v3310_v41  ;;  %2581 = vmatmul.mubr.msk.f32.gmra.mxu1 %vm327_vm1, %v3315_v42 }
  0x55   : > { %642 = vmatprep.mubr.f32.mxu0 %v3051_v10  ;;  %894 = vmatprep.mubr.f32.mxu1 %v3051_v10 }
  0x58   : > { %2540 = vmatmul.mubr.msk.f32.gmra.mxu0 %vm327_vm1, %v3326_v43  ;;  %2582 = vmatmul.mubr.msk.f32.gmra.mxu1 %vm327_vm1, %v3331_v44 }
  0x59   : > { %648 = vmatprep.mubr.f32.mxu0 %v3051_v10  ;;  %900 = vmatprep.mubr.f32.mxu1 %v3051_v10 }
  0x5c   : > { %2541 = vmatmul.mubr.msk.f32.gmra.mxu0 %vm327_vm1, %v3342_v45  ;;  %2583 = vmatmul.mubr.msk.f32.gmra.mxu1 %vm327_vm1, %v3347_v46 }
  0x5d   : > { %654 = vmatprep.mubr.f32.mxu0 %v3051_v10  ;;  %906 = vmatprep.mubr.f32.mxu1 %v3051_v10 }
  0x60   : > { %2542 = vmatmul.mubr.msk.f32.gmra.mxu0 %vm327_vm1, %v3358_v47  ;;  %2584 = vmatmul.mubr.msk.f32.gmra.mxu1 %vm327_vm1, %v3363_v48 }
  0x61   : > { %660 = vmatprep.mubr.f32.mxu0 %v3051_v10  ;;  %977 = vmatprep.mubr.f32.mxu1 %v3051_v10 }
  0x64   : > { %2543 = vmatmul.mubr.msk.f32.gmra.mxu0 %vm327_vm1, %v3374_v49  ;;  %2587 = vmatmul.mubr.msk.f32.vlgmr.msra.gmra.mxu1 %vm327_vm1, %v3140_v15 }
  0x65   : > { %666 = vmatprep.mubr.f32.mxu0 %v3051_v10  ;;  %983 = vmatprep.mubr.f32.mxu1 %v3051_v10 }
  0x68   : > { %2544 = vmatmul.mubr.msk.f32.gmra.mxu0 %vm327_vm1, %v3385_v50  ;;  %2588 = vmatmul.mubr.msk.f32.gmra.mxu1 %vm327_vm1, %v3159_v20 }
  0x69   : > { %672 = vmatprep.mubr.f32.mxu0 %v3051_v10  ;;  %989 = vmatprep.mubr.f32.mxu1 %v3051_v10 }
  0x6c   : > { %2545 = vmatmul.mubr.msk.f32.gmra.mxu0 %vm327_vm1, %v3396_v51  ;;  %2589 = vmatmul.mubr.msk.f32.gmra.mxu1 %vm327_vm1, %v3181_v24 }
  0x6d   : > { %678 = vmatprep.mubr.f32.mxu0 %v3051_v10  ;;  %995 = vmatprep.mubr.f32.mxu1 %v3051_v10 }
  0x70   : > { %2546 = vmatmul.mubr.msk.f32.gmra.mxu0 %vm327_vm1, %v3407_v52  ;;  %2590 = vmatmul.mubr.msk.f32.gmra.mxu1 %vm327_vm1, %v3198_v27 }
  0x71   : > { %684 = vmatprep.mubr.f32.mxu0 %v3051_v10  ;;  %1001 = vmatprep.mubr.f32.mxu1 %v3051_v10 }
  0x74   : > { %2547 = vmatmul.mubr.msk.f32.gmra.mxu0 %vm327_vm1, %v3418_v53  ;;  %2591 = vmatmul.mubr.msk.f32.gmra.mxu1 %vm327_vm1, %v3214_v29 }
  0x75   : > { %690 = vmatprep.mubr.f32.mxu0 %v3051_v10  ;;  %1007 = vmatprep.mubr.f32.mxu1 %v3051_v10 }
  0x78   : > { %2548 = vmatmul.mubr.msk.f32.gmra.mxu0 %vm327_vm1, %v3429_v54  ;;  %2592 = vmatmul.mubr.msk.f32.gmra.mxu1 %vm327_vm1, %v3230_v31 }
  0x79   : > { %696 = vmatprep.mubr.f32.mxu0 %v3051_v10  ;;  %1013 = vmatprep.mubr.f32.mxu1 %v3051_v10 }
  0x7c   : > { %2549 = vmatmul.mubr.msk.f32.gmra.mxu0 %vm327_vm1, %v3440_v55  ;;  %2593 = vmatmul.mubr.msk.f32.gmra.mxu1 %vm327_vm1, %v3246_v33 }
  0x7d   : > { %702 = vmatprep.mubr.f32.mxu0 %v3051_v10  ;;  %1019 = vmatprep.mubr.f32.mxu1 %v3051_v10 }
  0x80   : > { %2550 = vmatmul.mubr.msk.f32.gmra.mxu0 %vm327_vm1, %v3451_v56  ;;  %2594 = vmatmul.mubr.msk.f32.gmra.mxu1 %vm327_vm1, %v3262_v35 }
  0x81   : > { %708 = vmatprep.mubr.f32.mxu0 %v3051_v10  ;;  %1025 = vmatprep.mubr.f32.mxu1 %v3051_v10 }
  0x84   : > { %2551 = vmatmul.mubr.msk.f32.gmra.mxu0 %vm327_vm1, %v3462_v57  ;;  %2595 = vmatmul.mubr.msk.f32.gmra.mxu1 %vm327_vm1, %v3278_v37 }
  0x85   : > { %714 = vmatprep.mubr.f32.mxu0 %v3051_v10  ;;  %1031 = vmatprep.mubr.f32.mxu1 %v3051_v10 }
  0x88   : > { %2552 = vmatmul.mubr.msk.f32.gmra.mxu0 %vm327_vm1, %v3473_v58  ;;  %2596 = vmatmul.mubr.msk.f32.gmra.mxu1 %vm327_vm1, %v3294_v39 }
  0x89   : > { %720 = vmatprep.mubr.f32.mxu0 %v3051_v10  ;;  %1037 = vmatprep.mubr.f32.mxu1 %v3051_v10 }
  0x8c   : > { %2553 = vmatmul.mubr.msk.f32.gmra.mxu0 %vm327_vm1, %v3484_v59  ;;  %2597 = vmatmul.mubr.msk.f32.gmra.mxu1 %vm327_vm1, %v3310_v41 }
  0x8d   : > { %726 = vmatprep.mubr.f32.mxu0 %v3051_v10  ;;  %1043 = vmatprep.mubr.f32.mxu1 %v3051_v10 }
  0x90   : > { %2554 = vmatmul.mubr.msk.f32.gmra.mxu0 %vm327_vm1, %v3495_v60  ;;  %2598 = vmatmul.mubr.msk.f32.gmra.mxu1 %vm327_vm1, %v3326_v43 }
  0x91   : > { %732 = vmatprep.mubr.f32.mxu0 %v3051_v10  ;;  %1049 = vmatprep.mubr.f32.mxu1 %v3051_v10 }
  0x94   : > { %2555 = vmatmul.mubr.msk.f32.gmra.mxu0 %vm327_vm1, %v3506_v61  ;;  %2599 = vmatmul.mubr.msk.f32.gmra.mxu1 %vm327_vm1, %v3342_v45 }
  0x95   : > { %738 = vmatprep.mubr.f32.mxu0 %v3051_v10  ;;  %1055 = vmatprep.mubr.f32.mxu1 %v3051_v10 }
  0x98   : > { %2556 = vmatmul.mubr.msk.f32.gmra.mxu0 %vm327_vm1, %v3517_v62  ;;  %2600 = vmatmul.mubr.msk.f32.gmra.mxu1 %vm327_vm1, %v3358_v47 }
  0x99   : > { %744 = vmatprep.mubr.f32.mxu0 %v3051_v10  ;;  %1061 = vmatprep.mubr.f32.mxu1 %v3051_v10 }
  0x9c   : > { %2557 = vmatmul.mubr.msk.f32.gmra.mxu0 %vm327_vm1, %v3528_v63  ;;  %2601 = vmatmul.mubr.msk.f32.gmra.mxu1 %vm327_vm1, %v3374_v49 }
  0x9d   : > { %750 = vmatprep.mubr.f32.mxu0 %v3051_v10  ;;  %1067 = vmatprep.mubr.f32.mxu1 %v3051_v10 }
  0xa0   : > { %2558 = vmatmul.mubr.msk.f32.gmra.mxu0 %vm327_vm1, %v3539_v0  ;;  %2602 = vmatmul.mubr.msk.f32.gmra.mxu1 %vm327_vm1, %v3385_v50 }
  0xa1   : > { %756 = vmatprep.mubr.f32.mxu0 %v3051_v10  ;;  %1073 = vmatprep.mubr.f32.mxu1 %v3051_v10 }
  0xa4   : > { %2559 = vmatmul.mubr.msk.f32.gmra.mxu0 %vm327_vm1, %v3550_v1  ;;  %2603 = vmatmul.mubr.msk.f32.gmra.mxu1 %vm327_vm1, %v3396_v51 }
  0xa5   : > { %762 = vmatprep.mubr.f32.mxu0 %v3051_v10  ;;  %1079 = vmatprep.mubr.f32.mxu1 %v3051_v10 }
  0xa8   : > { %2560 = vmatmul.mubr.msk.f32.gmra.mxu0 %vm327_vm1, %v3561_v2  ;;  %2604 = vmatmul.mubr.msk.f32.gmra.mxu1 %vm327_vm1, %v3407_v52 }
  0xa9   : > { %768 = vmatprep.mubr.f32.mxu0 %v3051_v10  ;;  %1085 = vmatprep.mubr.f32.mxu1 %v3051_v10 }
  0xac   : > { %2561 = vmatmul.mubr.msk.f32.gmra.mxu0 %vm327_vm1, %v3572_v3  ;;  %2605 = vmatmul.mubr.msk.f32.gmra.mxu1 %vm327_vm1, %v3418_v53 }
  0xad   : > { %774 = vmatprep.mubr.f32.mxu0 %v3051_v10  ;;  %1091 = vmatprep.mubr.f32.mxu1 %v3051_v10 }
  0xb0   : > { %2562 = vmatmul.mubr.msk.f32.gmra.mxu0 %vm327_vm1, %v3583_v4  ;;  %2606 = vmatmul.mubr.msk.f32.gmra.mxu1 %vm327_vm1, %v3429_v54 }
  0xb1   : > { %780 = vmatprep.mubr.f32.mxu0 %v3051_v10  ;;  %1097 = vmatprep.mubr.f32.mxu1 %v3051_v10 }
  0xb4   : > { %2563 = vmatmul.mubr.msk.f32.gmra.mxu0 %vm327_vm1, %v3594_v5  ;;  %2607 = vmatmul.mubr.msk.f32.gmra.mxu1 %vm327_vm1, %v3440_v55 }
  0xb5   : > { %786 = vmatprep.mubr.f32.mxu0 %v3051_v10  ;;  %1103 = vmatprep.mubr.f32.mxu1 %v3051_v10 }
  0xb8   : > { %2564 = vmatmul.mubr.msk.f32.gmra.mxu0 %vm327_vm1, %v3605_v6  ;;  %2608 = vmatmul.mubr.msk.f32.gmra.mxu1 %vm327_vm1, %v3451_v56 }
  0xb9   : > { %792 = vmatprep.mubr.f32.mxu0 %v3051_v10  ;;  %1109 = vmatprep.mubr.f32.mxu1 %v3051_v10 }
  0xbc   : > { %2565 = vmatmul.mubr.msk.f32.gmra.mxu0 %vm327_vm1, %v3616_v7  ;;  %2609 = vmatmul.mubr.msk.f32.gmra.mxu1 %vm327_vm1, %v3462_v57 }
  0xbd   : > { %798 = vmatprep.mubr.f32.mxu0 %v3051_v10  ;;  %1115 = vmatprep.mubr.f32.mxu1 %v3051_v10 }
  0xc0   : > { %2566 = vmatmul.mubr.msk.f32.gmra.mxu0 %vm327_vm1, %v3627_v8  ;;  %2610 = vmatmul.mubr.msk.f32.gmra.mxu1 %vm327_vm1, %v3473_v58 }
  0xc1   : > { %804 = vmatprep.mubr.f32.mxu0 %v3051_v10  ;;  %1121 = vmatprep.mubr.f32.mxu1 %v3051_v10 }
  0xc4   : > { %2567 = vmatmul.mubr.msk.f32.gmra.mxu0 %vm327_vm1, %v3638_v9  ;;  %2611 = vmatmul.mubr.msk.f32.gmra.mxu1 %vm327_vm1, %v3484_v59 }
  0xc5   : > { %810 = vmatprep.mubr.f32.mxu0 %v3051_v10  ;;  %1127 = vmatprep.mubr.f32.mxu1 %v3051_v10 }
  0xc8   : > { %2568 = vmatmul.mubr.msk.f32.gmra.mxu0 %vm327_vm1, %v3649_v11  ;;  %2612 = vmatmul.mubr.msk.f32.gmra.mxu1 %vm327_vm1, %v3495_v60 }
  0xc9   : > { %816 = vmatprep.mubr.f32.mxu0 %v3051_v10  ;;  %1133 = vmatprep.mubr.f32.mxu1 %v3051_v10 }
  0xcc   : > { %2569 = vmatmul.mubr.msk.f32.gmra.mxu0 %vm327_vm1, %v3660_v12  ;;  %2613 = vmatmul.mubr.msk.f32.gmra.mxu1 %vm327_vm1, %v3506_v61 }
  0xcd   : > { %822 = vmatprep.mubr.f32.mxu0 %v3051_v10  ;;  %1139 = vmatprep.mubr.f32.mxu1 %v3051_v10 }
  0xd0   : > { %2570 = vmatmul.mubr.msk.f32.gmra.mxu0 %vm327_vm1, %v3671_v13  ;;  %2614 = vmatmul.mubr.msk.f32.gmra.mxu1 %vm327_vm1, %v3517_v62 }
  0xd1   : > { %1145 = vmatprep.mubr.f32.mxu1 %v3051_v10  ;;  %2879 = vmatprep.mubr.msk.f32.mxu0 %vm327_vm1, %v3140_v15 }
  0xd4   : > { %2615 = vmatmul.mubr.msk.f32.gmra.mxu1 %vm327_vm1, %v3528_v63  ;;  %2880 = vmatmul.mubr.msk.f32.vlgmr.msra.gmra.mxu0 %vm327_vm1, %v3159_v20 }
  0xd5   : > { %1151 = vmatprep.mubr.f32.mxu1 %v3051_v10  ;;  %2882 = vmatprep.mubr.msk.f32.mxu0 %vm327_vm1, %v3181_v24 }
  0xd8   : > { %2616 = vmatmul.mubr.msk.f32.gmra.mxu1 %vm327_vm1, %v3539_v0  ;;  %2883 = vmatmul.mubr.msk.f32.gmra.mxu0 %vm327_vm1, %v3198_v27 }
  0xd9   : > { %1157 = vmatprep.mubr.f32.mxu1 %v3051_v10  ;;  %2885 = vmatprep.mubr.msk.f32.mxu0 %vm327_vm1, %v3214_v29 }
  0xdc   : > { %2617 = vmatmul.mubr.msk.f32.gmra.mxu1 %vm327_vm1, %v3550_v1  ;;  %2886 = vmatmul.mubr.msk.f32.gmra.mxu0 %vm327_vm1, %v3230_v31 }
  0xdd   : > { %1163 = vmatprep.mubr.f32.mxu1 %v3051_v10  ;;  %2888 = vmatprep.mubr.msk.f32.mxu0 %vm327_vm1, %v3246_v33 }
  0xe0   : > { %2618 = vmatmul.mubr.msk.f32.gmra.mxu1 %vm327_vm1, %v3561_v2  ;;  %2889 = vmatmul.mubr.msk.f32.gmra.mxu0 %vm327_vm1, %v3262_v35 }
  0xe1   : > { %1169 = vmatprep.mubr.f32.mxu1 %v3051_v10  ;;  %2891 = vmatprep.mubr.msk.f32.mxu0 %vm327_vm1, %v3278_v37 }
  0xe4   : > { %2619 = vmatmul.mubr.msk.f32.gmra.mxu1 %vm327_vm1, %v3572_v3  ;;  %2892 = vmatmul.mubr.msk.f32.gmra.mxu0 %vm327_vm1, %v3294_v39 }
  0xe5   : > { %1175 = vmatprep.mubr.f32.mxu1 %v3051_v10  ;;  %2894 = vmatprep.mubr.msk.f32.mxu0 %vm327_vm1, %v3310_v41 }
  0xe8   : > { %2620 = vmatmul.mubr.msk.f32.gmra.mxu1 %vm327_vm1, %v3583_v4  ;;  %2895 = vmatmul.mubr.msk.f32.gmra.mxu0 %vm327_vm1, %v3326_v43 }
  0xe9   : > { %1181 = vmatprep.mubr.f32.mxu1 %v3051_v10  ;;  %2897 = vmatprep.mubr.msk.f32.mxu0 %vm327_vm1, %v3342_v45 }
  0xec   : > { %v3722_v14 = vpop.f32.mrf.mxu0  ;;  %v3724_v15 = vpop.f32.mrf.mxu1  ;;  %2621 = vmatmul.mubr.msk.f32.gmra.mxu1 %vm327_vm1, %v3594_v5  ;;  %2898 = vmatmul.mubr.msk.f32.gmra.mxu0 %vm327_vm1, %v3358_v47 }
  0xed   : > { %1187 = vmatprep.mubr.f32.mxu1 %v3051_v10  ;;  %2900 = vmatprep.mubr.msk.f32.mxu0 %vm327_vm1, %v3374_v49 }
  0xee   : > { %v3733_v17 = vpop.f32.mrf.mxu0  ;;  %v3735_v18 = vpop.f32.mrf.mxu1 }
  0xf0   : > { %v3737_v19 = vpop.f32.mrf.mxu0  ;;  %v3739_v20 = vpop.f32.mrf.mxu1  ;;  %2622 = vmatmul.mubr.msk.f32.gmra.mxu1 %vm327_vm1, %v3605_v6  ;;  %2901 = vmatmul.mubr.msk.f32.gmra.mxu0 %vm327_vm1, %v3385_v50 }
  0xf1   : > { %1193 = vmatprep.mubr.f32.mxu1 %v3051_v10  ;;  %2903 = vmatprep.mubr.msk.f32.mxu0 %vm327_vm1, %v3396_v51 }
  0xf2   : > { %v3748_v22 = vpop.f32.mrf.mxu0  ;;  %v3750_v23 = vpop.f32.mrf.mxu1 }
  0xf4   : > { %v3752_v24 = vpop.f32.mrf.mxu0  ;;  %v3754_v26 = vpop.f32.mrf.mxu1  ;;  %2623 = vmatmul.mubr.msk.f32.gmra.mxu1 %vm327_vm1, %v3616_v7  ;;  %2904 = vmatmul.mubr.msk.f32.gmra.mxu0 %vm327_vm1, %v3407_v52 }
  0xf5   : > { %1199 = vmatprep.mubr.f32.mxu1 %v3051_v10  ;;  %2906 = vmatprep.mubr.msk.f32.mxu0 %vm327_vm1, %v3418_v53 }
  0xf6   : > { %v3763_v27 = vpop.f32.mrf.mxu0  ;;  %v3765_v29 = vpop.f32.mrf.mxu1 }
  0xf8   : > { %v3767_v31 = vpop.f32.mrf.mxu0  ;;  %v3769_v33 = vpop.f32.mrf.mxu1  ;;  %2624 = vmatmul.mubr.msk.f32.gmra.mxu1 %vm327_vm1, %v3627_v8  ;;  %2907 = vmatmul.mubr.msk.f32.gmra.mxu0 %vm327_vm1, %v3429_v54 }
  0xf9   : > { %1205 = vmatprep.mubr.f32.mxu1 %v3051_v10  ;;  %2909 = vmatprep.mubr.msk.f32.mxu0 %vm327_vm1, %v3440_v55 }
  0xfa   : > { %v3778_v35 = vpop.f32.mrf.mxu0  ;;  %v3780_v37 = vpop.f32.mrf.mxu1 }
  0xfc   : > { %v3782_v39 = vpop.f32.mrf.mxu0  ;;  %v3784_v41 = vpop.f32.mrf.mxu1  ;;  %2625 = vmatmul.mubr.msk.f32.gmra.mxu1 %vm327_vm1, %v3638_v9  ;;  %2910 = vmatmul.mubr.msk.f32.gmra.mxu0 %vm327_vm1, %v3451_v56 }
  0xfd   : > { %1211 = vmatprep.mubr.f32.mxu1 %v3051_v10  ;;  %2912 = vmatprep.mubr.msk.f32.mxu0 %vm327_vm1, %v3462_v57 }
  0xfe   : > { %v3793_v43 = vpop.f32.mrf.mxu0  ;;  %v3795_v45 = vpop.f32.mrf.mxu1 }
 0x100   : > { %v3797_v47 = vpop.f32.mrf.mxu0  ;;  %v3799_v49 = vpop.f32.mrf.mxu1  ;;  %2626 = vmatmul.mubr.msk.f32.gmra.mxu1 %vm327_vm1, %v3649_v11  ;;  %2913 = vmatmul.mubr.msk.f32.gmra.mxu0 %vm327_vm1, %v3473_v58 }
 0x101   : > { %1217 = vmatprep.mubr.f32.mxu1 %v3051_v10  ;;  %2915 = vmatprep.mubr.msk.f32.mxu0 %vm327_vm1, %v3484_v59 }
 0x102   : > { %v3808_v50 = vpop.f32.mrf.mxu0  ;;  %v3810_v51 = vpop.f32.mrf.mxu1 }
 0x104   : > { %v3812_v52 = vpop.f32.mrf.mxu0  ;;  %v3814_v53 = vpop.f32.mrf.mxu1  ;;  %2627 = vmatmul.mubr.msk.f32.gmra.mxu1 %vm327_vm1, %v3660_v12  ;;  %2916 = vmatmul.mubr.msk.f32.gmra.mxu0 %vm327_vm1, %v3495_v60 }
 0x105   : > { %4919 = vst [vmem:[#allocation4_spill] sm:$0xff] %v3814_v53  ;;  %1223 = vmatprep.mubr.f32.mxu1 %v3051_v10  ;;  %2918 = vmatprep.mubr.msk.f32.mxu0 %vm327_vm1, %v3506_v61 }
 0x106   : > { %v3823_v54 = vpop.f32.mrf.mxu0  ;;  %v3825_v55 = vpop.f32.mrf.mxu1 }
 0x107   : > { %4920 = vst [vmem:[#allocation5_spill] sm:$0xff] %v3823_v54  ;;  %4921 = vst [vmem:[#allocation6_spill] sm:$0xff] %v3825_v55 }
 0x108   : > { %v3827_v56 = vpop.f32.mrf.mxu0  ;;  %v3829_v57 = vpop.f32.mrf.mxu1  ;;  %2628 = vmatmul.mubr.msk.f32.gmra.mxu1 %vm327_vm1, %v3671_v13  ;;  %2919 = vmatmul.mubr.msk.f32.gmra.mxu0 %vm327_vm1, %v3517_v62 }
 0x109   : > { %4922 = vst [vmem:[#allocation7_spill] sm:$0xff] %v3827_v56  ;;  %4923 = vst [vmem:[#allocation8_spill] sm:$0xff] %v3829_v57  ;;  %1229 = vmatprep.mubr.f32.mxu1 %v3051_v10  ;;  %2921 = vmatprep.mubr.msk.f32.mxu0 %vm327_vm1, %v3528_v63 }
 0x10a   : > { %v3838_v58 = vpop.f32.mrf.mxu0  ;;  %v3840_v59 = vpop.f32.mrf.mxu1 }
 0x10b   : > { %4924 = vst [vmem:[#allocation9_spill] sm:$0xff] %v3838_v58  ;;  %4925 = vst [vmem:[#allocation10_spill] sm:$0xff] %v3840_v59 }
 0x10c   : > { %v3842_v60 = vpop.f32.mrf.mxu0  ;;  %v3844_v61 = vpop.f32.mrf.mxu1  ;;  %2629 = vmatmul.mubr.msk.f32.gmra.mxu1 %vm327_vm1, %v3145_v16  ;;  %2922 = vmatmul.mubr.msk.f32.gmra.mxu0 %vm327_vm1, %v3539_v0 }
 0x10d   : > { %4926 = vst [vmem:[#allocation11_spill] sm:$0xff] %v3842_v60  ;;  %4927 = vst [vmem:[#allocation12_spill] sm:$0xff] %v3844_v61  ;;  %1235 = vmatprep.mubr.f32.mxu1 %v3051_v10  ;;  %2924 = vmatprep.mubr.msk.f32.mxu0 %vm327_vm1, %v3550_v1 }
 0x10e   : > { %v3853_v62 = vpop.f32.mrf.mxu0  ;;  %v3855_v63 = vpop.f32.mrf.mxu1 }
 0x10f   : > { %4928 = vst [vmem:[#allocation13_spill] sm:$0xff] %v3853_v62  ;;  %4929 = vst [vmem:[#allocation14_spill] sm:$0xff] %v3855_v63 }
 0x110   : > { %v3857_v59 = vpop.f32.mrf.mxu0  ;;  %v3859_v60 = vpop.f32.mrf.mxu1  ;;  %2630 = vmatmul.mubr.msk.f32.gmra.mxu1 %vm327_vm1, %v3164_v21  ;;  %2925 = vmatmul.mubr.msk.f32.gmra.mxu0 %vm327_vm1, %v3561_v2 }
 0x111   : > { %4930 = vst [vmem:[#allocation15_spill] sm:$0xff] %v3857_v59  ;;  %4931 = vst [vmem:[#allocation16_spill] sm:$0xff] %v3859_v60  ;;  %1241 = vmatprep.mubr.f32.mxu1 %v3051_v10  ;;  %2927 = vmatprep.mubr.msk.f32.mxu0 %vm327_vm1, %v3572_v3 }
 0x112   : > { %v3868_v0 = vpop.f32.mrf.mxu0  ;;  %v3870_v1 = vpop.f32.mrf.mxu1 }
 0x113   : > { %4932 = vst [vmem:[#allocation17_spill] sm:$0xff] %v3868_v0  ;;  %4933 = vst [vmem:[#allocation18_spill] sm:$0xff] %v3870_v1 }
 0x114   : > { %v3872_v63 = vpop.f32.mrf.mxu0  ;;  %v3874_v59 = vpop.f32.mrf.mxu1  ;;  %2631 = vmatmul.mubr.msk.f32.gmra.mxu1 %vm327_vm1, %v3186_v25  ;;  %2928 = vmatmul.mubr.msk.f32.gmra.mxu0 %vm327_vm1, %v3583_v4 }
 0x115   : > { %4934 = vst [vmem:[#allocation19_spill] sm:$0xff] %v3872_v63  ;;  %4935 = vst [vmem:[#allocation20_spill] sm:$0xff] %v3874_v59  ;;  %1247 = vmatprep.mubr.f32.mxu1 %v3051_v10  ;;  %2930 = vmatprep.mubr.msk.f32.mxu0 %vm327_vm1, %v3594_v5 }
 0x116   : > { %v3883_v2 = vpop.f32.mrf.mxu0  ;;  %v3885_v3 = vpop.f32.mrf.mxu1 }
 0x117   : > { %4936 = vst [vmem:[#allocation21_spill] sm:$0xff] %v3883_v2  ;;  %4937 = vst [vmem:[#allocation22_spill] sm:$0xff] %v3885_v3 }
 0x118   : > { %v3887_v1 = vpop.f32.mrf.mxu0  ;;  %v3889_v63 = vpop.f32.mrf.mxu1  ;;  %2632 = vmatmul.mubr.msk.f32.gmra.mxu1 %vm327_vm1, %v3203_v28  ;;  %2931 = vmatmul.mubr.msk.f32.gmra.mxu0 %vm327_vm1, %v3605_v6 }
 0x119   : > { %4938 = vst [vmem:[#allocation23_spill] sm:$0xff] %v3887_v1  ;;  %4939 = vst [vmem:[#allocation24_spill] sm:$0xff] %v3889_v63  ;;  %1253 = vmatprep.mubr.f32.mxu1 %v3051_v10  ;;  %2933 = vmatprep.mubr.msk.f32.mxu0 %vm327_vm1, %v3616_v7 }
 0x11a   : > { %v3898_v4 = vpop.f32.mrf.mxu0  ;;  %v3900_v5 = vpop.f32.mrf.mxu1 }
 0x11b   : > { %4940 = vst [vmem:[#allocation25_spill] sm:$0xff] %v3898_v4  ;;  %4941 = vst [vmem:[#allocation26_spill] sm:$0xff] %v3900_v5 }
 0x11c   : > { %v3902_v3 = vpop.f32.mrf.mxu0  ;;  %v3904_v1 = vpop.f32.mrf.mxu1  ;;  %2633 = vmatmul.mubr.msk.f32.gmra.mxu1 %vm327_vm1, %v3219_v30  ;;  %2934 = vmatmul.mubr.msk.f32.gmra.mxu0 %vm327_vm1, %v3627_v8 }
 0x11d   : > { %4942 = vst [vmem:[#allocation27_spill] sm:$0xff] %v3902_v3  ;;  %4943 = vst [vmem:[#allocation28_spill] sm:$0xff] %v3904_v1  ;;  %1259 = vmatprep.mubr.f32.mxu1 %v3051_v10  ;;  %2936 = vmatprep.mubr.msk.f32.mxu0 %vm327_vm1, %v3638_v9 }
 0x11e   : > { %v3913_v6 = vpop.f32.mrf.mxu0  ;;  %v3915_v7 = vpop.f32.mrf.mxu1 }
 0x11f   : > { %4944 = vst [vmem:[#allocation29_spill] sm:$0xff] %v3913_v6  ;;  %4945 = vst [vmem:[#allocation30_spill] sm:$0xff] %v3915_v7 }
 0x120   : > { %v3917_v5 = vpop.f32.mrf.mxu0  ;;  %v3919_v3 = vpop.f32.mrf.mxu1  ;;  %2634 = vmatmul.mubr.msk.f32.gmra.mxu1 %vm327_vm1, %v3235_v32  ;;  %2937 = vmatmul.mubr.msk.f32.gmra.mxu0 %vm327_vm1, %v3649_v11 }
 0x121   : > { %4946 = vst [vmem:[#allocation31_spill] sm:$0xff] %v3917_v5  ;;  %4947 = vst [vmem:[#allocation32_spill] sm:$0xff] %v3919_v3  ;;  %1265 = vmatprep.mubr.f32.mxu1 %v3051_v10  ;;  %2939 = vmatprep.mubr.msk.f32.mxu0 %vm327_vm1, %v3660_v12 }
 0x122   : > { %v3928_v8 = vpop.f32.mrf.mxu0  ;;  %v3930_v9 = vpop.f32.mrf.mxu1 }
 0x123   : > { %4948 = vst [vmem:[#allocation33_spill] sm:$0xff] %v3928_v8  ;;  %4949 = vst [vmem:[#allocation34_spill] sm:$0xff] %v3930_v9 }
 0x124   : > { %v3932_v7 = vpop.f32.mrf.mxu0  ;;  %v3934_v5 = vpop.f32.mrf.mxu1  ;;  %2635 = vmatmul.mubr.msk.f32.gmra.mxu1 %vm327_vm1, %v3251_v34  ;;  %2940 = vmatmul.mubr.msk.f32.gmra.mxu0 %vm327_vm1, %v3671_v13 }
 0x125   : > { %1271 = vmatprep.mubr.f32.mxu1 %v3051_v10  ;;  %2942 = vmatprep.mubr.msk.f32.mxu0 %vm327_vm1, %v3145_v16 }
 0x126   : > { %v3943_v11 = vpop.f32.mrf.mxu0  ;;  %v3945_v12 = vpop.f32.mrf.mxu1 }
 0x128   : > { %v3947_v9 = vpop.f32.mrf.mxu0  ;;  %v3949_v8 = vpop.f32.mrf.mxu1  ;;  %2636 = vmatmul.mubr.msk.f32.gmra.mxu1 %vm327_vm1, %v3267_v36  ;;  %2943 = vmatmul.mubr.msk.f32.gmra.mxu0 %vm327_vm1, %v3164_v21 }
 0x129   : > { %1277 = vmatprep.mubr.f32.mxu1 %v3051_v10  ;;  %2945 = vmatprep.mubr.msk.f32.mxu0 %vm327_vm1, %v3186_v25 }
 0x12a   : > { %v3958_v16 = vpop.f32.mrf.mxu0  ;;  %v3960_v13 = vpop.f32.mrf.mxu1 }
 0x12c   : > { %v3962_v3 = vpop.f32.mrf.mxu0  ;;  %v3964_v6 = vpop.f32.mrf.mxu1  ;;  %2637 = vmatmul.mubr.msk.f32.gmra.mxu1 %vm327_vm1, %v3283_v38  ;;  %2946 = vmatmul.mubr.msk.f32.gmra.mxu0 %vm327_vm1, %v3203_v28 }
 0x12d   : > { %1283 = vmatprep.mubr.f32.mxu1 %v3051_v10  ;;  %2948 = vmatprep.mubr.msk.f32.mxu0 %vm327_vm1, %v3219_v30 }
 0x12e   : > { %v3973_v21 = vpop.f32.mrf.mxu0  ;;  %v3975_v25 = vpop.f32.mrf.mxu1 }
 0x130   : > { %v3977_v1 = vpop.f32.mrf.mxu0  ;;  %v3979_v4 = vpop.f32.mrf.mxu1  ;;  %2638 = vmatmul.mubr.msk.f32.gmra.mxu1 %vm327_vm1, %v3299_v40  ;;  %2949 = vmatmul.mubr.msk.f32.gmra.mxu0 %vm327_vm1, %v3235_v32 }
 0x131   : > { %1289 = vmatprep.mubr.f32.mxu1 %v3051_v10  ;;  %2951 = vmatprep.mubr.msk.f32.mxu0 %vm327_vm1, %v3251_v34 }
 0x132   : > { %v3988_v28 = vpop.f32.mrf.mxu0  ;;  %v3990_v30 = vpop.f32.mrf.mxu1 }
 0x134   : > { %v3992_v63 = vpop.f32.mrf.mxu0  ;;  %v3994_v2 = vpop.f32.mrf.mxu1  ;;  %2639 = vmatmul.mubr.msk.f32.gmra.mxu1 %vm327_vm1, %v3315_v42  ;;  %2952 = vmatmul.mubr.msk.f32.gmra.mxu0 %vm327_vm1, %v3267_v36 }
 0x135   : > { %1295 = vmatprep.mubr.f32.mxu1 %v3051_v10  ;;  %2954 = vmatprep.mubr.msk.f32.mxu0 %vm327_vm1, %v3283_v38 }
 0x136   : > { %v4003_v32 = vpop.f32.mrf.mxu0  ;;  %v4005_v34 = vpop.f32.mrf.mxu1 }
 0x138   : > { %v4007_v59 = vpop.f32.mrf.mxu0  ;;  %v4009_v0 = vpop.f32.mrf.mxu1  ;;  %2640 = vmatmul.mubr.msk.f32.gmra.mxu1 %vm327_vm1, %v3331_v44  ;;  %2955 = vmatmul.mubr.msk.f32.gmra.mxu0 %vm327_vm1, %v3299_v40 }
 0x139   : > { %1301 = vmatprep.mubr.f32.mxu1 %v3051_v10  ;;  %2957 = vmatprep.mubr.msk.f32.mxu0 %vm327_vm1, %v3315_v42 }
 0x13a   : > { %v4018_v36 = vpop.f32.mrf.mxu0  ;;  %v4020_v38 = vpop.f32.mrf.mxu1 }
 0x13c   : > { %v4022_v60 = vpop.f32.mrf.mxu0  ;;  %v4024_v62 = vpop.f32.mrf.mxu1  ;;  %2641 = vmatmul.mubr.msk.f32.gmra.mxu1 %vm327_vm1, %v3347_v46  ;;  %2958 = vmatmul.mubr.msk.f32.gmra.mxu0 %vm327_vm1, %v3331_v44 }
 0x13d   : > { %4950 = vst [vmem:[#allocation35_spill] sm:$0xff] %v4024_v62  ;;  %1307 = vmatprep.mubr.f32.mxu1 %v3051_v10  ;;  %2960 = vmatprep.mubr.msk.f32.mxu0 %vm327_vm1, %v3347_v46  ;;  %v1660_v62 = vmax.f32 %v3733_v17, %v3943_v11  ;;  %v1665_v11 = vmax.f32 %v3748_v22, %v3958_v16 }
 0x13e   : > { %v4033_v40 = vpop.f32.mrf.mxu0  ;;  %v4035_v42 = vpop.f32.mrf.mxu1 }
 0x13f   : > { %4951 = vst [vmem:[#allocation36_spill] sm:$0xff] %v4033_v40  ;;  %4952 = vst [vmem:[#allocation37_spill] sm:$0xff] %v4035_v42 }
 0x140   : > { %v4037_v61 = vpop.f32.mrf.mxu0  ;;  %v4039_v58 = vpop.f32.mrf.mxu1  ;;  %2642 = vmatmul.mubr.msk.f32.gmra.mxu1 %vm327_vm1, %v3363_v48  ;;  %2961 = vmatmul.mubr.msk.f32.gmra.mxu0 %vm327_vm1, %v3363_v48 }
 0x141   : > { %4953 = vst [vmem:[#allocation38_spill] sm:$0xff] %v4037_v61  ;;  %4954 = vst [vmem:[#allocation39_spill] sm:$0xff] %v4039_v58 }
 0x142   : > { %v4045_v44 = vpop.f32.mrf.mxu0  ;;  %v4047_v10 = vpop.f32.mrf.mxu1 }
 0x143   : > { %4955 = vst [vmem:[#allocation40_spill] sm:$0xff] %v4045_v44  ;;  %4956 = vst [vmem:[#allocation41_spill] sm:$0xff] %v4047_v10  ;;  %v1659_v44 = vmax.f32 %v3722_v14, %v3932_v7 }
 0x144   : > { %v4049_v46 = vpop.f32.mrf.mxu0  ;;  %v4051_v57 = vpop.f32.mrf.mxu1 }
 0x145   : > { %4957 = vst [vmem:[#allocation42_spill] sm:$0xff] %v4049_v46  ;;  %4958 = vst [vmem:[#allocation43_spill] sm:$0xff] %v4051_v57 }
 0x146   : > { %v4053_v56 = vpop.f32.mrf.mxu0  ;;  %v4055_v42 = vpop.f32.mrf.mxu1 }
 0x147   : > { %4959 = vst [vmem:[#allocation44_spill] sm:$0xff] %v4053_v56  ;;  %4960 = vst [vmem:[#allocation45_spill] sm:$0xff] %v4055_v42 }
 0x148   : > { %v4057_v61 = vpop.f32.mrf.mxu0  ;;  %v4059_v58 = vpop.f32.mrf.mxu1 }
 0x149   : > { %4961 = vst [vmem:[#allocation46_spill] sm:$0xff] %v4057_v61  ;;  %4962 = vst [vmem:[#allocation47_spill] sm:$0xff] %v4059_v58  ;;  %v1871_v61 = vlaneseq }
 0x14a   : > { %v4061_v55 = vpop.f32.mrf.mxu0  ;;  %v4063_v54 = vpop.f32.mrf.mxu1 }
 0x14b   : > { %4963 = vst [vmem:[#allocation48_spill] sm:$0xff] %v4061_v55  ;;  %4964 = vst [vmem:[#allocation49_spill] sm:$0xff] %v4063_v54 }
 0x14c   : > { %v4066_v48 = vpop.f32.mrf.mxu0  ;;  %v4068_v10 = vpop.f32.mrf.mxu1 }
 0x14d   : > { %4965 = vst [vmem:[#allocation50_spill] sm:$0xff] %v4066_v48  ;;  %4966 = vst [vmem:[#allocation51_spill] sm:$0xff] %v4068_v10  ;;  %v4086_v10 = vshrl.u32 %v1871_v61, 7  ;;  %v4104_v61 = vld [vmem:[%s257_s19] sm:$0x1f] }
 0x14e   : > { %v4070_v46 = vpop.f32.mrf.mxu0  ;;  %v4072_v57 = vpop.f32.mrf.mxu1 }
 0x14f   : > { %4967 = vst [vmem:[#allocation52_spill] sm:$0xff] %v4070_v46  ;;  %4968 = vst [vmem:[#allocation53_spill] sm:$0xff] %v4072_v57 }
 0x150   : > { %v4074_v56 = vpop.f32.mrf.mxu0  ;;  %v4076_v42 = vpop.f32.mrf.mxu1  ;;  %4975 = vst [vmem:[#allocation60_spill] sm:$0xff] %v4086_v10 }
 0x151   : > { %4969 = vst [vmem:[#allocation54_spill] sm:$0xff] %v4074_v56  ;;  %4970 = vst [vmem:[#allocation55_spill] sm:$0xff] %v4076_v42 }
 0x152   : > { %v4078_v58 = vpop.f32.mrf.mxu0  ;;  %v4080_v55 = vpop.f32.mrf.mxu1 }
 0x153   : > { %4971 = vst [vmem:[#allocation56_spill] sm:$0xff] %v4078_v58  ;;  %4972 = vst [vmem:[#allocation57_spill] sm:$0xff] %v4080_v55  ;;  %v1873_v55 = vsub.s32 0, %v4086_v10 }
 0x154   : > { %v4082_v54 = vpop.f32.mrf.mxu0  ;;  %v4084_v48 = vpop.f32.mrf.mxu1 }
 0x155   : > { %4973 = vst [vmem:[#allocation58_spill] sm:$0xff] %v4082_v54  ;;  %4974 = vst [vmem:[#allocation59_spill] sm:$0xff] %v4084_v48 }
 0x156   : > { %v4088_v46 = vpop.f32.mrf.mxu0  ;;  %v4090_v57 = vpop.f32.mrf.mxu1 }
 0x157   : > { %4976 = vst [vmem:[#allocation61_spill] sm:$0xff] %v4088_v46  ;;  %4977 = vst [vmem:[#allocation62_spill] sm:$0xff] %v4090_v57  ;;  %v1877_v46 = vsub.s32 1, %v4086_v10 }
 0x158   : > { %v4095_v42 = vpop.f32.mrf.mxu0  ;;  %v4097_v58 = vpop.f32.mrf.mxu1 }
 0x159   : > { %4978 = vst [vmem:[#allocation63_spill] sm:$0xff] %v4095_v42  ;;  %4979 = vst [vmem:[#allocation64_spill] sm:$0xff] %v4097_v58  ;;  %v4113_v58 = vrot.slane %v4104_v61, %v1873_v55  ;;  %v4118_v40 = vrot.slane %v4104_v61, %v1877_v46  ;;  %v1664_v55 = vmax.f32 %v3737_v19, %v3947_v9 }
 0x15a   : > { %v4100_v56 = vpop.f32.mrf.mxu0  ;;  %v4102_v54 = vpop.f32.mrf.mxu1 }
 0x15b   : > { %4980 = vst [vmem:[#allocation65_spill] sm:$0xff] %v4100_v56  ;;  %4981 = vst [vmem:[#allocation66_spill] sm:$0xff] %v4102_v54 }
 0x15c   : > { %v746_v48 = vpop.f32.mrf.mxu0  ;;  %v4107_v57 = vpop.f32.mrf.mxu1 }
 0x15d   : > { %4982 = vst [vmem:[#allocation67_spill] sm:$0xff] %v4107_v57  ;;  %v1729_v42 = vmax.f32 %v746_v48, %v3724_v15 }
 0x15e   : > { %v748_v54 = vpop.f32.mrf.mxu0  ;;  %v4120_v10 = vpop.f32.mrf.mxu1 }
 0x15f   : > { %v1799_v53 = vmax.f32 %v1659_v44, %v1729_v42  ;;  %v1730_v14 = vmax.f32 %v748_v54, %v3735_v18 }
 0x160   : > { %v752_v7 = vpop.f32.mrf.mxu0  ;;  %v4129_v48 = vpop.f32.mrf.mxu1 }
 0x161   : > { %v1896_v46 = vadd.f32 %v4113_v58, %v1799_v53  ;;  %v1800_v56 = vmax.f32 %v1660_v62, %v1730_v14  ;;  %v1734_v57 = vmax.f32 %v752_v7, %v3739_v20  ;;  %v1669_v53 = vmax.f32 %v3752_v24, %v3962_v3 }
 0x162   : > { %v754_v18 = vpop.f32.mrf.mxu0  ;;  %v4137_v54 = vpop.f32.mrf.mxu1 }
 0x163   : > { %v1897_v19 = vadd.f32 %v4118_v40, %v1800_v56  ;;  %v1804_v9 = vmax.f32 %v1664_v55, %v1734_v57  ;;  %v1735_v42 = vmax.f32 %v754_v18, %v3750_v23  ;;  %v1966_v20 = vmax.f32 %v1896_v46, 0.0  ;;  %v5021_v56 = vld [vmem:[#allocation19_spill] sm:$0xff] }
 0x164   : > { %v758_v44 = vpop.f32.mrf.mxu0  ;;  %v4147_v14 = vpop.f32.mrf.mxu1  ;;  %v1670_v55 = vmax.f32 %v3763_v27, %v3973_v21  ;;  %v1674_v46 = vmax.f32 %v3767_v31, %v3977_v1 }
 0x165   : > { %v1967_v7 = vmax.f32 %v1897_v19, 0.0  ;;  %v1901_v17 = vadd.f32 %v4113_v58, %v1804_v9  ;;  %v1805_v15 = vmax.f32 %v1665_v11, %v1735_v42  ;;  %v1739_v22 = vmax.f32 %v758_v44, %v3754_v26 }
 0x166   : > { %v760_v23 = vpop.f32.mrf.mxu0  ;;  %v4153_v57 = vpop.f32.mrf.mxu1 }
 0x167   : > { %v2774_v24 = vpack.c.bf16 %v1967_v7, %v1966_v20  ;;  %v1902_v3 = vadd.f32 %v4118_v40, %v1805_v15  ;;  %v1809_v16 = vmax.f32 %v1669_v53, %v1739_v22  ;;  %v1740_v18 = vmax.f32 %v760_v23, %v3765_v29 }
 0x168   : > { %v764_v11 = vpop.f32.mrf.mxu0  ;;  %v4163_v19 = vpop.f32.mrf.mxu1  ;;  %v1971_v15 = vmax.f32 %v1901_v17, 0.0  ;;  %v1675_v53 = vmax.f32 %v3778_v35, %v3988_v28  ;;  %v1679_v7 = vmax.f32 %v3782_v39, %v3992_v63 }
 0x169   : > { %2260 = vst [vmem:[%s4165_s12] sm:$0xff] %v2774_v24  ;;  %v1972_v9 = vmax.f32 %v1902_v3, 0.0  ;;  %v1744_v27 = vmax.f32 %v764_v11, %v3769_v33  ;;  %v1906_v29 = vadd.f32 %v4113_v58, %v1809_v16  ;;  %v1810_v1 = vmax.f32 %v1670_v55, %v1740_v18 }
 0x16a   : > { %v766_v21 = vpop.f32.mrf.mxu0  ;;  %v4172_v42 = vpop.f32.mrf.mxu1 }
 0x16b   : > { %v2777_v20 = vpack.c.bf16 %v1972_v9, %v1971_v15  ;;  %v1814_v44 = vmax.f32 %v1674_v46, %v1744_v27  ;;  %v1745_v17 = vmax.f32 %v766_v21, %v3780_v37  ;;  %v1907_v33 = vadd.f32 %v4118_v40, %v1810_v1 }
 0x16c   : > { %v770_v23 = vpop.f32.mrf.mxu0  ;;  %v4182_v24 = vpop.f32.mrf.mxu1  ;;  %v1976_v28 = vmax.f32 %v1906_v29, 0.0  ;;  %v1680_v46 = vmax.f32 %v3793_v43, %v4003_v32 }
 0x16d   : > { %2263 = vst [vmem:[%s4165_s12 + $0x14] sm:$0xff] %v2777_v20  ;;  %v1911_v3 = vadd.f32 %v4113_v58, %v1814_v44  ;;  %v1815_v16 = vmax.f32 %v1675_v53, %v1745_v17  ;;  %v1749_v35 = vmax.f32 %v770_v23, %v3784_v41  ;;  %v1977_v55 = vmax.f32 %v1907_v33, 0.0 }
 0x16e   : > { %v772_v39 = vpop.f32.mrf.mxu0  ;;  %v4189_v63 = vpop.f32.mrf.mxu1  ;;  %v1684_v41 = vmax.f32 %v3797_v47, %v4007_v59  ;;  %v1685_v33 = vmax.f32 %v3808_v50, %v4018_v36  ;;  %v1689_v23 = vmax.f32 %v3812_v52, %v4022_v60 }
 0x16f   : > { %v1912_v18 = vadd.f32 %v4118_v40, %v1815_v16  ;;  %v1819_v11 = vmax.f32 %v1679_v7, %v1749_v35  ;;  %v1750_v15 = vmax.f32 %v772_v39, %v3795_v45  ;;  %v2780_v9 = vpack.c.bf16 %v1977_v55, %v1976_v28  ;;  %v4984_v39 = vld [vmem:[#allocation4_spill] sm:$0xff] }
 0x170   : > { %v1981_v27 = vmax.f32 %v1911_v3, 0.0  ;;  %v776_v1 = vpop.f32.mrf.mxu0  ;;  %v4199_v21 = vpop.f32.mrf.mxu1 }
 0x171   : > { %v1982_v53 = vmax.f32 %v1912_v18, 0.0  ;;  %v1916_v20 = vadd.f32 %v4113_v58, %v1819_v11  ;;  %v1820_v43 = vmax.f32 %v1680_v46, %v1750_v15  ;;  %v1754_v32 = vmax.f32 %v776_v1, %v3799_v49  ;;  %2266 = vst [vmem:[%s4165_s12 + $0x28] sm:$0xff] %v2780_v9  ;;  %v4987_v11 = vld [vmem:[#allocation36_spill] sm:$0xff]  ;;  %v4988_v15 = vld [vmem:[#allocation5_spill] sm:$0xff]  ;;  %v4989_v1 = vld [vmem:[#allocation6_spill] sm:$0xff] }
 0x172   : > { %v778_v47 = vpop.f32.mrf.mxu0  ;;  %v4206_v59 = vpop.f32.mrf.mxu1 }
 0x173   : > { %v2783_v44 = vpack.c.bf16 %v1982_v53, %v1981_v27  ;;  %v1917_v17 = vadd.f32 %v4118_v40, %v1820_v43  ;;  %v1824_v7 = vmax.f32 %v1684_v41, %v1754_v32  ;;  %v1755_v3 = vmax.f32 %v778_v47, %v3810_v51  ;;  %v4991_v43 = vld [vmem:[#allocation7_spill] sm:$0xff] }
 0x174   : > { %v782_v16 = vpop.f32.mrf.mxu0  ;;  %v4216_v35 = vpop.f32.mrf.mxu1  ;;  %v1986_v28 = vmax.f32 %v1916_v20, 0.0  ;;  %v1690_v41 = vmax.f32 %v4988_v15, %v4987_v11  ;;  %v4990_v20 = vld [vmem:[#allocation38_spill] sm:$0xff]  ;;  %v4997_v15 = vld [vmem:[#allocation40_spill] sm:$0xff] }
 0x175   : > { %4983 = vst [vmem:[#allocation68_spill] sm:$0xff] %v4216_v35  ;;  %2269 = vst [vmem:[%s4165_s12 + $0x3c] sm:$0xff] %v2783_v44  ;;  %v1987_v55 = vmax.f32 %v1917_v17, 0.0  ;;  %v1759_v46 = vmax.f32 %v782_v16, %v4984_v39  ;;  %v1921_v36 = vadd.f32 %v4113_v58, %v1824_v7  ;;  %v1825_v52 = vmax.f32 %v1685_v33, %v1755_v3  ;;  %v4994_v39 = vld [vmem:[#allocation8_spill] sm:$0xff]  ;;  %v4999_v17 = vld [vmem:[#allocation10_spill] sm:$0xff] }
 0x176   : > { %v784_v60 = vpop.f32.mrf.mxu0  ;;  %v4223_v51 = vpop.f32.mrf.mxu1  ;;  %v1694_v32 = vmax.f32 %v4991_v43, %v4990_v20 }
 0x177   : > { %4986 = vst [vmem:[#allocation4_spill] sm:$0xff] %v4223_v51  ;;  %v2786_v9 = vpack.c.bf16 %v1987_v55, %v1986_v28  ;;  %v1829_v27 = vmax.f32 %v1689_v23, %v1759_v46  ;;  %v1760_v53 = vmax.f32 %v784_v60, %v4989_v1  ;;  %v1922_v47 = vadd.f32 %v4118_v40, %v1825_v52  ;;  %v4998_v1 = vld [vmem:[#allocation9_spill] sm:$0xff] }
 0x178   : > { %v788_v7 = vpop.f32.mrf.mxu0  ;;  %v4233_v33 = vpop.f32.mrf.mxu1  ;;  %v1991_v46 = vmax.f32 %v1921_v36, 0.0  ;;  %v1695_v20 = vmax.f32 %v4998_v1, %v4997_v15 }
 0x179   : > { %4993 = vst [vmem:[#allocation36_spill] sm:$0xff] %v4233_v33  ;;  %2272 = vst [vmem:[%s4165_s12 + $0x50] sm:$0xff] %v2786_v9  ;;  %v1926_v3 = vadd.f32 %v4113_v58, %v1829_v27  ;;  %v1830_v16 = vmax.f32 %v1690_v41, %v1760_v53  ;;  %v1764_v28 = vmax.f32 %v788_v7, %v4994_v39  ;;  %v1992_v60 = vmax.f32 %v1922_v47, 0.0  ;;  %v5000_v41 = vld [vmem:[#allocation42_spill] sm:$0xff]  ;;  %v5001_v53 = vld [vmem:[#allocation11_spill] sm:$0xff] }
 0x17a   : > { %v790_v11 = vpop.f32.mrf.mxu0  ;;  %v4240_v52 = vpop.f32.mrf.mxu1  ;;  %v1699_v7 = vmax.f32 %v5001_v53, %v5000_v41  ;;  %v5007_v41 = vld [vmem:[#allocation44_spill] sm:$0xff]  ;;  %v5008_v53 = vld [vmem:[#allocation13_spill] sm:$0xff]  ;;  %v5009_v47 = vld [vmem:[#allocation46_spill] sm:$0xff] }
 0x17b   : > { %4996 = vst [vmem:[#allocation5_spill] sm:$0xff] %v4240_v52  ;;  %v1927_v43 = vadd.f32 %v4118_v40, %v1830_v16  ;;  %v1834_v9 = vmax.f32 %v1694_v32, %v1764_v28  ;;  %v1765_v27 = vmax.f32 %v790_v11, %v4999_v17  ;;  %v2789_v39 = vpack.c.bf16 %v1992_v60, %v1991_v46  ;;  %v5004_v16 = vld [vmem:[#allocation12_spill] sm:$0xff] }
 0x17c   : > { %v1996_v50 = vmax.f32 %v1926_v3, 0.0  ;;  %v794_v55 = vpop.f32.mrf.mxu0  ;;  %v4250_v49 = vpop.f32.mrf.mxu1 }
 0x17d   : > { %5003 = vst [vmem:[#allocation6_spill] sm:$0xff] %v4250_v49  ;;  %v1997_v45 = vmax.f32 %v1927_v43, 0.0  ;;  %v1931_v29 = vadd.f32 %v4113_v58, %v1834_v9  ;;  %v1835_v15 = vmax.f32 %v1695_v20, %v1765_v27  ;;  %v1769_v32 = vmax.f32 %v794_v55, %v5004_v16  ;;  %2275 = vst [vmem:[%s4165_s12 + $0x64] sm:$0xff] %v2789_v39  ;;  %v5010_v9 = vld [vmem:[#allocation15_spill] sm:$0xff]  ;;  %v5011_v20 = vld [vmem:[#allocation14_spill] sm:$0xff] }
 0x17e   : > { %v796_v11 = vpop.f32.mrf.mxu0  ;;  %v4257_v46 = vpop.f32.mrf.mxu1  ;;  %v1700_v43 = vmax.f32 %v5008_v53, %v5007_v41  ;;  %v1704_v37 = vmax.f32 %v5010_v9, %v5009_v47  ;;  %v5017_v9 = vld [vmem:[#allocation48_spill] sm:$0xff] }
 0x17f   : > { %5006 = vst [vmem:[#allocation38_spill] sm:$0xff] %v4257_v46  ;;  %v2792_v3 = vpack.c.bf16 %v1997_v45, %v1996_v50  ;;  %v1932_v60 = vadd.f32 %v4118_v40, %v1835_v15  ;;  %v1839_v1 = vmax.f32 %v1699_v7, %v1769_v32  ;;  %v1770_v27 = vmax.f32 %v796_v11, %v5011_v20  ;;  %v5014_v50 = vld [vmem:[#allocation16_spill] sm:$0xff]  ;;  %v5018_v20 = vld [vmem:[#allocation17_spill] sm:$0xff] }
 0x180   : > { %v800_v16 = vpop.f32.mrf.mxu0  ;;  %v4267_v28 = vpop.f32.mrf.mxu1  ;;  %v2001_v22 = vmax.f32 %v1931_v29, 0.0  ;;  %v1705_v39 = vmax.f32 %v5018_v20, %v5017_v9  ;;  %v5024_v9 = vld [vmem:[#allocation20_spill] sm:$0xff] }
 0x181   : > { %5013 = vst [vmem:[#allocation7_spill] sm:$0xff] %v4267_v28  ;;  %2278 = vst [vmem:[%s4165_s12 + $0x78] sm:$0xff] %v2792_v3  ;;  %v2002_v45 = vmax.f32 %v1932_v60, 0.0  ;;  %v1774_v7 = vmax.f32 %v800_v16, %v5014_v50  ;;  %v1936_v41 = vadd.f32 %v4113_v58, %v1839_v1  ;;  %v1840_v47 = vmax.f32 %v1700_v43, %v1770_v27  ;;  %v5019_v3 = vld [vmem:[#allocation18_spill] sm:$0xff]  ;;  %v5027_v20 = vld [vmem:[#allocation52_spill] sm:$0xff] }
 0x182   : > { %v802_v53 = vpop.f32.mrf.mxu0  ;;  %v4274_v11 = vpop.f32.mrf.mxu1  ;;  %v5020_v60 = vld [vmem:[#allocation50_spill] sm:$0xff] }
 0x183   : > { %5016 = vst [vmem:[#allocation8_spill] sm:$0xff] %v4274_v11  ;;  %v2795_v31 = vpack.c.bf16 %v2002_v45, %v2001_v22  ;;  %v1844_v26 = vmax.f32 %v1704_v37, %v1774_v7  ;;  %v1775_v29 = vmax.f32 %v802_v53, %v5019_v3  ;;  %v1709_v62 = vmax.f32 %v5021_v56, %v5020_v60  ;;  %v5028_v3 = vld [vmem:[#allocation21_spill] sm:$0xff]  ;;  %v5029_v11 = vld [vmem:[#allocation22_spill] sm:$0xff] }
 0x184   : > { %v1937_v16 = vadd.f32 %v4118_v40, %v1840_v47  ;;  %v806_v1 = vpop.f32.mrf.mxu0  ;;  %v4284_v43 = vpop.f32.mrf.mxu1  ;;  %v2006_v7 = vmax.f32 %v1936_v41, 0.0  ;;  %v1710_v60 = vmax.f32 %v5028_v3, %v5027_v20 }
 0x185   : > { %5023 = vst [vmem:[#allocation40_spill] sm:$0xff] %v4284_v43  ;;  %2281 = vst [vmem:[%s4165_s12 + $0x8c] sm:$0xff] %v2795_v31  ;;  %v1941_v27 = vadd.f32 %v4113_v58, %v1844_v26  ;;  %v1845_v28 = vmax.f32 %v1705_v39, %v1775_v29  ;;  %v1779_v22 = vmax.f32 %v806_v1, %v5024_v9  ;;  %v5030_v39 = vld [vmem:[#allocation54_spill] sm:$0xff]  ;;  %v5031_v29 = vld [vmem:[#allocation23_spill] sm:$0xff] }
 0x186   : > { %v2007_v53 = vmax.f32 %v1937_v16, 0.0  ;;  %v808_v56 = vpop.f32.mrf.mxu0  ;;  %v4291_v47 = vpop.f32.mrf.mxu1  ;;  %v1714_v1 = vmax.f32 %v5031_v29, %v5030_v39  ;;  %v5037_v39 = vld [vmem:[#allocation56_spill] sm:$0xff]  ;;  %v5038_v29 = vld [vmem:[#allocation25_spill] sm:$0xff]  ;;  %v5039_v16 = vld [vmem:[#allocation58_spill] sm:$0xff] }
 0x187   : > { %5026 = vst [vmem:[#allocation9_spill] sm:$0xff] %v4291_v47  ;;  %v1942_v32 = vadd.f32 %v4118_v40, %v1845_v28  ;;  %v1849_v31 = vmax.f32 %v1709_v62, %v1779_v22  ;;  %v1780_v26 = vmax.f32 %v808_v56, %v5029_v11  ;;  %v2011_v50 = vmax.f32 %v1941_v27, 0.0  ;;  %v5034_v28 = vld [vmem:[#allocation24_spill] sm:$0xff]  ;;  %v5051_v11 = vld [vmem:[#allocation31_spill] sm:$0xff] }
 0x188   : > { %v2798_v9 = vpack.c.bf16 %v2007_v53, %v2006_v7  ;;  %v812_v45 = vpop.f32.mrf.mxu0  ;;  %v4301_v43 = vpop.f32.mrf.mxu1 }
 0x189   : > { %5033 = vst [vmem:[#allocation10_spill] sm:$0xff] %v4301_v43  ;;  %v2012_v37 = vmax.f32 %v1942_v32, 0.0  ;;  %v1946_v15 = vadd.f32 %v4113_v58, %v1849_v31  ;;  %v1850_v20 = vmax.f32 %v1710_v60, %v1780_v26  ;;  %v1784_v62 = vmax.f32 %v812_v45, %v5034_v28  ;;  %v5040_v31 = vld [vmem:[#allocation27_spill] sm:$0xff]  ;;  %v5041_v60 = vld [vmem:[#allocation26_spill] sm:$0xff] }
 0x18a   : > { %2284 = vst [vmem:[%s4165_s12 + $0xa0] sm:$0xff] %v2798_v9  ;;  %v814_v56 = vpop.f32.mrf.mxu0  ;;  %v4308_v7 = vpop.f32.mrf.mxu1  ;;  %v1715_v32 = vmax.f32 %v5038_v29, %v5037_v39  ;;  %v1719_v47 = vmax.f32 %v5040_v31, %v5039_v16  ;;  %v5047_v31 = vld [vmem:[#allocation61_spill] sm:$0xff] }
 0x18b   : > { %5036 = vst [vmem:[#allocation42_spill] sm:$0xff] %v4308_v7  ;;  %v2801_v27 = vpack.c.bf16 %v2012_v37, %v2011_v50  ;;  %v1947_v53 = vadd.f32 %v4118_v40, %v1850_v20  ;;  %v1854_v3 = vmax.f32 %v1714_v1, %v1784_v62  ;;  %v1785_v26 = vmax.f32 %v814_v56, %v5041_v60  ;;  %v5044_v37 = vld [vmem:[#allocation28_spill] sm:$0xff]  ;;  %v5048_v60 = vld [vmem:[#allocation29_spill] sm:$0xff] }
 0x18c   : > { %v818_v28 = vpop.f32.mrf.mxu0  ;;  %v4318_v22 = vpop.f32.mrf.mxu1  ;;  %v2016_v43 = vmax.f32 %v1946_v15, 0.0  ;;  %v1720_v9 = vmax.f32 %v5048_v60, %v5047_v31  ;;  %v5054_v31 = vld [vmem:[#allocation32_spill] sm:$0xff]  ;;  %v5057_v60 = vld [vmem:[#allocation65_spill] sm:$0xff] }
 0x18d   : > { %5043 = vst [vmem:[#allocation11_spill] sm:$0xff] %v4318_v22  ;;  %2287 = vst [vmem:[%s4165_s12 + $0xb4] sm:$0xff] %v2801_v27  ;;  %v2017_v50 = vmax.f32 %v1947_v53, 0.0  ;;  %v1789_v1 = vmax.f32 %v818_v28, %v5044_v37  ;;  %v1951_v39 = vadd.f32 %v4113_v58, %v1854_v3  ;;  %v1855_v16 = vmax.f32 %v1715_v32, %v1785_v26  ;;  %v5049_v27 = vld [vmem:[#allocation30_spill] sm:$0xff]  ;;  %v5050_v53 = vld [vmem:[#allocation63_spill] sm:$0xff] }
 0x18e   : > { %v820_v29 = vpop.f32.mrf.mxu0  ;;  %v4325_v56 = vpop.f32.mrf.mxu1  ;;  %v1724_v41 = vmax.f32 %v5051_v11, %v5050_v53 }
 0x18f   : > { %5046 = vst [vmem:[#allocation12_spill] sm:$0xff] %v4325_v56  ;;  %v2804_v7 = vpack.c.bf16 %v2017_v50, %v2016_v43  ;;  %v1859_v45 = vmax.f32 %v1719_v47, %v1789_v1  ;;  %v1790_v15 = vmax.f32 %v820_v29, %v5049_v27  ;;  %v1952_v28 = vadd.f32 %v4118_v40, %v1855_v16  ;;  %v5058_v27 = vld [vmem:[#allocation33_spill] sm:$0xff]  ;;  %v5059_v56 = vld [vmem:[#allocation34_spill] sm:$0xff] }
 0x190   : > { %v824_v3 = vpop.f32.mrf.mxu0  ;;  %v4335_v32 = vpop.f32.mrf.mxu1  ;;  %v2021_v1 = vmax.f32 %v1951_v39, 0.0  ;;  %v1725_v53 = vmax.f32 %v5058_v27, %v5057_v60 }
 0x191   : > { %5053 = vst [vmem:[#allocation44_spill] sm:$0xff] %v4335_v32  ;;  %2290 = vst [vmem:[%s4165_s12 + $0xc8] sm:$0xff] %v2804_v7  ;;  %v1956_v26 = vadd.f32 %v4113_v58, %v1859_v45  ;;  %v1860_v22 = vmax.f32 %v1720_v9, %v1790_v15  ;;  %v1794_v43 = vmax.f32 %v824_v3, %v5054_v31  ;;  %v2022_v11 = vmax.f32 %v1952_v28, 0.0 }
 0x192   : > { %v826_v29 = vpop.f32.mrf.mxu0  ;;  %v4342_v16 = vpop.f32.mrf.mxu1 }
 0x193   : > { %5056 = vst [vmem:[#allocation13_spill] sm:$0xff] %v4342_v16  ;;  %v1957_v62 = vadd.f32 %v4118_v40, %v1860_v22  ;;  %v1864_v7 = vmax.f32 %v1724_v41, %v1794_v43  ;;  %v1795_v45 = vmax.f32 %v826_v29, %v5059_v56  ;;  %v2807_v9 = vpack.c.bf16 %v2022_v11, %v2021_v1 }
 0x194   : > { %v4350_v31 = vpop.f32.mrf.mxu1  ;;  %v4352_v39 = vpop.f32.mrf.mxu0  ;;  %v2026_v28 = vmax.f32 %v1956_v26, 0.0 }
 0x195   : > { %v2027_v50 = vmax.f32 %v1957_v62, 0.0  ;;  %v1961_v32 = vadd.f32 %v4113_v58, %v1864_v7  ;;  %v1865_v47 = vmax.f32 %v1725_v53, %v1795_v45  ;;  %2293 = vst [vmem:[%s4165_s12 + $0xdc] sm:$0xff] %v2807_v9 }
 0x196   : > { %v4356_v22 = vpop.f32.mrf.mxu1  ;;  %v4358_v41 = vpop.f32.mrf.mxu0 }
 0x197   : > { %v2810_v56 = vpack.c.bf16 %v2027_v50, %v2026_v28  ;;  %v1962_v43 = vadd.f32 %v4118_v40, %v1865_v47  ;;  %v2031_v29 = vmax.f32 %v1961_v32, 0.0 }
 0x198   : > { %v4361_v1 = vpop.f32.mrf.mxu1  ;;  %v4363_v11 = vpop.f32.mrf.mxu0 }
 0x199   : > { %2296 = vst [vmem:[%s4165_s12 + $0xf0] sm:$0xff] %v2810_v56  ;;  %v2032_v26 = vmax.f32 %v1962_v43, 0.0 }
 0x19a   : > { %v4366_v62 = vpop.f32.mrf.mxu1  ;;  %v4368_v58 = vpop.f32.mrf.mxu0 }
 0x19b   : > { %v2813_v60 = vpack.c.bf16 %v2032_v26, %v2031_v29 }
 0x19c   : > { %v4370_v27 = vpop.f32.mrf.mxu1  ;;  %v4372_v53 = vpop.f32.mrf.mxu0 }
 0x19d   : > { %2299 = vst [vmem:[%s4165_s12 + $0x104] sm:$0xff] %v2813_v60 }
 0x19e   : > { %v4375_v50 = vpop.f32.mrf.mxu1  ;;  %v4377_v40 = vpop.f32.mrf.mxu0 }
 0x19f   : > { %5061 = vst [vmem:[#allocation46_spill] sm:$0xff] %v4377_v40 }
 0x1a0   : > { %v4379_v47 = vpop.f32.mrf.mxu1  ;;  %v4381_v7 = vpop.f32.mrf.mxu0 }
 0x1a1   : > { %5062 = vst [vmem:[#allocation15_spill] sm:$0xff] %v4381_v7 }
 0x1a2   : > { %v4383_v32 = vpop.f32.mrf.mxu1  ;;  %v4385_v45 = vpop.f32.mrf.mxu0 }
 0x1a3   : > { %5063 = vst [vmem:[#allocation14_spill] sm:$0xff] %v4385_v45 }
 0x1a4   : > { %v4387_v9 = vpop.f32.mrf.mxu1  ;;  %v4389_v28 = vpop.f32.mrf.mxu0 }
 0x1a5   : > { %5064 = vst [vmem:[#allocation16_spill] sm:$0xff] %v4389_v28 }
 0x1a6   : > { %v4391_v56 = vpop.f32.mrf.mxu1  ;;  %v4393_v43 = vpop.f32.mrf.mxu0 }
 0x1a7   : > { %5065 = vst [vmem:[#allocation48_spill] sm:$0xff] %v4393_v43 }
 0x1a8   : > { %v4395_v29 = vpop.f32.mrf.mxu1  ;;  %v4397_v26 = vpop.f32.mrf.mxu0 }
 0x1a9   : > { %5066 = vst [vmem:[#allocation17_spill] sm:$0xff] %v4397_v26 }
 0x1aa   : > { %v4399_v60 = vpop.f32.mrf.mxu1  ;;  %v4401_v3 = vpop.f32.mrf.mxu0 }
 0x1ab   : > { %5067 = vst [vmem:[#allocation18_spill] sm:$0xff] %v4401_v3 }
 0x1ac   : > { %v4403_v16 = vpop.f32.mrf.mxu1  ;;  %v4405_v15 = vpop.f32.mrf.mxu0 }
 0x1ad   : > { %5068 = vst [vmem:[#allocation50_spill] sm:$0xff] %v4405_v15 }
 0x1ae   : > { %v4407_v37 = vpop.f32.mrf.mxu1  ;;  %v4409_v20 = vpop.f32.mrf.mxu0 }
 0x1af   : > { %5069 = vst [vmem:[#allocation19_spill] sm:$0xff] %v4407_v37  ;;  %5070 = vst [vmem:[#allocation20_spill] sm:$0xff] %v4409_v20 }
 0x1b0   : > { %v4411_v46 = vpop.f32.mrf.mxu1  ;;  %v4413_v55 = vpop.f32.mrf.mxu0 }
 0x1b1   : > { %5071 = vst [vmem:[#allocation52_spill] sm:$0xff] %v4411_v46 }
 0x1b2   : > { %v4415_v49 = vpop.f32.mrf.mxu1  ;;  %v4417_v17 = vpop.f32.mrf.mxu0 }
 0x1b3   : > { %5072 = vst [vmem:[#allocation21_spill] sm:$0xff] %v4415_v49 }
 0x1b4   : > { %v4419_v52 = vpop.f32.mrf.mxu1  ;;  %v4421_v36 = vpop.f32.mrf.mxu0 }
 0x1b5   : > { %5073 = vst [vmem:[#allocation22_spill] sm:$0xff] %v4419_v52 }
 0x1b6   : > { %v4423_v3 = vpop.f32.mrf.mxu1  ;;  %v4425_v33 = vpop.f32.mrf.mxu0 }
 0x1b7   : > { %5074 = vst [vmem:[#allocation54_spill] sm:$0xff] %v4423_v3 }
 0x1b8   : > { %v4427_v15 = vpop.f32.mrf.mxu1  ;;  %v4429_v23 = vpop.f32.mrf.mxu0 }
 0x1b9   : > { %5075 = vst [vmem:[#allocation23_spill] sm:$0xff] %v4427_v15 }
 0x1ba   : > { %v4431_v20 = vpop.f32.mrf.mxu1  ;;  %v4433_v26 = vpop.f32.mrf.mxu0 }
 0x1bb   : > { %5076 = vst [vmem:[#allocation24_spill] sm:$0xff] %v4431_v20  ;;  %5077 = vst [vmem:[#allocation56_spill] sm:$0xff] %v4433_v26 }
 0x1bc   : > { %v4435_v43 = vpop.f32.mrf.mxu1  ;;  %v4437_v49 = vpop.f32.mrf.mxu0 }
 0x1bd   : > { %5078 = vst [vmem:[#allocation25_spill] sm:$0xff] %v4435_v43  ;;  %5079 = vst [vmem:[#allocation58_spill] sm:$0xff] %v4437_v49 }
 0x1be   : > { %v4439_v28 = vpop.f32.mrf.mxu1  ;;  %v4441_v52 = vpop.f32.mrf.mxu0 }
 0x1bf   : > { %5080 = vst [vmem:[#allocation27_spill] sm:$0xff] %v4439_v28  ;;  %5081 = vst [vmem:[#allocation26_spill] sm:$0xff] %v4441_v52  ;;  %v5092_v52 = vld [vmem:[#allocation60_spill] sm:$0xff] }
 0x1c0   : > { %v4443_v46 = vpop.f32.mrf.mxu1  ;;  %v4445_v3 = vpop.f32.mrf.mxu0 }
 0x1c1   : > { %5082 = vst [vmem:[#allocation28_spill] sm:$0xff] %v4443_v46  ;;  %5083 = vst [vmem:[#allocation61_spill] sm:$0xff] %v4445_v3  ;;  %v1881_v46 = vsub.s32 2, %v5092_v52 }
 0x1c2   : > { %v4447_v51 = vpop.f32.mrf.mxu1  ;;  %v4449_v15 = vpop.f32.mrf.mxu0 }
 0x1c3   : > { %5084 = vst [vmem:[#allocation29_spill] sm:$0xff] %v4447_v51  ;;  %5085 = vst [vmem:[#allocation30_spill] sm:$0xff] %v4449_v15  ;;  %v1885_v51 = vsub.s32 3, %v5092_v52 }
 0x1c4   : > { %v4451_v44 = vpop.f32.mrf.mxu1  ;;  %v4453_v20 = vpop.f32.mrf.mxu0 }
 0x1c5   : > { %5086 = vst [vmem:[#allocation63_spill] sm:$0xff] %v4451_v44  ;;  %5087 = vst [vmem:[#allocation31_spill] sm:$0xff] %v4453_v20 }
 0x1c6   : > { %v4455_v45 = vpop.f32.mrf.mxu1  ;;  %v4457_v43 = vpop.f32.mrf.mxu0 }
 0x1c7   : > { %5088 = vst [vmem:[#allocation32_spill] sm:$0xff] %v4455_v45  ;;  %5089 = vst [vmem:[#allocation65_spill] sm:$0xff] %v4457_v43  ;;  %v4473_v45 = vrot.slane %v4104_v61, %v1881_v46  ;;  %v5099_v46 = vmax.f32 %v3945_v12, %v4120_v10 }
 0x1c8   : > { %v4459_v7 = vpop.f32.mrf.mxu1  ;;  %v4461_v28 = vpop.f32.mrf.mxu0 }
 0x1c9   : > { %5090 = vst [vmem:[#allocation33_spill] sm:$0xff] %v4459_v7  ;;  %5091 = vst [vmem:[#allocation34_spill] sm:$0xff] %v4461_v28  ;;  %v5097_v28 = vld [vmem:[#allocation67_spill] sm:$0xff] }
 0x1ca   : > { %v4464_v49 = vpop.f32.mrf.mxu1  ;;  %v4466_v3 = vpop.f32.mrf.mxu0  ;;  %v5098_v40 = vmax.f32 %v3934_v5, %v5097_v28 }
 0x1cb   : > { %5093 = vst [vmem:[#allocation60_spill] sm:$0xff] %v4464_v49  ;;  %5094 = vst [vmem:[#allocation69_spill] sm:$0xff] %v4466_v3  ;;  %v4482_v3 = vrot.slane %v4104_v61, %v1885_v51  ;;  %v5100_v51 = vmax.f32 %v3949_v8, %v4129_v48 }
 0x1cc   : > { %v1231_v15 = vpop.f32.mrf.mxu1  ;;  %v4469_v44 = vpop.f32.mrf.mxu0 }
 0x1cd   : > { %5095 = vst [vmem:[#allocation70_spill] sm:$0xff] %v4469_v44  ;;  %v1731_v20 = vmax.f32 %v4350_v31, %v1231_v15 }
 0x1ce   : > { %v1233_v43 = vpop.f32.mrf.mxu1  ;;  %v4475_v7 = vpop.f32.mrf.mxu0 }
 0x1cf   : > { %5096 = vst [vmem:[#allocation71_spill] sm:$0xff] %v4475_v7  ;;  %v1801_v26 = vmax.f32 %v5098_v40, %v1731_v20  ;;  %v1732_v49 = vmax.f32 %v4356_v22, %v1233_v43 }
 0x1d0   : > { %v1237_v37 = vpop.f32.mrf.mxu1  ;;  %v4484_v35 = vpop.f32.mrf.mxu0 }
 0x1d1   : > { %v1898_v15 = vadd.f32 %v4473_v45, %v1801_v26  ;;  %v1802_v31 = vmax.f32 %v5099_v46, %v1732_v49  ;;  %v1736_v7 = vmax.f32 %v4361_v1, %v1237_v37  ;;  %v5101_v49 = vmax.f32 %v3960_v13, %v4137_v54 }
 0x1d2   : > { %v1239_v44 = vpop.f32.mrf.mxu1  ;;  %v4491_v18 = vpop.f32.mrf.mxu0 }
 0x1d3   : > { %v1899_v5 = vadd.f32 %v4482_v3, %v1802_v31  ;;  %v1806_v20 = vmax.f32 %v5100_v51, %v1736_v7  ;;  %v1737_v22 = vmax.f32 %v4366_v62, %v1239_v44  ;;  %v1968_v40 = vmax.f32 %v1898_v15, 0.0 }
 0x1d4   : > { %v1243_v28 = vpop.f32.mrf.mxu1  ;;  %v4498_v43 = vpop.f32.mrf.mxu0  ;;  %v5102_v44 = vmax.f32 %v3964_v6, %v4147_v14  ;;  %v5103_v51 = vmax.f32 %v3975_v25, %v4153_v57  ;;  %v5105_v25 = vmax.f32 %v3990_v30, %v4172_v42 }
 0x1d5   : > { %v1969_v12 = vmax.f32 %v1899_v5, 0.0  ;;  %v1903_v10 = vadd.f32 %v4473_v45, %v1806_v20  ;;  %v1807_v37 = vmax.f32 %v5101_v49, %v1737_v22  ;;  %v1741_v1 = vmax.f32 %v4370_v27, %v1243_v28 }
 0x1d6   : > { %v1245_v26 = vpop.f32.mrf.mxu1  ;;  %v4505_v46 = vpop.f32.mrf.mxu0 }
 0x1d7   : > { %v2775_v8 = vpack.c.bf16 %v1969_v12, %v1968_v40  ;;  %v1904_v48 = vadd.f32 %v4482_v3, %v1807_v37  ;;  %v1811_v62 = vmax.f32 %v5102_v44, %v1741_v1  ;;  %v1742_v7 = vmax.f32 %v4375_v50, %v1245_v26 }
 0x1d8   : > { %v1249_v15 = vpop.f32.mrf.mxu1  ;;  %v4512_v31 = vpop.f32.mrf.mxu0  ;;  %v1973_v13 = vmax.f32 %v1903_v10, 0.0  ;;  %v5104_v50 = vmax.f32 %v3979_v4, %v4163_v19 }
 0x1d9   : > { %2261 = vst [vmem:[%s4165_s12 + $0x8] sm:$0xff] %v2775_v8  ;;  %v1974_v54 = vmax.f32 %v1904_v48, 0.0  ;;  %v1746_v27 = vmax.f32 %v4379_v47, %v1249_v15  ;;  %v1908_v5 = vadd.f32 %v4473_v45, %v1811_v62  ;;  %v1812_v20 = vmax.f32 %v5103_v51, %v1742_v7 }
 0x1da   : > { %v1251_v22 = vpop.f32.mrf.mxu1  ;;  %v4520_v6 = vpop.f32.mrf.mxu0  ;;  %v5106_v8 = vmax.f32 %v3994_v2, %v4182_v24 }
 0x1db   : > { %v2778_v14 = vpack.c.bf16 %v1974_v54, %v1973_v13  ;;  %v1816_v40 = vmax.f32 %v5104_v50, %v1746_v27  ;;  %v1747_v28 = vmax.f32 %v4383_v32, %v1251_v22  ;;  %v1909_v12 = vadd.f32 %v4482_v3, %v1812_v20 }
 0x1dc   : > { %v1255_v10 = vpop.f32.mrf.mxu1  ;;  %v4527_v47 = vpop.f32.mrf.mxu0  ;;  %v1978_v1 = vmax.f32 %v1908_v5, 0.0  ;;  %v5107_v54 = vmax.f32 %v4005_v34, %v4189_v63  ;;  %v1668_v22 = vmax.f32 %v4352_v39, %v4413_v55  ;;  %v1663_v50 = vmax.f32 %v4358_v41, %v4417_v17 }
 0x1dd   : > { %2264 = vst [vmem:[%s4165_s12 + $0x1c] sm:$0xff] %v2778_v14  ;;  %v1913_v49 = vadd.f32 %v4473_v45, %v1816_v40  ;;  %v1817_v57 = vmax.f32 %v5105_v25, %v1747_v28  ;;  %v1751_v37 = vmax.f32 %v4387_v9, %v1255_v10  ;;  %v1979_v4 = vmax.f32 %v1909_v12, 0.0  ;;  %v5110_v10 = vld [vmem:[#allocation35_spill] sm:$0xff] }
 0x1de   : > { %v1257_v19 = vpop.f32.mrf.mxu1  ;;  %v4535_v26 = vpop.f32.mrf.mxu0  ;;  %v1889_v9 = vsub.s32 4, %v5092_v52  ;;  %v5108_v52 = vmax.f32 %v4009_v0, %v4199_v21  ;;  %v1678_v21 = vmax.f32 %v4363_v11, %v4421_v36  ;;  %v1673_v55 = vmax.f32 %v4368_v58, %v4425_v33  ;;  %v5113_v25 = vld [vmem:[#allocation19_spill] sm:$0xff]  ;;  %v5153_v58 = vld [vmem:[#allocation24_spill] sm:$0xff] }
 0x1df   : > { %v1914_v32 = vadd.f32 %v4482_v3, %v1817_v57  ;;  %v1821_v48 = vmax.f32 %v5106_v8, %v1751_v37  ;;  %v1752_v44 = vmax.f32 %v4391_v56, %v1257_v19  ;;  %v2781_v62 = vpack.c.bf16 %v1979_v4, %v1978_v1  ;;  %v5114_v37 = vld [vmem:[#allocation56_spill] sm:$0xff]  ;;  %v5115_v1 = vld [vmem:[#allocation46_spill] sm:$0xff] }
 0x1e0   : > { %v1983_v7 = vmax.f32 %v1913_v49, 0.0  ;;  %v1261_v30 = vpop.f32.mrf.mxu1  ;;  %v4542_v42 = vpop.f32.mrf.mxu0  ;;  %v1688_v41 = vmax.f32 %v4372_v53, %v4429_v23  ;;  %v5111_v49 = vld [vmem:[#allocation68_spill] sm:$0xff]  ;;  %v5116_v19 = vld [vmem:[#allocation58_spill] sm:$0xff] }
 0x1e1   : > { %v1984_v15 = vmax.f32 %v1914_v32, 0.0  ;;  %v1918_v13 = vadd.f32 %v4473_v45, %v1821_v48  ;;  %v1822_v27 = vmax.f32 %v5107_v54, %v1752_v44  ;;  %v1756_v2 = vmax.f32 %v4395_v29, %v1261_v30  ;;  %2267 = vst [vmem:[%s4165_s12 + $0x30] sm:$0xff] %v2781_v62  ;;  %v5117_v32 = vld [vmem:[#allocation15_spill] sm:$0xff]  ;;  %v5119_v8 = vld [vmem:[#allocation14_spill] sm:$0xff]  ;;  %v5156_v23 = vld [vmem:[#allocation8_spill] sm:$0xff] }
 0x1e2   : > { %v1263_v24 = vpop.f32.mrf.mxu1  ;;  %v4551_v56 = vpop.f32.mrf.mxu0  ;;  %v4563_v29 = vrot.slane %v4104_v61, %v1889_v9  ;;  %v5109_v61 = vmax.f32 %v4020_v38, %v4206_v59  ;;  %v5112_v36 = vmax.f32 %v5110_v10, %v5111_v49  ;;  %v5118_v59 = vld [vmem:[#allocation26_spill] sm:$0xff]  ;;  %v5120_v9 = vld [vmem:[#allocation37_spill] sm:$0xff] }
 0x1e3   : > { %v2784_v5 = vpack.c.bf16 %v1984_v15, %v1983_v7  ;;  %v1919_v51 = vadd.f32 %v4482_v3, %v1822_v27  ;;  %v1826_v20 = vmax.f32 %v5108_v52, %v1756_v2  ;;  %v1757_v14 = vmax.f32 %v4399_v60, %v1263_v24  ;;  %v5121_v15 = vld [vmem:[#allocation4_spill] sm:$0xff]  ;;  %v5124_v24 = vld [vmem:[#allocation70_spill] sm:$0xff]  ;;  %v5137_v38 = vld [vmem:[#allocation65_spill] sm:$0xff] }
 0x1e4   : > { %v1267_v34 = vpop.f32.mrf.mxu1  ;;  %v4560_v63 = vpop.f32.mrf.mxu0  ;;  %v1988_v40 = vmax.f32 %v1918_v13, 0.0  ;;  %v5122_v13 = vmax.f32 %v5120_v9, %v5121_v15  ;;  %v5123_v27 = vld [vmem:[#allocation52_spill] sm:$0xff]  ;;  %v5134_v15 = vld [vmem:[#allocation21_spill] sm:$0xff]  ;;  %v5136_v48 = vld [vmem:[#allocation22_spill] sm:$0xff] }
 0x1e5   : > { %2270 = vst [vmem:[%s4165_s12 + $0x44] sm:$0xff] %v2784_v5  ;;  %v1989_v28 = vmax.f32 %v1919_v51, 0.0  ;;  %v1761_v0 = vmax.f32 %v4403_v16, %v1267_v34  ;;  %v1923_v39 = vadd.f32 %v4473_v45, %v1826_v20  ;;  %v1827_v60 = vmax.f32 %v5109_v61, %v1757_v14  ;;  %v5125_v51 = vld [vmem:[#allocation61_spill] sm:$0xff]  ;;  %v5126_v52 = vld [vmem:[#allocation16_spill] sm:$0xff]  ;;  %v5127_v14 = vld [vmem:[#allocation30_spill] sm:$0xff] }
 0x1e6   : > { %v1269_v12 = vpop.f32.mrf.mxu1  ;;  %v4577_v17 = vpop.f32.mrf.mxu0  ;;  %v5128_v34 = vld [vmem:[#allocation48_spill] sm:$0xff]  ;;  %v5138_v4 = vld [vmem:[#allocation18_spill] sm:$0xff] }
 0x1e7   : > { %v2787_v16 = vpack.c.bf16 %v1989_v28, %v1988_v40  ;;  %v1831_v11 = vmax.f32 %v5112_v36, %v1761_v0  ;;  %v1762_v57 = vmax.f32 %v5113_v25, %v1269_v12  ;;  %v1924_v44 = vadd.f32 %v4482_v3, %v1827_v60  ;;  %v5129_v12 = vld [vmem:[#allocation31_spill] sm:$0xff] }
 0x1e8   : > { %v1273_v62 = vpop.f32.mrf.mxu1  ;;  %v2944_v7 = vpop.f32.mrf.mxu0  ;;  %v1993_v28 = vmax.f32 %v1923_v39, 0.0  ;;  %v5131_v36 = vld [vmem:[#allocation39_spill] sm:$0xff] }
 0x1e9   : > { %2273 = vst [vmem:[%s4165_s12 + $0x58] sm:$0xff] %v2787_v16  ;;  %v1928_v30 = vadd.f32 %v4473_v45, %v1831_v11  ;;  %v1832_v54 = vmax.f32 %v5122_v13, %v1762_v57  ;;  %v1766_v2 = vmax.f32 %v5123_v27, %v1273_v62  ;;  %v1738_v5 = vmax.f32 %v5124_v24, %v2944_v7  ;;  %v5130_v16 = vld [vmem:[#allocation17_spill] sm:$0xff]  ;;  %v5132_v11 = vld [vmem:[#allocation36_spill] sm:$0xff]  ;;  %v5135_v27 = vld [vmem:[#allocation71_spill] sm:$0xff] }
 0x1ea   : > { %v1994_v0 = vmax.f32 %v1924_v44, 0.0  ;;  %v1275_v61 = vpop.f32.mrf.mxu1  ;;  %v1590_v60 = vpop.f32.mrf.mxu0  ;;  %v5133_v25 = vmax.f32 %v5131_v36, %v5132_v11  ;;  %v1713_v36 = vmax.f32 %v5138_v4, %v5137_v38 }
 0x1eb   : > { %v1929_v49 = vadd.f32 %v4482_v3, %v1832_v54  ;;  %v1808_v62 = vmax.f32 %v1668_v22, %v1738_v5  ;;  %v1998_v9 = vmax.f32 %v1928_v30, 0.0  ;;  %v1767_v13 = vmax.f32 %v5134_v15, %v1275_v61  ;;  %v5139_v22 = vld [vmem:[#allocation41_spill] sm:$0xff] }
 0x1ec   : > { %v1836_v57 = vmax.f32 %v5133_v25, %v1766_v2  ;;  %v2790_v7 = vpack.c.bf16 %v1994_v0, %v1993_v28  ;;  %v1733_v39 = vmax.f32 %v5135_v27, %v1590_v60  ;;  %v1279_v44 = vpop.f32.mrf.mxu1  ;;  %v2947_v24 = vpop.f32.mrf.mxu0  ;;  %v5140_v2 = vld [vmem:[#allocation5_spill] sm:$0xff] }
 0x1ed   : > { %v1999_v40 = vmax.f32 %v1929_v49, 0.0  ;;  %v1905_v10 = vadd.f32 %v4563_v29, %v1808_v62  ;;  %v1771_v54 = vmax.f32 %v5136_v48, %v1279_v44  ;;  %v5141_v30 = vmax.f32 %v5139_v22, %v5140_v2  ;;  %v5143_v62 = vld [vmem:[#allocation6_spill] sm:$0xff] }
 0x1ee   : > { %v1933_v20 = vadd.f32 %v4473_v45, %v1836_v57  ;;  %2276 = vst [vmem:[%s4165_s12 + $0x6c] sm:$0xff] %v2790_v7  ;;  %v1803_v28 = vmax.f32 %v1663_v50, %v1733_v39  ;;  %v1748_v0 = vmax.f32 %v4484_v35, %v2947_v24  ;;  %v1281_v61 = vpop.f32.mrf.mxu1  ;;  %v1600_v60 = vpop.f32.mrf.mxu0  ;;  %v5142_v57 = vld [vmem:[#allocation43_spill] sm:$0xff]  ;;  %v5145_v22 = vld [vmem:[#allocation54_spill] sm:$0xff] }
 0x1ef   : > { %v1837_v5 = vmax.f32 %v5141_v30, %v1767_v13  ;;  %v2793_v49 = vpack.c.bf16 %v1999_v40, %v1998_v9  ;;  %v1975_v25 = vmax.f32 %v1905_v10, 0.0  ;;  %v5144_v48 = vmax.f32 %v5142_v57, %v5143_v62  ;;  %v5146_v10 = vld [vmem:[#allocation23_spill] sm:$0xff]  ;;  %v5147_v30 = vld [vmem:[#allocation45_spill] sm:$0xff] }
 0x1f0   : > { %v2003_v11 = vmax.f32 %v1933_v20, 0.0  ;;  %v1900_v7 = vadd.f32 %v4563_v29, %v1803_v28  ;;  %v1818_v44 = vmax.f32 %v1678_v21, %v1748_v0  ;;  %v1772_v13 = vmax.f32 %v5145_v22, %v1281_v61  ;;  %v1285_v50 = vpop.f32.mrf.mxu1  ;;  %v2950_v39 = vpop.f32.mrf.mxu0 }
 0x1f1   : > { %v1841_v15 = vmax.f32 %v5144_v48, %v1771_v54  ;;  %v1934_v27 = vadd.f32 %v4482_v3, %v1837_v5  ;;  %2279 = vst [vmem:[%s4165_s12 + $0x80] sm:$0xff] %v2793_v49  ;;  %v2779_v35 = vpack.c.bf16 %v1975_v25, %v1975_v25  ;;  %v1743_v20 = vmax.f32 %v4491_v18, %v1600_v60  ;;  %v5148_v5 = vld [vmem:[#allocation38_spill] sm:$0xff]  ;;  %v5150_v60 = vld [vmem:[#allocation47_spill] sm:$0xff] }
 0x1f2   : > { %v1776_v9 = vmax.f32 %v5146_v10, %v1285_v50  ;;  %v1970_v54 = vmax.f32 %v1900_v7, 0.0  ;;  %v1915_v2 = vadd.f32 %v4563_v29, %v1818_v44  ;;  %v5149_v28 = vmax.f32 %v5147_v30, %v5148_v5  ;;  %v1287_v0 = vpop.f32.mrf.mxu1  ;;  %v1610_v61 = vpop.f32.mrf.mxu0  ;;  %v5151_v25 = vld [vmem:[#allocation7_spill] sm:$0xff]  ;;  %v5155_v30 = vld [vmem:[#allocation49_spill] sm:$0xff] }
 0x1f3   : > { %v1938_v40 = vadd.f32 %v4473_v45, %v1841_v15  ;;  %v2004_v24 = vmax.f32 %v1934_v27, 0.0  ;;  %2265 = vst [vmem:[%s4165_s12 + $0x24] sm:$0xf] %v2779_v35  ;;  %v1813_v18 = vmax.f32 %v1673_v55, %v1743_v20  ;;  %v5152_v57 = vmax.f32 %v5150_v60, %v5151_v25 }
 0x1f4   : > { %v1842_v21 = vmax.f32 %v5149_v28, %v1772_v13  ;;  %v1758_v48 = vmax.f32 %v4498_v43, %v2950_v39  ;;  %v2776_v27 = vpack.c.bf16 %v1970_v54, %v1970_v54  ;;  %v1985_v7 = vmax.f32 %v1915_v2, 0.0  ;;  %v1291_v22 = vpop.f32.mrf.mxu1  ;;  %v2953_v13 = vpop.f32.mrf.mxu0 }
 0x1f5   : > { %v2008_v49 = vmax.f32 %v1938_v40, 0.0  ;;  %v1846_v62 = vmax.f32 %v5152_v57, %v1776_v9  ;;  %v2796_v15 = vpack.c.bf16 %v2004_v24, %v2003_v11  ;;  %v1910_v50 = vadd.f32 %v4563_v29, %v1813_v18  ;;  %v5154_v40 = vld [vmem:[#allocation25_spill] sm:$0xff] }
 0x1f6   : > { %v1939_v44 = vadd.f32 %v4482_v3, %v1842_v21  ;;  %v1828_v33 = vmax.f32 %v1688_v41, %v1758_v48  ;;  %v1777_v55 = vmax.f32 %v5153_v58, %v1287_v0  ;;  %2262 = vst [vmem:[%s4165_s12 + $0x10] sm:$0xf] %v2776_v27  ;;  %v2785_v43 = vpack.c.bf16 %v1985_v7, %v1985_v7  ;;  %v1293_v10 = vpop.f32.mrf.mxu1  ;;  %v1620_v9 = vpop.f32.mrf.mxu0  ;;  %v5160_v0 = vld [vmem:[#allocation40_spill] sm:$0xff]  ;;  %v5162_v27 = vld [vmem:[#allocation27_spill] sm:$0xff]  ;;  %v5165_v58 = vld [vmem:[#allocation9_spill] sm:$0xff] }
 0x1f7   : > { %v1943_v35 = vadd.f32 %v4473_v45, %v1846_v62  ;;  %2282 = vst [vmem:[%s4165_s12 + $0x94] sm:$0xff] %v2796_v15  ;;  %v1753_v39 = vmax.f32 %v4505_v46, %v1610_v61  ;;  %v1781_v20 = vmax.f32 %v5154_v40, %v1291_v22  ;;  %v1980_v24 = vmax.f32 %v1910_v50, 0.0  ;;  %v5159_v46 = vld [vmem:[#allocation51_spill] sm:$0xff] }
 0x1f8   : > { %v2009_v11 = vmax.f32 %v1939_v44, 0.0  ;;  %v1925_v2 = vadd.f32 %v4563_v29, %v1828_v33  ;;  %v5157_v53 = vmax.f32 %v5155_v30, %v5156_v23  ;;  %2271 = vst [vmem:[%s4165_s12 + $0x4c] sm:$0xf] %v2785_v43  ;;  %v5158_v28 = vmax.f32 %v5115_v1, %v5114_v37  ;;  %v1297_v25 = vpop.f32.mrf.mxu1  ;;  %v2956_v57 = vpop.f32.mrf.mxu0  ;;  %v5164_v33 = vld [vmem:[#allocation53_spill] sm:$0xff]  ;;  %v5169_v30 = vld [vmem:[#allocation55_spill] sm:$0xff]  ;;  %v5170_v23 = vld [vmem:[#allocation10_spill] sm:$0xff] }
 0x1f9   : > { %v2013_v54 = vmax.f32 %v1943_v35, 0.0  ;;  %v5161_v61 = vmax.f32 %v5159_v46, %v5160_v0  ;;  %v1768_v60 = vmax.f32 %v4512_v31, %v2953_v13  ;;  %v2782_v62 = vpack.c.bf16 %v1980_v24, %v1980_v24  ;;  %v5172_v0 = vld [vmem:[#allocation29_spill] sm:$0xff] }
 0x1fa   : > { %v1847_v41 = vmax.f32 %v5157_v53, %v1777_v55  ;;  %v2799_v5 = vpack.c.bf16 %v2009_v11, %v2008_v49  ;;  %v1823_v21 = vmax.f32 %v5158_v28, %v1753_v39  ;;  %v1995_v48 = vmax.f32 %v1925_v2, 0.0  ;;  %v1299_v22 = vpop.f32.mrf.mxu1  ;;  %v1630_v13 = vpop.f32.mrf.mxu0  ;;  %v5167_v11 = vld [vmem:[#allocation28_spill] sm:$0xff] }
 0x1fb   : > { %v1851_v18 = vmax.f32 %v5161_v61, %v1781_v20  ;;  %v1782_v7 = vmax.f32 %v5162_v27, %v1293_v10  ;;  %v5163_v1 = vmax.f32 %v5117_v32, %v5116_v19  ;;  %v1763_v31 = vmax.f32 %v4520_v6, %v1620_v9  ;;  %2268 = vst [vmem:[%s4165_s12 + $0x38] sm:$0xf] %v2782_v62 }
 0x1fc   : > { %v1944_v15 = vadd.f32 %v4482_v3, %v1847_v41  ;;  %2285 = vst [vmem:[%s4165_s12 + $0xa8] sm:$0xff] %v2799_v5  ;;  %v1920_v49 = vadd.f32 %v4563_v29, %v1823_v21  ;;  %v2791_v50 = vpack.c.bf16 %v1995_v48, %v1995_v48  ;;  %v5166_v55 = vmax.f32 %v5164_v33, %v5165_v58  ;;  %v1303_v10 = vpop.f32.mrf.mxu1  ;;  %v2959_v9 = vpop.f32.mrf.mxu0  ;;  %v5174_v48 = vld [vmem:[#allocation57_spill] sm:$0xff]  ;;  %v5180_v33 = vld [vmem:[#allocation11_spill] sm:$0xff] }
 0x1fd   : > { %v1948_v37 = vadd.f32 %v4473_v45, %v1851_v18  ;;  %v1838_v44 = vmax.f32 %v5163_v1, %v1768_v60  ;;  %v1786_v39 = vmax.f32 %v5167_v11, %v1297_v25  ;;  %v5168_v32 = vmax.f32 %v5119_v8, %v5118_v59 }
 0x1fe   : > { %v2014_v35 = vmax.f32 %v1944_v15, 0.0  ;;  %v1852_v43 = vmax.f32 %v5166_v55, %v1782_v7  ;;  %v1990_v40 = vmax.f32 %v1920_v49, 0.0  ;;  %2277 = vst [vmem:[%s4165_s12 + $0x74] sm:$0xf] %v2791_v50  ;;  %v5171_v53 = vmax.f32 %v5169_v30, %v5170_v23  ;;  %v1305_v8 = vpop.f32.mrf.mxu1  ;;  %v1640_v61 = vpop.f32.mrf.mxu0  ;;  %v5175_v15 = vld [vmem:[#allocation42_spill] sm:$0xff]  ;;  %v5177_v49 = vld [vmem:[#allocation63_spill] sm:$0xff] }
 0x1ff   : > { %v2018_v20 = vmax.f32 %v1948_v37, 0.0  ;;  %v1935_v19 = vadd.f32 %v4563_v29, %v1838_v44  ;;  %v1833_v6 = vmax.f32 %v5168_v32, %v1763_v31  ;;  %v1778_v5 = vmax.f32 %v4527_v47, %v2956_v57  ;;  %v5186_v30 = vld [vmem:[#allocation12_spill] sm:$0xff] }
 0x200   : > { %v2802_v24 = vpack.c.bf16 %v2014_v35, %v2013_v54  ;;  %v1949_v2 = vadd.f32 %v4482_v3, %v1852_v43  ;;  %v1856_v41 = vmax.f32 %v5171_v53, %v1786_v39  ;;  %v2788_v28 = vpack.c.bf16 %v1990_v40, %v1990_v40  ;;  %v5179_v35 = vld [vmem:[#allocation59_spill] sm:$0xff]  ;;  %v5182_v40 = vld [vmem:[#allocation32_spill] sm:$0xff] }
 0x201   : > { %v2005_v21 = vmax.f32 %v1935_v19, 0.0  ;;  %v1930_v46 = vadd.f32 %v4563_v29, %v1833_v6  ;;  %v1787_v59 = vmax.f32 %v5172_v0, %v1299_v22  ;;  %v5173_v60 = vmax.f32 %v5126_v52, %v5125_v51  ;;  %v2962_v22 = vpop.f32.mrf.mxu0  ;;  %v5190_v0 = vld [vmem:[#allocation64_spill] sm:$0xff] }
 0x202   : > { %2288 = vst [vmem:[%s4165_s12 + $0xbc] sm:$0xff] %v2802_v24  ;;  %v2019_v18 = vmax.f32 %v1949_v2, 0.0  ;;  %v1953_v54 = vadd.f32 %v4473_v45, %v1856_v41  ;;  %v1773_v62 = vmax.f32 %v4535_v26, %v1630_v13  ;;  %2274 = vst [vmem:[%s4165_s12 + $0x60] sm:$0xf] %v2788_v28  ;;  %v5176_v27 = vmax.f32 %v5174_v48, %v5175_v15  ;;  %v1309_v26 = vpop.f32.mrf.mxu1  ;;  %v5185_v2 = vld [vmem:[#allocation62_spill] sm:$0xff] }
 0x203   : > { %v1848_v25 = vmax.f32 %v5173_v60, %v1778_v5  ;;  %v2797_v47 = vpack.c.bf16 %v2005_v21, %v2005_v21  ;;  %v2000_v57 = vmax.f32 %v1930_v46, 0.0  ;;  %v1791_v37 = vmax.f32 %v5177_v49, %v1303_v10  ;;  %v5184_v10 = vld [vmem:[#allocation33_spill] sm:$0xff]  ;;  %v1650_v5 = vpop.f32.mrf.mxu0  ;;  %v5188_v28 = vld [vmem:[#allocation34_spill] sm:$0xff]  ;;  %v5194_v60 = vld [vmem:[#allocation20_spill] sm:$0xff] }
 0x204   : > { %v1857_v7 = vmax.f32 %v5176_v27, %v1787_v59  ;;  %v2805_v1 = vpack.c.bf16 %v2019_v18, %v2018_v20  ;;  %v2023_v44 = vmax.f32 %v1953_v54, 0.0  ;;  %v5178_v51 = vmax.f32 %v5128_v34, %v5127_v14  ;;  %v1311_v41 = vpop.f32.mrf.mxu1  ;;  %v5189_v21 = vld [vmem:[#allocation50_spill] sm:$0xff]  ;;  %v5191_v59 = vld [vmem:[#allocation44_spill] sm:$0xff] }
 0x205   : > { %v1945_v31 = vadd.f32 %v4563_v29, %v1848_v25  ;;  %2283 = vst [vmem:[%s4165_s12 + $0x9c] sm:$0xf] %v2797_v47  ;;  %v2794_v13 = vpack.c.bf16 %v2000_v57, %v2000_v57  ;;  %v5181_v58 = vmax.f32 %v5179_v35, %v5180_v33  ;;  %v1788_v43 = vmax.f32 %v4542_v42, %v2959_v9  ;;  %v5195_v47 = vld [vmem:[#allocation60_spill] sm:$0xff] }
 0x206   : > { %v1843_v52 = vmax.f32 %v5178_v51, %v1773_v62  ;;  %v1954_v50 = vadd.f32 %v4482_v3, %v1857_v7  ;;  %2291 = vst [vmem:[%s4165_s12 + $0xd0] sm:$0xff] %v2805_v1  ;;  %v1792_v20 = vmax.f32 %v5182_v40, %v1305_v8  ;;  %v1783_v14 = vmax.f32 %v4551_v56, %v1640_v61  ;;  %v5196_v1 = vld [vmem:[#allocation66_spill] sm:$0xff] }
 0x207   : > { %v1861_v55 = vmax.f32 %v5181_v58, %v1791_v37  ;;  %v2015_v11 = vmax.f32 %v1945_v31, 0.0  ;;  %2280 = vst [vmem:[%s4165_s12 + $0x88] sm:$0xf] %v2794_v13  ;;  %v5183_v32 = vmax.f32 %v5130_v16, %v5129_v12  ;;  %v1796_v24 = vmax.f32 %v5184_v10, %v1309_v26  ;;  %v2335_v40 = vld [vmem:[%s4165_s12 + $0x1c] sm:$0xff] (%p3107_p6)  ;;  %v2349_v10 = vld [vmem:[%s4165_s12 + $0x64] sm:$0xff] (%p3107_p6) }
 0x208   : > { %v1940_v39 = vadd.f32 %v4563_v29, %v1843_v52  ;;  %v2024_v34 = vmax.f32 %v1954_v50, 0.0  ;;  %v5187_v23 = vmax.f32 %v5185_v2, %v5186_v30  ;;  %v1853_v56 = vmax.f32 %v1713_v36, %v1783_v14  ;;  %v5193_v36 = vld [vmem:[#allocation69_spill] sm:$0xff]  ;;  %v2339_v14 = vld [vmem:[%s4165_s12 + $0x30] sm:$0xff] (%p3107_p6)  ;;  %2336 = vst [vmem:[%s4770_s24 + $0x30] sm:$0xff] (%p3107_p6), %v2335_v40  ;;  %2350 = vst [vmem:[%s4770_s24 + $0xc8] sm:$0xff] (%p3107_p6), %v2349_v10 }
 0x209   : > { %v1958_v19 = vadd.f32 %v4473_v45, %v1861_v55  ;;  %v1858_v6 = vmax.f32 %v5183_v32, %v1788_v43  ;;  %v2803_v42 = vpack.c.bf16 %v2015_v11, %v2015_v11  ;;  %v1728_v12 = vmax.f32 %v5189_v21, %v5188_v28  ;;  %v2345_v32 = vld [vmem:[%s4165_s12 + $0x50] sm:$0xff] (%p3107_p6)  ;;  %2340 = vst [vmem:[%s4770_s24 + $0x58] sm:$0xff] (%p3107_p6), %v2339_v14  ;;  %v2373_v21 = vld [vmem:[%s4165_s12 + $0xdc] sm:$0xff] (%p3107_p6) }
 0x20a   : > { %v2010_v9 = vmax.f32 %v1940_v39, 0.0  ;;  %v1862_v53 = vmax.f32 %v5187_v23, %v1792_v20  ;;  %v2808_v16 = vpack.c.bf16 %v2024_v34, %v2023_v44  ;;  %v5192_v8 = vmax.f32 %v5190_v0, %v5191_v59  ;;  %v5197_v44 = vld [vmem:[#allocation13_spill] sm:$0xff]  ;;  %v2337_v20 = vld [vmem:[%s4165_s12 + $0x28] sm:$0xff] (%p3107_p6)  ;;  %2346 = vst [vmem:[%s4770_s24 + $0xa0] sm:$0xff] (%p3107_p6), %v2345_v32  ;;  %2374 = vst [vmem:[%s4770_s24 + $0x1b8] sm:$0xff] (%p3107_p6), %v2373_v21 }
 0x20b   : > { %v1955_v46 = vadd.f32 %v4563_v29, %v1858_v6  ;;  %2289 = vst [vmem:[%s4165_s12 + $0xc4] sm:$0xf] %v2803_v42  ;;  %v1950_v4 = vadd.f32 %v4563_v29, %v1853_v56  ;;  %v1798_v38 = vmax.f32 %v4560_v63, %v2962_v22  ;;  %v1723_v25 = vmax.f32 %v5194_v60, %v5193_v36  ;;  %v2333_v39 = vld [vmem:[%s4165_s12 + $0x14] sm:$0xff] (%p3107_p6)  ;;  %v2341_v34 = vld [vmem:[%s4165_s12 + $0x3c] sm:$0xff] (%p3107_p6)  ;;  %v2357_v2 = vld [vmem:[%s4165_s12 + $0x8c] sm:$0xff] (%p3107_p6) }
 0x20c   : > { %v1866_v61 = vmax.f32 %v5192_v8, %v1796_v24  ;;  %v2800_v18 = vpack.c.bf16 %v2010_v9, %v2010_v9  ;;  %v1959_v54 = vadd.f32 %v4482_v3, %v1862_v53  ;;  %2294 = vst [vmem:[%s4165_s12 + $0xe4] sm:$0xff] %v2808_v16  ;;  %v1797_v57 = vmax.f32 %v5195_v47, %v1311_v41  ;;  %v2347_v6 = vld [vmem:[%s4165_s12 + $0x58] sm:$0xff] (%p3107_p6)  ;;  %v2351_v24 = vld [vmem:[%s4165_s12 + $0x6c] sm:$0xff] (%p3107_p6)  ;;  %v2355_v9 = vld [vmem:[%s4165_s12 + $0x80] sm:$0xff] (%p3107_p6) }
 0x20d   : > { %v2025_v62 = vmax.f32 %v1955_v46, 0.0  ;;  %v1793_v48 = vmax.f32 %v4577_v17, %v1650_v5  ;;  %v2028_v15 = vmax.f32 %v1958_v19, 0.0  ;;  %v2020_v7 = vmax.f32 %v1950_v4, 0.0  ;;  %v2343_v19 = vld [vmem:[%s4165_s12 + $0x44] sm:$0xff] (%p3107_p6)  ;;  %2334 = vst [vmem:[%s4770_s24 + $0x28] sm:$0xff] (%p3107_p6), %v2333_v39  ;;  %2338 = vst [vmem:[%s4770_s24 + $0x50] sm:$0xff] (%p3107_p6), %v2337_v20 }
 0x20e   : > { %2286 = vst [vmem:[%s4165_s12 + $0xb0] sm:$0xf] %v2800_v18  ;;  %v2029_v27 = vmax.f32 %v1959_v54, 0.0  ;;  %v1868_v49 = vmax.f32 %v1728_v12, %v1798_v38  ;;  %v1963_v63 = vadd.f32 %v4473_v45, %v1866_v61  ;;  %v5198_v31 = vmax.f32 %v5196_v1, %v5197_v44  ;;  %2342 = vst [vmem:[%s4770_s24 + $0x78] sm:$0xff] (%p3107_p6), %v2341_v34  ;;  %v2353_v42 = vld [vmem:[%s4165_s12 + $0x78] sm:$0xff] (%p3107_p6)  ;;  %v2361_v23 = vld [vmem:[%s4165_s12 + $0xa0] sm:$0xff] (%p3107_p6) }
 0x20f   : > { %v2809_v37 = vpack.c.bf16 %v2025_v62, %v2025_v62  ;;  %v1863_v52 = vmax.f32 %v1723_v25, %v1793_v48  ;;  %v2806_v22 = vpack.c.bf16 %v2020_v7, %v2020_v7  ;;  %2344 = vst [vmem:[%s4770_s24 + $0x80] sm:$0xff] (%p3107_p6), %v2343_v19  ;;  %2348 = vst [vmem:[%s4770_s24 + $0xa8] sm:$0xff] (%p3107_p6), %v2347_v6  ;;  %v2359_v30 = vld [vmem:[%s4165_s12 + $0x94] sm:$0xff] (%p3107_p6)  ;;  %v2363_v53 = vld [vmem:[%s4165_s12 + $0xa8] sm:$0xff] (%p3107_p6) }
 0x210   : > { %v1867_v51 = vmax.f32 %v5198_v31, %v1797_v57  ;;  %v2811_v26 = vpack.c.bf16 %v2029_v27, %v2028_v15  ;;  %v1965_v17 = vadd.f32 %v4563_v29, %v1868_v49  ;;  %v2033_v35 = vmax.f32 %v1963_v63, 0.0  ;;  %2352 = vst [vmem:[%s4770_s24 + $0xd0] sm:$0xff] (%p3107_p6), %v2351_v24  ;;  %2354 = vst [vmem:[%s4770_s24 + $0xf0] sm:$0xff] (%p3107_p6), %v2353_v42  ;;  %v2365_v56 = vld [vmem:[%s4165_s12 + $0xb4] sm:$0xff] (%p3107_p6)  ;;  %v2367_v41 = vld [vmem:[%s4165_s12 + $0xbc] sm:$0xff] (%p3107_p6) }
 0x211   : > { %2295 = vst [vmem:[%s4165_s12 + $0xec] sm:$0xf] %v2809_v37  ;;  %v1960_v50 = vadd.f32 %v4563_v29, %v1863_v52  ;;  %2292 = vst [vmem:[%s4165_s12 + $0xd8] sm:$0xf] %v2806_v22  ;;  %v2331_v29 = vld [vmem:[%s4165_s12 + $0x8] sm:$0xff] (%p3107_p6)  ;;  %v2371_v28 = vld [vmem:[%s4165_s12 + $0xd0] sm:$0xff] (%p3107_p6) }
 0x212   : > { %v1964_v13 = vadd.f32 %v4482_v3, %v1867_v51  ;;  %2297 = vst [vmem:[%s4165_s12 + $0xf8] sm:$0xff] %v2811_v26  ;;  %v2035_v45 = vmax.f32 %v1965_v17, 0.0  ;;  %v2329_v3 = vld [vmem:[%s4165_s12] sm:$0xff] (%p3107_p6)  ;;  %2332 = vst [vmem:[%s4770_s24 + $0x8] sm:$0xff] (%p3107_p6), %v2331_v29  ;;  %v2369_v5 = vld [vmem:[%s4165_s12 + $0xc8] sm:$0xff] (%p3107_p6) }
 0x213   : > { %v2030_v58 = vmax.f32 %v1960_v50, 0.0  ;;  %2330 = vst [vmem:[%s4770_s24] sm:$0xff] (%p3107_p6), %v2329_v3  ;;  %2356 = vst [vmem:[%s4770_s24 + $0xf8] sm:$0xff] (%p3107_p6), %v2355_v9  ;;  %v2375_v12 = vld [vmem:[%s4165_s12 + $0xe4] sm:$0xff] (%p3107_p6)  ;;  %v2377_v16 = vld [vmem:[%s4165_s12 + $0xf0] sm:$0xff] (%p3107_p6) }
 0x214   : > { %v2034_v33 = vmax.f32 %v1964_v13, 0.0  ;;  %v2815_v55 = vpack.c.bf16 %v2035_v45, %v2035_v45  ;;  %2308 = sbr.rel (!%p3107_p6) target bundleno = 547 (0x223), region = 59  ;;  %2358 = vst [vmem:[%s4770_s24 + $0x118] sm:$0xff] (%p3107_p6), %v2357_v2  ;;  %2360 = vst [vmem:[%s4770_s24 + $0x120] sm:$0xff] (%p3107_p6), %v2359_v30  ;;  %v2381_v0 = vld [vmem:[%s4165_s12 + $0x104] sm:$0xff] (%p3107_p6) }
 0x215   : > { %v2812_v11 = vpack.c.bf16 %v2030_v58, %v2030_v58  ;;  %2362 = vst [vmem:[%s4770_s24 + $0x140] sm:$0xff] (%p3107_p6), %v2361_v23  ;;  %2364 = vst [vmem:[%s4770_s24 + $0x148] sm:$0xff] (%p3107_p6), %v2363_v53  ;;  %v2743_v8 = vld [vmem:[%s4165_s12 + $0x10] sm:$0xf] (%p3107_p6)  ;;  %v2745_v61 = vld [vmem:[%s4165_s12 + $0x24] sm:$0xf] (%p3107_p6) }
 0x216   : > { %v2814_v43 = vpack.c.bf16 %v2034_v33, %v2033_v35  ;;  %2301 = vst [vmem:[%s4165_s12 + $0x114] sm:$0xf] %v2815_v55  ;;  %2366 = vst [vmem:[%s4770_s24 + $0x168] sm:$0xff] (%p3107_p6), %v2365_v56  ;;  %v2747_v18 = vld [vmem:[%s4165_s12 + $0x38] sm:$0xf] (%p3107_p6) }
 0x217   : > { %2298 = vst [vmem:[%s4165_s12 + $0x100] sm:$0xf] %v2812_v11  ;;  %2368 = vst [vmem:[%s4770_s24 + $0x170] sm:$0xff] (%p3107_p6), %v2367_v41  ;;  %v2749_v54 = vld [vmem:[%s4165_s12 + $0x4c] sm:$0xf] (%p3107_p6) }
 0x218   : > { %2300 = vst [vmem:[%s4165_s12 + $0x10c] sm:$0xff] %v2814_v43  ;;  %2370 = vst [vmem:[%s4770_s24 + $0x190] sm:$0xff] (%p3107_p6), %v2369_v5  ;;  %v2751_v4 = vld [vmem:[%s4165_s12 + $0x60] sm:$0xf] (%p3107_p6)  ;;  %v2753_v38 = vld [vmem:[%s4165_s12 + $0x74] sm:$0xf] (%p3107_p6) }
 0x219   : > { %2372 = vst [vmem:[%s4770_s24 + $0x198] sm:$0xff] %v2371_v28  ;;  %2376 = vst [vmem:[%s4770_s24 + $0x1c0] sm:$0xff] %v2375_v12  ;;  %v2379_v46 = vld [vmem:[%s4165_s12 + $0xf8] sm:$0xff]  ;;  %v2755_v36 = vld [vmem:[%s4165_s12 + $0x88] sm:$0xf] }
 0x21a   : > { %2378 = vst [vmem:[%s4770_s24 + $0x1e0] sm:$0xff] %v2377_v16  ;;  %2380 = vst [vmem:[%s4770_s24 + $0x1e8] sm:$0xff] %v2379_v46  ;;  %v2757_v60 = vld [vmem:[%s4165_s12 + $0x9c] sm:$0xf]  ;;  %v2759_v25 = vld [vmem:[%s4165_s12 + $0xb0] sm:$0xf] }
 0x21b   : > { %2382 = vst [vmem:[%s4770_s24 + $0x208] sm:$0xff] %v2381_v0  ;;  %2744 = vst [vmem:[%s4770_s24 + $0x10] sm:$0xf] %v2743_v8  ;;  %v2761_v62 = vld [vmem:[%s4165_s12 + $0xc4] sm:$0xf] }
 0x21c   : > { %2746 = vst [vmem:[%s4770_s24 + $0x38] sm:$0xf] %v2745_v61  ;;  %2748 = vst [vmem:[%s4770_s24 + $0x60] sm:$0xf] %v2747_v18  ;;  %v2763_v47 = vld [vmem:[%s4165_s12 + $0xd8] sm:$0xf] }
 0x21d   : > { %2750 = vst [vmem:[%s4770_s24 + $0x88] sm:$0xf] %v2749_v54  ;;  %2752 = vst [vmem:[%s4770_s24 + $0xb0] sm:$0xf] %v2751_v4  ;;  %v2765_v57 = vld [vmem:[%s4165_s12 + $0xec] sm:$0xf] }
 0x21e   : > { %2754 = vst [vmem:[%s4770_s24 + $0xd8] sm:$0xf] %v2753_v38  ;;  %2756 = vst [vmem:[%s4770_s24 + $0x100] sm:$0xf] %v2755_v36  ;;  %v2767_v48 = vld [vmem:[%s4165_s12 + $0x100] sm:$0xf] }
 0x21f   : > { %v2383_v59 = vld [vmem:[%s4165_s12 + $0x10c] sm:$0xff]  ;;  %2758 = vst [vmem:[%s4770_s24 + $0x128] sm:$0xf] %v2757_v60  ;;  %2760 = vst [vmem:[%s4770_s24 + $0x150] sm:$0xf] %v2759_v25 }
 0x220   : > { %2384 = vst [vmem:[%s4770_s24 + $0x210] sm:$0xff] %v2383_v59  ;;  %2762 = vst [vmem:[%s4770_s24 + $0x178] sm:$0xf] %v2761_v62  ;;  %v2769_v15 = vld [vmem:[%s4165_s12 + $0x114] sm:$0xf] }
 0x221   : > { %2764 = vst [vmem:[%s4770_s24 + $0x1a0] sm:$0xf] %v2763_v47  ;;  %2766 = vst [vmem:[%s4770_s24 + $0x1c8] sm:$0xf] %v2765_v57 }
 0x222   : > { %2768 = vst [vmem:[%s4770_s24 + $0x1f0] sm:$0xf] %v2767_v48  ;;  %2770 = vst [vmem:[%s4770_s24 + $0x218] sm:$0xf] %v2769_v15 }
 0x223 PF: > { %s13_s16 = sadd.s32 1, %s3049_s16   ;;  %s5199_s12 = smov %s3037_s13 }
 0x224   : > { %p10_p12 = scmp.ge.s32.totalorder %s13_s16, 4   ;;  %s5200_s13 = smov %s3112_s22 }
 0x225   : > { %s5201_s14 = smov %s3045_s15  ;;  %s5202_s15 = smov %s5204_s17 }
 0x226   :  { %12 = sbr.rel (!%p10_p12) target bundleno = 3 (0x3), region = 128 }

// kernel: new_model_forward.3
= control target key start
LH: loop header
LB: loop body
LE: loop exit
PB: predicated region body
PF: predicated region fallthrough
CT: control target
= control target key end

     0   :  { %s9731_s9 = smov 0   ;;  %s9733_s10 = smov 0   ;;  %s10166_s0 = inlined_call_operand.vmem [shape: bf16[2,71680], index: 0, kind: input, shape index: {}]   ;;  %s10167_s1 = inlined_call_operand.vmem [shape: bf16[8,71680], index: 1, kind: input, shape index: {}]   ;;  %s10168_s2 = inlined_call_operand.vmem [shape: f32[2,2,8], index: 2, kind: output, shape index: {}]  }
   0x1   :  { %s9735_s11 = smov 0  }
   0x2 LB: > { %s24_s12 = sadd.s32 1, %s9708_s10  ;;  %p9064_p0 = scmp.ge.s32.totalorder %s9712_s11, 1  ;;  %s9712_s11 = sphi %s9735_s11, %s12_s11   ;;  %s9708_s10 = sphi %s9733_s10, %s10170_s10   ;;  %s9704_s9 = sphi %s9731_s9, %s10169_s9  }
   0x3   : > { %p26_p1 = scmp.ge.s32.totalorder %s24_s12, 2  ;;  %p143_p2 = scmp.lt.s32.totalorder %s9712_s11, 3 }
   0x5   : > { %s10172_s12 = smov (%p26_p1, %s24_s12), 0  ;;  %p144_p3 = pnand %p9064_p0, %p143_p2 }
   0x6   : > { %s171_s13 = smul.u32 (!%p144_p3), 280, %s9704_s9  ;;  %p185_p5 = scmp.lt.s32.totalorder (!%p144_p3), %s9704_s9, 1 }
   0x7   : > { %147 = sbr.rel (%p144_p3) target bundleno = 786 (0x312), region = 28 }
   0x8   : > { %p172_p4 = scmp.lt.s32.totalorder (!%p144_p3), %s171_s13, 559 }
   0xc   : > { %v411_v0 = vlaneseq  ;;  %v9714_v1 = vmov 1966171168   ;;  %s10174_s13 = smov (!%p172_p4, %s171_s13), 559  ;;  %vm194_vm0 = vcmask 58368   ;;  %s10176_s9 = smov (!%p185_p5, %s9704_s9), 1 }
   0xd   : > { %v409_v2 = vunpack.c.l.s4 %v9714_v1  ;;  %s9065_s14 = sshll.u32 %s10174_s13, 2  ;;  %s9757_s17 = scalar_lea.vmem %s10166_s0, %s10174_s13 }
   0xe   : > { %v412_v3 = vshrl.u32 %v411_v0, 7  ;;  %s9762_s20 = scalar_lea.vmem %s10167_s1, %s9065_s14  ;;  %v197_v6 = vld [vmem:[%s9757_s17] sm:$0xff]  ;;  %v198_v19 = vld [vmem:[%s9757_s17 + $0x8] sm:$0xff]  ;;  %v199_v50 = vld [vmem:[%s9757_s17 + $0x10] sm:$0xff]  ;;  %s9066_s21 = sshll.u32 %s10176_s9, 1 }
   0xf   : > { %v410_v4 = vunpack.c.0.s8 %v409_v2  ;;  %v232_v7 = vld [vmem:[%s9762_s20] sm:$0xff]  ;;  %v233_v8 = vld [vmem:[%s9762_s20 + $0x8] sm:$0xff]  ;;  %v407_v9 = vcombine.high %v197_v6, %v197_v6  ;;  %v234_v11 = vld [vmem:[%s9762_s20 + $0x10] sm:$0xff]  ;;  %v456_v35 = vcombine.high %v198_v19, %v198_v19  ;;  %v505_v61 = vcombine.high %v199_v50, %v199_v50  ;;  %s188_s24 = scalar_lea.vmem %s10168_s2, %s9066_s21 }
  0x10   : > { %v9068_v12 = vcombine.high %v232_v7, %v232_v7  ;;  %v9070_v13 = vcombine.high %v233_v8, %v233_v8  ;;  %v9067_v14 = vcombine.low %v232_v7, %v232_v7  ;;  %v9069_v15 = vcombine.low %v233_v8, %v233_v8  ;;  %v235_v16 = vld [vmem:[%s9762_s20 + $0x18] sm:$0xff]  ;;  %v236_v29 = vld [vmem:[%s9762_s20 + $0x20] sm:$0xff]  ;;  %v237_v30 = vld [vmem:[%s9762_s20 + $0x28] sm:$0xff] }
  0x11   : > { %v9752_v5 = vsub.s32 %v410_v4, %v412_v3  ;;  %v9072_v18 = vcombine.high %v234_v11, %v234_v11  ;;  %v9074_v21 = vcombine.high %v235_v16, %v235_v16  ;;  %v9071_v31 = vcombine.low %v234_v11, %v234_v11  ;;  %v238_v42 = vld [vmem:[%s9762_s20 + $0x30] sm:$0xff]  ;;  %v239_v43 = vld [vmem:[%s9762_s20 + $0x38] sm:$0xff]  ;;  %v240_v55 = vld [vmem:[%s9762_s20 + $0x40] sm:$0xff] }
  0x12   : > { %3396 = vmatprep.subr.bf16.mxu0 %v9068_v12  ;;  %3436 = vmatprep.subr.bf16.mxu1 %v9070_v13  ;;  %v9073_v32 = vcombine.low %v235_v16, %v235_v16  ;;  %v9076_v36 = vcombine.high %v236_v29, %v236_v29  ;;  %v9078_v37 = vcombine.high %v237_v30, %v237_v30  ;;  %v241_v56 = vld [vmem:[%s9762_s20 + $0x48] sm:$0xff]  ;;  %v242_v4 = vld [vmem:[%s9762_s20 + $0x50] sm:$0xff]  ;;  %v200_v13 = vld [vmem:[%s9757_s17 + $0x18] sm:$0xff] }
  0x13   : > { %v414_v10 = vrot.slane %v197_v6, %v9752_v5  ;;  %v421_v22 = vrot.slane %v407_v9, %v9752_v5  ;;  %3397 = vmatpush1.bf16.xpose.msra.mxu0 %v9067_v14  ;;  %3437 = vmatpush1.bf16.xpose.msra.mxu1 %v9069_v15  ;;  %v463_v25 = vrot.slane %v198_v19, %v9752_v5  ;;  %v243_v6 = vld [vmem:[%s9762_s20 + $0x58] sm:$0xff]  ;;  %v245_v19 = vld [vmem:[%s9762_s20 + $0x68] sm:$0xff] }
  0x14   : > { %3476 = vmatprep.subr.bf16.mxu0 %v9072_v18  ;;  %3516 = vmatprep.subr.bf16.mxu1 %v9074_v21  ;;  %v470_v40 = vrot.slane %v456_v35, %v9752_v5  ;;  %v9075_v44 = vcombine.low %v236_v29, %v236_v29  ;;  %v9077_v45 = vcombine.low %v237_v30, %v237_v30  ;;  %v244_v18 = vld [vmem:[%s9762_s20 + $0x60] sm:$0xff] }
  0x15   : > { %v422_v17 = vcombine.high %v414_v10, %v414_v10  ;;  %v430_v20 = vrot.slane %v414_v10, %v9752_v5  ;;  %v423_v24 = vcombine.high %v421_v22, %v421_v22  ;;  %v471_v34 = vcombine.high %v463_v25, %v463_v25 }
  0x16   : > { %v437_v38 = vrot.slane %v421_v22, %v9752_v5  ;;  %v472_v47 = vcombine.high %v470_v40, %v470_v40  ;;  %v9080_v48 = vcombine.high %v238_v42, %v238_v42  ;;  %v9082_v49 = vcombine.high %v239_v43, %v239_v43 }
  0x17   : > { %v444_v23 = vrot.slane %v422_v17, %v9752_v5  ;;  %v452_v27 = vcombine.high %v430_v20, %v430_v20  ;;  %v451_v28 = vrot.slane %v423_v24, %v9752_v5  ;;  %v493_v39 = vrot.slane %v471_v34, %v9752_v5 }
  0x18   : > { %v453_v41 = vcombine.high %v437_v38, %v437_v38  ;;  %v479_v51 = vrot.slane %v463_v25, %v9752_v5  ;;  %v500_v52 = vrot.slane %v472_v47, %v9752_v5  ;;  %v512_v53 = vrot.slane %v199_v50, %v9752_v5 }
  0x19   : > { %3414 = vmatprep.mubr.bf16.mxu0 %v444_v23  ;;  %v454_v26 = vcombine.high %v444_v23, %v444_v23  ;;  %v455_v33 = vcombine.high %v451_v28, %v451_v28  ;;  %v503_v46 = vcombine.high %v493_v39, %v493_v39  ;;  %v9079_v57 = vcombine.low %v238_v42, %v238_v42 }
  0x1a   : > { %3415 = vmatmul.mubr.bf16.vlgmr.msra.gmra.mxu0 %v430_v20  ;;  %v501_v54 = vcombine.high %v479_v51, %v479_v51  ;;  %v9081_v58 = vcombine.low %v239_v43, %v239_v43  ;;  %v504_v59 = vcombine.high %v500_v52, %v500_v52  ;;  %v520_v60 = vcombine.high %v512_v53, %v512_v53 }
  0x1b   : > { %3454 = vmatprep.mubr.bf16.mxu1 %v454_v26  ;;  %3477 = vmatpush1.bf16.xpose.msra.mxu0 %v9071_v31  ;;  %v9084_v62 = vcombine.high %v240_v55, %v240_v55  ;;  %v9086_v63 = vcombine.high %v241_v56, %v241_v56  ;;  %v486_v0 = vrot.slane %v470_v40, %v9752_v5  ;;  %v246_v31 = vld [vmem:[%s9762_s20 + $0x70] sm:$0xff] }
  0x1c   : > { %3455 = vmatmul.mubr.bf16.vlgmr.msra.gmra.mxu1 %v452_v27  ;;  %3494 = vmatprep.mubr.bf16.mxu0 %v451_v28  ;;  %v542_v1 = vrot.slane %v520_v60, %v9752_v5  ;;  %v519_v2 = vrot.slane %v505_v61, %v9752_v5  ;;  %v9083_v7 = vcombine.low %v240_v55, %v240_v55 }
  0x1d   : > { %3517 = vmatpush1.bf16.xpose.msra.mxu1 %v9073_v32  ;;  %3534 = vmatprep.mubr.bf16.mxu1 %v455_v33  ;;  %v502_v3 = vcombine.high %v486_v0, %v486_v0  ;;  %v9085_v8 = vcombine.low %v241_v56, %v241_v56  ;;  %v9088_v11 = vcombine.high %v242_v4, %v242_v4  ;;  %v247_v32 = vld [vmem:[%s9762_s20 + $0x78] sm:$0xff] }
  0x1e   : > { %3556 = vmatprep.subr.bf16.mxu0 %v9076_v36  ;;  %3596 = vmatprep.subr.bf16.mxu1 %v9078_v37  ;;  %v552_v9 = vcombine.high %v542_v1, %v542_v1  ;;  %v521_v10 = vcombine.high %v519_v2, %v519_v2  ;;  %v9090_v12 = vcombine.high %v243_v6, %v243_v6 }
  0x1f   : > { %v528_v14 = vrot.slane %v512_v53, %v9752_v5  ;;  %v561_v16 = vrot.slane %v200_v13, %v9752_v5  ;;  %v9087_v20 = vcombine.low %v242_v4, %v242_v4  ;;  %v9089_v21 = vcombine.low %v243_v6, %v243_v6 }
  0x20   : > { %v549_v15 = vrot.slane %v521_v10, %v9752_v5  ;;  %v554_v24 = vcombine.high %v200_v13, %v200_v13  ;;  %v9092_v25 = vcombine.high %v244_v18, %v244_v18  ;;  %v9094_v26 = vcombine.high %v245_v19, %v245_v19 }
  0x21   : > { %v550_v17 = vcombine.high %v528_v14, %v528_v14  ;;  %v569_v23 = vcombine.high %v561_v16, %v561_v16  ;;  %v535_v27 = vrot.slane %v519_v2, %v9752_v5  ;;  %v9091_v33 = vcombine.low %v244_v18, %v244_v18 }
  0x22   : > { %3495 = vmatmul.mubr.bf16.vlgmr.msra.gmra.mxu0 %v437_v38  ;;  %v553_v22 = vcombine.high %v549_v15, %v549_v15  ;;  %v568_v29 = vrot.slane %v554_v24, %v9752_v5  ;;  %v9093_v34 = vcombine.low %v245_v19, %v245_v19  ;;  %v9096_v37 = vcombine.high %v246_v31, %v246_v31 }
  0x23   : > { %3557 = vmatpush1.bf16.xpose.msra.mxu0 %v9075_v44  ;;  %3574 = vmatprep.mubr.bf16.mxu0 %v493_v39  ;;  %v591_v28 = vrot.slane %v569_v23, %v9752_v5  ;;  %v551_v30 = vcombine.high %v535_v27, %v535_v27  ;;  %v9098_v38 = vcombine.high %v247_v32, %v247_v32  ;;  %v201_v39 = vld [vmem:[%s9757_s17 + $0x20] sm:$0xff] }
  0x24   : > { %3535 = vmatmul.mubr.bf16.vlgmr.msra.gmra.mxu1 %v453_v41  ;;  %3636 = vmatprep.subr.bf16.mxu0 %v9080_v48  ;;  %v570_v36 = vcombine.high %v568_v29, %v568_v29  ;;  %v577_v40 = vrot.slane %v561_v16, %v9752_v5  ;;  %v610_v42 = vrot.slane %v201_v39, %v9752_v5  ;;  %v248_v44 = vld [vmem:[%s9762_s20 + $0x80] sm:$0xff] }
  0x25   : > { %3597 = vmatpush1.bf16.xpose.msra.mxu1 %v9077_v45  ;;  %3614 = vmatprep.mubr.bf16.mxu1 %v503_v46  ;;  %v601_v35 = vcombine.high %v591_v28, %v591_v28  ;;  %v249_v45 = vld [vmem:[%s9762_s20 + $0x88] sm:$0xff]  ;;  %v9095_v46 = vcombine.low %v246_v31, %v246_v31  ;;  %v9097_v47 = vcombine.low %v247_v32, %v247_v32 }
  0x26   : > { %3676 = vmatprep.subr.bf16.mxu1 %v9082_v49  ;;  %v598_v41 = vrot.slane %v570_v36, %v9752_v5  ;;  %v599_v43 = vcombine.high %v577_v40, %v577_v40  ;;  %v618_v49 = vcombine.high %v610_v42, %v610_v42  ;;  %v603_v50 = vcombine.high %v201_v39, %v201_v39 }
  0x27   : > { %v584_v53 = vrot.slane %v568_v29, %v9752_v5  ;;  %v9101_v60 = vcombine.low %v249_v45, %v249_v45  ;;  %v626_v2 = vrot.slane %v610_v42, %v9752_v5 }
  0x28   : > { %v602_v48 = vcombine.high %v598_v41, %v598_v41  ;;  %v617_v55 = vrot.slane %v603_v50, %v9752_v5 }
  0x29   : > { %v600_v56 = vcombine.high %v584_v53, %v584_v53  ;;  %v648_v6 = vcombine.high %v626_v2, %v626_v2 }
  0x2a   : > { %3575 = vmatmul.mubr.bf16.vlgmr.msra.gmra.mxu0 %v479_v51  ;;  %v9100_v51 = vcombine.high %v248_v44, %v248_v44  ;;  %v633_v16 = vrot.slane %v617_v55, %v9752_v5 }
  0x2b   : > { %3637 = vmatpush1.bf16.xpose.msra.mxu0 %v9079_v57  ;;  %3654 = vmatprep.mubr.bf16.mxu0 %v500_v52  ;;  %v9102_v52 = vcombine.high %v249_v45, %v249_v45  ;;  %v250_v57 = vld [vmem:[%s9762_s20 + $0x90] sm:$0xff] }
  0x2c   : > { %3615 = vmatmul.mubr.bf16.vlgmr.msra.gmra.mxu1 %v501_v54  ;;  %3716 = vmatprep.subr.bf16.mxu0 %v9084_v62  ;;  %v640_v54 = vrot.slane %v618_v49, %v9752_v5  ;;  %v619_v62 = vcombine.high %v617_v55, %v617_v55  ;;  %v649_v19 = vcombine.high %v633_v16, %v633_v16 }
  0x2d   : > { %3677 = vmatpush1.bf16.xpose.msra.mxu1 %v9081_v58  ;;  %3694 = vmatprep.mubr.bf16.mxu1 %v504_v59  ;;  %v251_v58 = vld [vmem:[%s9762_s20 + $0x98] sm:$0xff]  ;;  %v9099_v59 = vcombine.low %v248_v44, %v248_v44 }
  0x2e   : > { %3756 = vmatprep.subr.bf16.mxu1 %v9086_v63  ;;  %v650_v61 = vcombine.high %v640_v54, %v640_v54  ;;  %v9104_v63 = vcombine.high %v250_v57, %v250_v57  ;;  %v9105_v10 = vcombine.low %v251_v58, %v251_v58 }
  0x32   : > { %3655 = vmatmul.mubr.bf16.vlgmr.msra.gmra.mxu0 %v486_v0  ;;  %v9106_v0 = vcombine.high %v251_v58, %v251_v58 }
  0x33   : > { %3717 = vmatpush1.bf16.xpose.msra.mxu0 %v9083_v7  ;;  %3734 = vmatprep.mubr.bf16.mxu0 %v542_v1  ;;  %v202_v1 = vld [vmem:[%s9757_s17 + $0x28] sm:$0xff]  ;;  %v252_v7 = vld [vmem:[%s9762_s20 + $0xa0] sm:$0xff] }
  0x34   : > { %3695 = vmatmul.mubr.bf16.vlgmr.msra.gmra.mxu1 %v502_v3  ;;  %3796 = vmatprep.subr.bf16.mxu0 %v9088_v11  ;;  %v647_v3 = vrot.slane %v619_v62, %v9752_v5  ;;  %v659_v4 = vrot.slane %v202_v1, %v9752_v5  ;;  %v652_v13 = vcombine.high %v202_v1, %v202_v1 }
  0x35   : > { %3757 = vmatpush1.bf16.xpose.msra.mxu1 %v9085_v8  ;;  %3774 = vmatprep.mubr.bf16.mxu1 %v552_v9  ;;  %v253_v8 = vld [vmem:[%s9762_s20 + $0xa8] sm:$0xff]  ;;  %v9103_v9 = vcombine.low %v250_v57, %v250_v57 }
  0x36   : > { %3836 = vmatprep.subr.bf16.mxu1 %v9090_v12  ;;  %v651_v11 = vcombine.high %v647_v3, %v647_v3  ;;  %v667_v12 = vcombine.high %v659_v4, %v659_v4  ;;  %v666_v18 = vrot.slane %v652_v13, %v9752_v5  ;;  %v9109_v23 = vcombine.low %v253_v8, %v253_v8 }
  0x37   : > { %v675_v29 = vrot.slane %v659_v4, %v9752_v5 }
  0x38   : > { %v682_v42 = vrot.slane %v666_v18, %v9752_v5 }
  0x39   : > { %v697_v32 = vcombine.high %v675_v29, %v675_v29 }
  0x3a   : > { %3735 = vmatmul.mubr.bf16.vlgmr.msra.gmra.mxu0 %v528_v14  ;;  %v9108_v14 = vcombine.high %v252_v7, %v252_v7  ;;  %v698_v45 = vcombine.high %v682_v42, %v682_v42 }
  0x3b   : > { %3797 = vmatpush1.bf16.xpose.msra.mxu0 %v9087_v20  ;;  %3814 = vmatprep.mubr.bf16.mxu0 %v549_v15  ;;  %v9110_v15 = vcombine.high %v253_v8, %v253_v8  ;;  %v254_v20 = vld [vmem:[%s9762_s20 + $0xb0] sm:$0xff] }
  0x3c   : > { %3775 = vmatmul.mubr.bf16.vlgmr.msra.gmra.mxu1 %v550_v17  ;;  %3876 = vmatprep.subr.bf16.mxu0 %v9092_v25  ;;  %v689_v17 = vrot.slane %v667_v12, %v9752_v5  ;;  %v668_v25 = vcombine.high %v666_v18, %v666_v18 }
  0x3d   : > { %3837 = vmatpush1.bf16.xpose.msra.mxu1 %v9089_v21  ;;  %3854 = vmatprep.mubr.bf16.mxu1 %v553_v22  ;;  %v255_v21 = vld [vmem:[%s9762_s20 + $0xb8] sm:$0xff]  ;;  %v9107_v22 = vcombine.low %v252_v7, %v252_v7 }
  0x3e   : > { %3916 = vmatprep.subr.bf16.mxu1 %v9094_v26  ;;  %v699_v24 = vcombine.high %v689_v17, %v689_v17  ;;  %v9112_v26 = vcombine.high %v254_v20, %v254_v20  ;;  %v9113_v36 = vcombine.low %v255_v21, %v255_v21 }
  0x42   : > { %3815 = vmatmul.mubr.bf16.vlgmr.msra.gmra.mxu0 %v535_v27  ;;  %v9114_v27 = vcombine.high %v255_v21, %v255_v21 }
  0x43   : > { %3877 = vmatpush1.bf16.xpose.msra.mxu0 %v9091_v33  ;;  %3894 = vmatprep.mubr.bf16.mxu0 %v591_v28  ;;  %v203_v28 = vld [vmem:[%s9757_s17 + $0x30] sm:$0xff]  ;;  %v256_v33 = vld [vmem:[%s9762_s20 + $0xc0] sm:$0xff] }
  0x44   : > { %3855 = vmatmul.mubr.bf16.vlgmr.msra.gmra.mxu1 %v551_v30  ;;  %3956 = vmatprep.subr.bf16.mxu0 %v9096_v37  ;;  %v696_v30 = vrot.slane %v668_v25, %v9752_v5  ;;  %v708_v31 = vrot.slane %v203_v28, %v9752_v5  ;;  %v701_v39 = vcombine.high %v203_v28, %v203_v28 }
  0x45   : > { %3917 = vmatpush1.bf16.xpose.msra.mxu1 %v9093_v34  ;;  %3934 = vmatprep.mubr.bf16.mxu1 %v601_v35  ;;  %v257_v34 = vld [vmem:[%s9762_s20 + $0xc8] sm:$0xff]  ;;  %v9111_v35 = vcombine.low %v254_v20, %v254_v20 }
  0x46   : > { %3996 = vmatprep.subr.bf16.mxu1 %v9098_v38  ;;  %v700_v37 = vcombine.high %v696_v30, %v696_v30  ;;  %v716_v38 = vcombine.high %v708_v31, %v708_v31  ;;  %v715_v44 = vrot.slane %v701_v39, %v9752_v5  ;;  %v9117_v49 = vcombine.low %v257_v34, %v257_v34 }
  0x47   : > { %v724_v55 = vrot.slane %v708_v31, %v9752_v5 }
  0x48   : > { %v731_v4 = vrot.slane %v715_v44, %v9752_v5 }
  0x49   : > { %v746_v58 = vcombine.high %v724_v55, %v724_v55 }
  0x4a   : > { %3895 = vmatmul.mubr.bf16.vlgmr.msra.gmra.mxu0 %v577_v40  ;;  %v9116_v40 = vcombine.high %v256_v33, %v256_v33  ;;  %v747_v8 = vcombine.high %v731_v4, %v731_v4 }
  0x4b   : > { %3957 = vmatpush1.bf16.xpose.msra.mxu0 %v9095_v46  ;;  %3974 = vmatprep.mubr.bf16.mxu0 %v598_v41  ;;  %v9118_v41 = vcombine.high %v257_v34, %v257_v34  ;;  %v258_v46 = vld [vmem:[%s9762_s20 + $0xd0] sm:$0xff] }
  0x4c   : > { %3935 = vmatmul.mubr.bf16.vlgmr.msra.gmra.mxu1 %v599_v43  ;;  %4036 = vmatprep.subr.bf16.mxu0 %v9100_v51  ;;  %v738_v43 = vrot.slane %v716_v38, %v9752_v5  ;;  %v717_v51 = vcombine.high %v715_v44, %v715_v44 }
  0x4d   : > { %3997 = vmatpush1.bf16.xpose.msra.mxu1 %v9097_v47  ;;  %4014 = vmatprep.mubr.bf16.mxu1 %v602_v48  ;;  %v259_v47 = vld [vmem:[%s9762_s20 + $0xd8] sm:$0xff]  ;;  %v9115_v48 = vcombine.low %v256_v33, %v256_v33 }
  0x4e   : > { %4076 = vmatprep.subr.bf16.mxu1 %v9102_v52  ;;  %v748_v50 = vcombine.high %v738_v43, %v738_v43  ;;  %v9120_v52 = vcombine.high %v258_v46, %v258_v46  ;;  %v9121_v62 = vcombine.low %v259_v47, %v259_v47 }
  0x52   : > { %3975 = vmatmul.mubr.bf16.vlgmr.msra.gmra.mxu0 %v584_v53  ;;  %v9122_v53 = vcombine.high %v259_v47, %v259_v47 }
  0x53   : > { %4037 = vmatpush1.bf16.xpose.msra.mxu0 %v9099_v59  ;;  %4054 = vmatprep.mubr.bf16.mxu0 %v640_v54  ;;  %v204_v54 = vld [vmem:[%s9757_s17 + $0x38] sm:$0xff]  ;;  %v260_v59 = vld [vmem:[%s9762_s20 + $0xe0] sm:$0xff] }
  0x54   : > { %4015 = vmatmul.mubr.bf16.vlgmr.msra.gmra.mxu1 %v600_v56  ;;  %4116 = vmatprep.subr.bf16.mxu0 %v9104_v63  ;;  %v745_v56 = vrot.slane %v717_v51, %v9752_v5  ;;  %v757_v57 = vrot.slane %v204_v54, %v9752_v5  ;;  %v750_v1 = vcombine.high %v204_v54, %v204_v54 }
  0x55   : > { %4077 = vmatpush1.bf16.xpose.msra.mxu1 %v9101_v60  ;;  %4094 = vmatprep.mubr.bf16.mxu1 %v650_v61  ;;  %v261_v60 = vld [vmem:[%s9762_s20 + $0xe8] sm:$0xff]  ;;  %v9119_v61 = vcombine.low %v258_v46, %v258_v46 }
  0x56   : > { %4156 = vmatprep.subr.bf16.mxu1 %v9106_v0  ;;  %v749_v63 = vcombine.high %v745_v56, %v745_v56  ;;  %v765_v0 = vcombine.high %v757_v57, %v757_v57  ;;  %v764_v7 = vrot.slane %v750_v1, %v9752_v5  ;;  %v9125_v12 = vcombine.low %v261_v60, %v261_v60 }
  0x57   : > { %v773_v18 = vrot.slane %v757_v57, %v9752_v5 }
  0x58   : > { %v780_v31 = vrot.slane %v764_v7, %v9752_v5 }
  0x59   : > { %v795_v21 = vcombine.high %v773_v18, %v773_v18 }
  0x5a   : > { %4055 = vmatmul.mubr.bf16.vlgmr.msra.gmra.mxu0 %v626_v2  ;;  %v9124_v2 = vcombine.high %v260_v59, %v260_v59  ;;  %v796_v34 = vcombine.high %v780_v31, %v780_v31 }
  0x5b   : > { %4117 = vmatpush1.bf16.xpose.msra.mxu0 %v9103_v9  ;;  %4134 = vmatprep.mubr.bf16.mxu0 %v647_v3  ;;  %v9126_v3 = vcombine.high %v261_v60, %v261_v60  ;;  %v262_v9 = vld [vmem:[%s9762_s20 + $0xf0] sm:$0xff] }
  0x5c   : > { %4095 = vmatmul.mubr.bf16.vlgmr.msra.gmra.mxu1 %v648_v6  ;;  %4196 = vmatprep.subr.bf16.mxu0 %v9108_v14  ;;  %v787_v6 = vrot.slane %v765_v0, %v9752_v5  ;;  %v766_v14 = vcombine.high %v764_v7, %v764_v7 }
  0x5d   : > { %4157 = vmatpush1.bf16.xpose.msra.mxu1 %v9105_v10  ;;  %4174 = vmatprep.mubr.bf16.mxu1 %v651_v11  ;;  %v263_v10 = vld [vmem:[%s9762_s20 + $0xf8] sm:$0xff]  ;;  %v9123_v11 = vcombine.low %v260_v59, %v260_v59 }
  0x5e   : > { %4236 = vmatprep.subr.bf16.mxu1 %v9110_v15  ;;  %v797_v13 = vcombine.high %v787_v6, %v787_v6  ;;  %v9128_v15 = vcombine.high %v262_v9, %v262_v9  ;;  %v9129_v25 = vcombine.low %v263_v10, %v263_v10 }
  0x62   : > { %4135 = vmatmul.mubr.bf16.vlgmr.msra.gmra.mxu0 %v633_v16  ;;  %v9130_v16 = vcombine.high %v263_v10, %v263_v10 }
  0x63   : > { %4197 = vmatpush1.bf16.xpose.msra.mxu0 %v9107_v22  ;;  %4214 = vmatprep.mubr.bf16.mxu0 %v689_v17  ;;  %v205_v17 = vld [vmem:[%s9757_s17 + $0x40] sm:$0xff] }
  0x64   : > { %4175 = vmatmul.mubr.bf16.vlgmr.msra.gmra.mxu1 %v649_v19  ;;  %4276 = vmatprep.subr.bf16.mxu0 %v9112_v26  ;;  %v794_v19 = vrot.slane %v766_v14, %v9752_v5  ;;  %v806_v20 = vrot.slane %v205_v17, %v9752_v5  ;;  %v264_v22 = vld [vmem:[%s9762_s20 + $0x100] sm:$0xff]  ;;  %v799_v28 = vcombine.high %v205_v17, %v205_v17 }
  0x65   : > { %4237 = vmatpush1.bf16.xpose.msra.mxu1 %v9109_v23  ;;  %4254 = vmatprep.mubr.bf16.mxu1 %v699_v24  ;;  %v265_v23 = vld [vmem:[%s9762_s20 + $0x108] sm:$0xff]  ;;  %v9127_v24 = vcombine.low %v262_v9, %v262_v9 }
  0x66   : > { %4316 = vmatprep.subr.bf16.mxu1 %v9114_v27  ;;  %v798_v26 = vcombine.high %v794_v19, %v794_v19  ;;  %v814_v27 = vcombine.high %v806_v20, %v806_v20  ;;  %v813_v33 = vrot.slane %v799_v28, %v9752_v5  ;;  %v9133_v38 = vcombine.low %v265_v23, %v265_v23 }
  0x67   : > { %v822_v44 = vrot.slane %v806_v20, %v9752_v5 }
  0x68   : > { %v829_v57 = vrot.slane %v813_v33, %v9752_v5 }
  0x69   : > { %v844_v47 = vcombine.high %v822_v44, %v822_v44 }
  0x6a   : > { %4215 = vmatmul.mubr.bf16.vlgmr.msra.gmra.mxu0 %v675_v29  ;;  %v9132_v29 = vcombine.high %v264_v22, %v264_v22  ;;  %v845_v60 = vcombine.high %v829_v57, %v829_v57 }
  0x6b   : > { %4277 = vmatpush1.bf16.xpose.msra.mxu0 %v9111_v35  ;;  %4294 = vmatprep.mubr.bf16.mxu0 %v696_v30  ;;  %v9134_v30 = vcombine.high %v265_v23, %v265_v23  ;;  %v266_v35 = vld [vmem:[%s9762_s20 + $0x110] sm:$0xff] }
  0x6c   : > { %4255 = vmatmul.mubr.bf16.vlgmr.msra.gmra.mxu1 %v697_v32  ;;  %4356 = vmatprep.subr.bf16.mxu0 %v9116_v40  ;;  %v836_v32 = vrot.slane %v814_v27, %v9752_v5  ;;  %v815_v40 = vcombine.high %v813_v33, %v813_v33 }
  0x6d   : > { %4317 = vmatpush1.bf16.xpose.msra.mxu1 %v9113_v36  ;;  %4334 = vmatprep.mubr.bf16.mxu1 %v700_v37  ;;  %v267_v36 = vld [vmem:[%s9762_s20 + $0x118] sm:$0xff]  ;;  %v9131_v37 = vcombine.low %v264_v22, %v264_v22 }
  0x6e   : > { %4396 = vmatprep.subr.bf16.mxu1 %v9118_v41  ;;  %v846_v39 = vcombine.high %v836_v32, %v836_v32  ;;  %v9136_v41 = vcombine.high %v266_v35, %v266_v35  ;;  %v9137_v51 = vcombine.low %v267_v36, %v267_v36 }
  0x72   : > { %4295 = vmatmul.mubr.bf16.vlgmr.msra.gmra.mxu0 %v682_v42  ;;  %v9138_v42 = vcombine.high %v267_v36, %v267_v36 }
  0x73   : > { %4357 = vmatpush1.bf16.xpose.msra.mxu0 %v9115_v48  ;;  %4374 = vmatprep.mubr.bf16.mxu0 %v738_v43  ;;  %v206_v43 = vld [vmem:[%s9757_s17 + $0x48] sm:$0xff]  ;;  %v268_v48 = vld [vmem:[%s9762_s20 + $0x120] sm:$0xff] }
  0x74   : > { %4335 = vmatmul.mubr.bf16.vlgmr.msra.gmra.mxu1 %v698_v45  ;;  %4436 = vmatprep.subr.bf16.mxu0 %v9120_v52  ;;  %v843_v45 = vrot.slane %v815_v40, %v9752_v5  ;;  %v855_v46 = vrot.slane %v206_v43, %v9752_v5  ;;  %v848_v54 = vcombine.high %v206_v43, %v206_v43 }
  0x75   : > { %4397 = vmatpush1.bf16.xpose.msra.mxu1 %v9117_v49  ;;  %4414 = vmatprep.mubr.bf16.mxu1 %v748_v50  ;;  %v269_v49 = vld [vmem:[%s9762_s20 + $0x128] sm:$0xff]  ;;  %v9135_v50 = vcombine.low %v266_v35, %v266_v35 }
  0x76   : > { %4476 = vmatprep.subr.bf16.mxu1 %v9122_v53  ;;  %v847_v52 = vcombine.high %v843_v45, %v843_v45  ;;  %v863_v53 = vcombine.high %v855_v46, %v855_v46  ;;  %v862_v59 = vrot.slane %v848_v54, %v9752_v5  ;;  %v9141_v0 = vcombine.low %v269_v49, %v269_v49 }
  0x77   : > { %v871_v7 = vrot.slane %v855_v46, %v9752_v5 }
  0x78   : > { %v878_v20 = vrot.slane %v862_v59, %v9752_v5 }
  0x79   : > { %v893_v10 = vcombine.high %v871_v7, %v871_v7 }
  0x7a   : > { %4375 = vmatmul.mubr.bf16.vlgmr.msra.gmra.mxu0 %v724_v55  ;;  %v9140_v55 = vcombine.high %v268_v48, %v268_v48  ;;  %v894_v23 = vcombine.high %v878_v20, %v878_v20 }
  0x7b   : > { %4437 = vmatpush1.bf16.xpose.msra.mxu0 %v9119_v61  ;;  %4454 = vmatprep.mubr.bf16.mxu0 %v745_v56  ;;  %v9142_v56 = vcombine.high %v269_v49, %v269_v49  ;;  %v270_v61 = vld [vmem:[%s9762_s20 + $0x130] sm:$0xff] }
  0x7c   : > { %4415 = vmatmul.mubr.bf16.vlgmr.msra.gmra.mxu1 %v746_v58  ;;  %4516 = vmatprep.subr.bf16.mxu0 %v9124_v2  ;;  %v885_v58 = vrot.slane %v863_v53, %v9752_v5  ;;  %v864_v2 = vcombine.high %v862_v59, %v862_v59 }
  0x7d   : > { %4477 = vmatpush1.bf16.xpose.msra.mxu1 %v9121_v62  ;;  %4494 = vmatprep.mubr.bf16.mxu1 %v749_v63  ;;  %v271_v62 = vld [vmem:[%s9762_s20 + $0x138] sm:$0xff]  ;;  %v9139_v63 = vcombine.low %v268_v48, %v268_v48 }
  0x7e   : > { %4556 = vmatprep.subr.bf16.mxu1 %v9126_v3  ;;  %v895_v1 = vcombine.high %v885_v58, %v885_v58  ;;  %v9144_v3 = vcombine.high %v270_v61, %v270_v61  ;;  %v9145_v14 = vcombine.low %v271_v62, %v271_v62 }
  0x82   : > { %4455 = vmatmul.mubr.bf16.vlgmr.msra.gmra.mxu0 %v731_v4  ;;  %v9146_v4 = vcombine.high %v271_v62, %v271_v62 }
  0x83   : > { %4517 = vmatpush1.bf16.xpose.msra.mxu0 %v9123_v11  ;;  %4534 = vmatprep.mubr.bf16.mxu0 %v787_v6  ;;  %v207_v6 = vld [vmem:[%s9757_s17 + $0x50] sm:$0xff]  ;;  %v272_v11 = vld [vmem:[%s9762_s20 + $0x140] sm:$0xff] }
  0x84   : > { %4495 = vmatmul.mubr.bf16.vlgmr.msra.gmra.mxu1 %v747_v8  ;;  %4596 = vmatprep.subr.bf16.mxu0 %v9128_v15  ;;  %v892_v8 = vrot.slane %v864_v2, %v9752_v5  ;;  %v904_v9 = vrot.slane %v207_v6, %v9752_v5  ;;  %v897_v17 = vcombine.high %v207_v6, %v207_v6 }
  0x85   : > { %4557 = vmatpush1.bf16.xpose.msra.mxu1 %v9125_v12  ;;  %4574 = vmatprep.mubr.bf16.mxu1 %v797_v13  ;;  %v273_v12 = vld [vmem:[%s9762_s20 + $0x148] sm:$0xff]  ;;  %v9143_v13 = vcombine.low %v270_v61, %v270_v61 }
  0x86   : > { %4636 = vmatprep.subr.bf16.mxu1 %v9130_v16  ;;  %v896_v15 = vcombine.high %v892_v8, %v892_v8  ;;  %v912_v16 = vcombine.high %v904_v9, %v904_v9  ;;  %v911_v22 = vrot.slane %v897_v17, %v9752_v5  ;;  %v9149_v27 = vcombine.low %v273_v12, %v273_v12 }
  0x87   : > { %v920_v33 = vrot.slane %v904_v9, %v9752_v5 }
  0x88   : > { %v927_v46 = vrot.slane %v911_v22, %v9752_v5 }
  0x89   : > { %v942_v36 = vcombine.high %v920_v33, %v920_v33 }
  0x8a   : > { %4535 = vmatmul.mubr.bf16.vlgmr.msra.gmra.mxu0 %v773_v18  ;;  %v9148_v18 = vcombine.high %v272_v11, %v272_v11  ;;  %v943_v49 = vcombine.high %v927_v46, %v927_v46 }
  0x8b   : > { %4597 = vmatpush1.bf16.xpose.msra.mxu0 %v9127_v24  ;;  %4614 = vmatprep.mubr.bf16.mxu0 %v794_v19  ;;  %v9150_v19 = vcombine.high %v273_v12, %v273_v12  ;;  %v274_v24 = vld [vmem:[%s9762_s20 + $0x150] sm:$0xff] }
  0x8c   : > { %4575 = vmatmul.mubr.bf16.vlgmr.msra.gmra.mxu1 %v795_v21  ;;  %4676 = vmatprep.subr.bf16.mxu0 %v9132_v29  ;;  %v934_v21 = vrot.slane %v912_v16, %v9752_v5  ;;  %v913_v29 = vcombine.high %v911_v22, %v911_v22 }
  0x8d   : > { %4637 = vmatpush1.bf16.xpose.msra.mxu1 %v9129_v25  ;;  %4654 = vmatprep.mubr.bf16.mxu1 %v798_v26  ;;  %v275_v25 = vld [vmem:[%s9762_s20 + $0x158] sm:$0xff]  ;;  %v9147_v26 = vcombine.low %v272_v11, %v272_v11 }
  0x8e   : > { %4716 = vmatprep.subr.bf16.mxu1 %v9134_v30  ;;  %v944_v28 = vcombine.high %v934_v21, %v934_v21  ;;  %v9152_v30 = vcombine.high %v274_v24, %v274_v24  ;;  %v9153_v40 = vcombine.low %v275_v25, %v275_v25 }
  0x92   : > { %4615 = vmatmul.mubr.bf16.vlgmr.msra.gmra.mxu0 %v780_v31  ;;  %v9154_v31 = vcombine.high %v275_v25, %v275_v25 }
  0x93   : > { %4677 = vmatpush1.bf16.xpose.msra.mxu0 %v9131_v37  ;;  %4694 = vmatprep.mubr.bf16.mxu0 %v836_v32  ;;  %v208_v32 = vld [vmem:[%s9757_s17 + $0x58] sm:$0xff]  ;;  %v276_v37 = vld [vmem:[%s9762_s20 + $0x160] sm:$0xff] }
  0x94   : > { %4655 = vmatmul.mubr.bf16.vlgmr.msra.gmra.mxu1 %v796_v34  ;;  %4756 = vmatprep.subr.bf16.mxu0 %v9136_v41  ;;  %v941_v34 = vrot.slane %v913_v29, %v9752_v5  ;;  %v953_v35 = vrot.slane %v208_v32, %v9752_v5  ;;  %v946_v43 = vcombine.high %v208_v32, %v208_v32 }
  0x95   : > { %4717 = vmatpush1.bf16.xpose.msra.mxu1 %v9133_v38  ;;  %4734 = vmatprep.mubr.bf16.mxu1 %v846_v39  ;;  %v277_v38 = vld [vmem:[%s9762_s20 + $0x168] sm:$0xff]  ;;  %v9151_v39 = vcombine.low %v274_v24, %v274_v24 }
  0x96   : > { %4796 = vmatprep.subr.bf16.mxu1 %v9138_v42  ;;  %v945_v41 = vcombine.high %v941_v34, %v941_v34  ;;  %v961_v42 = vcombine.high %v953_v35, %v953_v35  ;;  %v960_v48 = vrot.slane %v946_v43, %v9752_v5  ;;  %v9157_v53 = vcombine.low %v277_v38, %v277_v38 }
  0x97   : > { %v969_v59 = vrot.slane %v953_v35, %v9752_v5 }
  0x98   : > { %v976_v9 = vrot.slane %v960_v48, %v9752_v5 }
  0x99   : > { %v991_v62 = vcombine.high %v969_v59, %v969_v59 }
  0x9a   : > { %4695 = vmatmul.mubr.bf16.vlgmr.msra.gmra.mxu0 %v822_v44  ;;  %v9156_v44 = vcombine.high %v276_v37, %v276_v37  ;;  %v992_v12 = vcombine.high %v976_v9, %v976_v9 }
  0x9b   : > { %4757 = vmatpush1.bf16.xpose.msra.mxu0 %v9135_v50  ;;  %4774 = vmatprep.mubr.bf16.mxu0 %v843_v45  ;;  %v9158_v45 = vcombine.high %v277_v38, %v277_v38  ;;  %v278_v50 = vld [vmem:[%s9762_s20 + $0x170] sm:$0xff] }
  0x9c   : > { %4735 = vmatmul.mubr.bf16.vlgmr.msra.gmra.mxu1 %v844_v47  ;;  %4836 = vmatprep.subr.bf16.mxu0 %v9140_v55  ;;  %v983_v47 = vrot.slane %v961_v42, %v9752_v5  ;;  %v962_v55 = vcombine.high %v960_v48, %v960_v48 }
  0x9d   : > { %4797 = vmatpush1.bf16.xpose.msra.mxu1 %v9137_v51  ;;  %4814 = vmatprep.mubr.bf16.mxu1 %v847_v52  ;;  %v279_v51 = vld [vmem:[%s9762_s20 + $0x178] sm:$0xff]  ;;  %v9155_v52 = vcombine.low %v276_v37, %v276_v37 }
  0x9e   : > { %4876 = vmatprep.subr.bf16.mxu1 %v9142_v56  ;;  %v993_v54 = vcombine.high %v983_v47, %v983_v47  ;;  %v9160_v56 = vcombine.high %v278_v50, %v278_v50  ;;  %v9161_v2 = vcombine.low %v279_v51, %v279_v51 }
  0xa2   : > { %4775 = vmatmul.mubr.bf16.vlgmr.msra.gmra.mxu0 %v829_v57  ;;  %v9162_v57 = vcombine.high %v279_v51, %v279_v51 }
  0xa3   : > { %4837 = vmatpush1.bf16.xpose.msra.mxu0 %v9139_v63  ;;  %4854 = vmatprep.mubr.bf16.mxu0 %v885_v58  ;;  %v209_v58 = vld [vmem:[%s9757_s17 + $0x60] sm:$0xff] }
  0xa4   : > { %4815 = vmatmul.mubr.bf16.vlgmr.msra.gmra.mxu1 %v845_v60  ;;  %4916 = vmatprep.subr.bf16.mxu0 %v9144_v3  ;;  %v990_v60 = vrot.slane %v962_v55, %v9752_v5  ;;  %v1002_v61 = vrot.slane %v209_v58, %v9752_v5  ;;  %v280_v63 = vld [vmem:[%s9762_s20 + $0x180] sm:$0xff]  ;;  %v995_v6 = vcombine.high %v209_v58, %v209_v58 }
  0xa5   : > { %4877 = vmatpush1.bf16.xpose.msra.mxu1 %v9141_v0  ;;  %4894 = vmatprep.mubr.bf16.mxu1 %v895_v1  ;;  %v281_v0 = vld [vmem:[%s9762_s20 + $0x188] sm:$0xff]  ;;  %v9159_v1 = vcombine.low %v278_v50, %v278_v50 }
  0xa6   : > { %4956 = vmatprep.subr.bf16.mxu1 %v9146_v4  ;;  %v994_v3 = vcombine.high %v990_v60, %v990_v60  ;;  %v1010_v4 = vcombine.high %v1002_v61, %v1002_v61  ;;  %v1009_v11 = vrot.slane %v995_v6, %v9752_v5  ;;  %v9165_v16 = vcombine.low %v281_v0, %v281_v0  ;;  %v288_v6 = vld [vmem:[%s9762_s20 + $0x1c0] sm:$0xff] }
  0xa7   : > { %v1018_v22 = vrot.slane %v1002_v61, %v9752_v5 }
  0xa8   : > { %v1025_v37 = vrot.slane %v1009_v11, %v9752_v5 }
  0xa9   : > { %v1040_v25 = vcombine.high %v1018_v22, %v1018_v22 }
  0xaa   : > { %4855 = vmatmul.mubr.bf16.vlgmr.msra.gmra.mxu0 %v871_v7  ;;  %v9164_v7 = vcombine.high %v280_v63, %v280_v63 }
  0xab   : > { %4917 = vmatpush1.bf16.xpose.msra.mxu0 %v9143_v13  ;;  %4934 = vmatprep.mubr.bf16.mxu0 %v892_v8  ;;  %v9166_v8 = vcombine.high %v281_v0, %v281_v0  ;;  %v282_v13 = vld [vmem:[%s9762_s20 + $0x190] sm:$0xff] }
  0xac   : > { %4895 = vmatmul.mubr.bf16.vlgmr.msra.gmra.mxu1 %v893_v10  ;;  %4996 = vmatprep.subr.bf16.mxu0 %v9148_v18  ;;  %v1032_v10 = vrot.slane %v1010_v4, %v9752_v5  ;;  %v1011_v18 = vcombine.high %v1009_v11, %v1009_v11 }
  0xad   : > { %4957 = vmatpush1.bf16.xpose.msra.mxu1 %v9145_v14  ;;  %4974 = vmatprep.mubr.bf16.mxu1 %v896_v15  ;;  %v283_v14 = vld [vmem:[%s9762_s20 + $0x198] sm:$0xff]  ;;  %v9163_v15 = vcombine.low %v280_v63, %v280_v63 }
  0xae   : > { %5036 = vmatprep.subr.bf16.mxu1 %v9150_v19  ;;  %v1042_v17 = vcombine.high %v1032_v10, %v1032_v10  ;;  %v9168_v19 = vcombine.high %v282_v13, %v282_v13  ;;  %v9169_v29 = vcombine.low %v283_v14, %v283_v14 }
  0xb2   : > { %4935 = vmatmul.mubr.bf16.vlgmr.msra.gmra.mxu0 %v878_v20  ;;  %v9170_v20 = vcombine.high %v283_v14, %v283_v14 }
  0xb3   : > { %4997 = vmatpush1.bf16.xpose.msra.mxu0 %v9147_v26  ;;  %5014 = vmatprep.mubr.bf16.mxu0 %v934_v21  ;;  %v210_v21 = vld [vmem:[%s9757_s17 + $0x68] sm:$0xff]  ;;  %v284_v26 = vld [vmem:[%s9762_s20 + $0x1a0] sm:$0xff] }
  0xb4   : > { %4975 = vmatmul.mubr.bf16.vlgmr.msra.gmra.mxu1 %v894_v23  ;;  %5076 = vmatprep.subr.bf16.mxu0 %v9152_v30  ;;  %v1039_v23 = vrot.slane %v1011_v18, %v9752_v5  ;;  %v1051_v24 = vrot.slane %v210_v21, %v9752_v5  ;;  %v1044_v32 = vcombine.high %v210_v21, %v210_v21 }
  0xb5   : > { %5037 = vmatpush1.bf16.xpose.msra.mxu1 %v9149_v27  ;;  %5054 = vmatprep.mubr.bf16.mxu1 %v944_v28  ;;  %v285_v27 = vld [vmem:[%s9762_s20 + $0x1a8] sm:$0xff]  ;;  %v9167_v28 = vcombine.low %v282_v13, %v282_v13  ;;  %v9171_v48 = vcombine.low %v284_v26, %v284_v26 }
  0xb6   : > { %5116 = vmatprep.subr.bf16.mxu1 %v9154_v31  ;;  %v1043_v30 = vcombine.high %v1039_v23, %v1039_v23  ;;  %v1059_v31 = vcombine.high %v1051_v24, %v1051_v24  ;;  %v1058_v42 = vrot.slane %v1044_v32, %v9752_v5 }
  0xba   : > { %5015 = vmatmul.mubr.bf16.vlgmr.msra.gmra.mxu0 %v920_v33  ;;  %v9172_v33 = vcombine.high %v284_v26, %v284_v26 }
  0xbb   : > { %5077 = vmatpush1.bf16.xpose.msra.mxu0 %v9151_v39  ;;  %5094 = vmatprep.mubr.bf16.mxu0 %v941_v34  ;;  %v9174_v34 = vcombine.high %v285_v27, %v285_v27 }
  0xbc   : > { %5055 = vmatmul.mubr.bf16.vlgmr.msra.gmra.mxu1 %v942_v36  ;;  %5156 = vmatprep.subr.bf16.mxu0 %v9156_v44 }
  0xbd   : > { %5117 = vmatpush1.bf16.xpose.msra.mxu1 %v9153_v40  ;;  %5134 = vmatprep.mubr.bf16.mxu1 %v945_v41  ;;  %v1081_v41 = vrot.slane %v1059_v31, %v9752_v5  ;;  %v9179_v31 = vcombine.low %v288_v6, %v288_v6 }
  0xbe   : > { %5196 = vmatprep.subr.bf16.mxu1 %v9158_v45  ;;  %v1041_v45 = vcombine.high %v1025_v37, %v1025_v37 }
  0xc2   : > { %5095 = vmatmul.mubr.bf16.vlgmr.msra.gmra.mxu0 %v927_v46  ;;  %v286_v46 = vld [vmem:[%s9762_s20 + $0x1b0] sm:$0xff] }
  0xc3   : > { %5157 = vmatpush1.bf16.xpose.msra.mxu0 %v9155_v52  ;;  %5174 = vmatprep.mubr.bf16.mxu0 %v983_v47  ;;  %v287_v47 = vld [vmem:[%s9762_s20 + $0x1b8] sm:$0xff]  ;;  %v1091_v52 = vcombine.high %v1081_v41, %v1081_v41 }
  0xc4   : > { %5135 = vmatmul.mubr.bf16.vlgmr.msra.gmra.mxu1 %v943_v49  ;;  %5236 = vmatprep.subr.bf16.mxu0 %v9160_v56  ;;  %v9173_v49 = vcombine.low %v285_v27, %v285_v27  ;;  %v9178_v55 = vcombine.high %v287_v47, %v287_v47  ;;  %v211_v56 = vld [vmem:[%s9757_s17 + $0x70] sm:$0xff] }
  0xc5   : > { %5197 = vmatpush1.bf16.xpose.msra.mxu1 %v9157_v53  ;;  %5214 = vmatprep.mubr.bf16.mxu1 %v993_v54  ;;  %v1060_v53 = vcombine.high %v1058_v42, %v1058_v42  ;;  %v9176_v54 = vcombine.high %v286_v46, %v286_v46  ;;  %v1100_v0 = vrot.slane %v211_v56, %v9752_v5 }
  0xc6   : > { %5276 = vmatprep.subr.bf16.mxu1 %v9162_v57  ;;  %v1093_v14 = vcombine.high %v211_v56, %v211_v56 }
  0xc7   : > { %v1088_v63 = vrot.slane %v1060_v53, %v9752_v5  ;;  %v1108_v13 = vcombine.high %v1100_v0, %v1100_v0  ;;  %v293_v53 = vld [vmem:[%s9762_s20 + $0x1e8] sm:$0xff] }
  0xca   : > { %5175 = vmatmul.mubr.bf16.vlgmr.msra.gmra.mxu0 %v969_v59  ;;  %v1067_v59 = vrot.slane %v1051_v24, %v9752_v5  ;;  %v1107_v24 = vrot.slane %v1093_v14, %v9752_v5 }
  0xcb   : > { %5237 = vmatpush1.bf16.xpose.msra.mxu0 %v9159_v1  ;;  %5254 = vmatprep.mubr.bf16.mxu0 %v990_v60 }
  0xcc   : > { %5215 = vmatmul.mubr.bf16.vlgmr.msra.gmra.mxu1 %v991_v62  ;;  %5316 = vmatprep.subr.bf16.mxu0 %v9164_v7  ;;  %v1089_v4 = vcombine.high %v1067_v59, %v1067_v59  ;;  %v289_v7 = vld [vmem:[%s9762_s20 + $0x1c8] sm:$0xff] }
  0xcd   : > { %5277 = vmatpush1.bf16.xpose.msra.mxu1 %v9161_v2  ;;  %5294 = vmatprep.mubr.bf16.mxu1 %v994_v3  ;;  %v9181_v32 = vcombine.low %v289_v7, %v289_v7 }
  0xce   : > { %5356 = vmatprep.subr.bf16.mxu1 %v9166_v8  ;;  %v9175_v8 = vcombine.low %v286_v46, %v286_v46 }
  0xd2   : > { %5255 = vmatmul.mubr.bf16.vlgmr.msra.gmra.mxu0 %v976_v9  ;;  %v9177_v9 = vcombine.low %v287_v47, %v287_v47 }
  0xd3   : > { %5317 = vmatpush1.bf16.xpose.msra.mxu0 %v9163_v15  ;;  %5334 = vmatprep.mubr.bf16.mxu0 %v1032_v10  ;;  %v9180_v15 = vcombine.high %v288_v6, %v288_v6 }
  0xd4   : > { %5295 = vmatmul.mubr.bf16.vlgmr.msra.gmra.mxu1 %v992_v12  ;;  %5396 = vmatprep.subr.bf16.mxu0 %v9168_v19  ;;  %v1092_v12 = vcombine.high %v1088_v63, %v1088_v63  ;;  %v1074_v19 = vrot.slane %v1058_v42, %v9752_v5  ;;  %v1116_v42 = vrot.slane %v1100_v0, %v9752_v5 }
  0xd5   : > { %5357 = vmatpush1.bf16.xpose.msra.mxu1 %v9165_v16  ;;  %5374 = vmatprep.mubr.bf16.mxu1 %v1042_v17  ;;  %v9182_v16 = vcombine.high %v289_v7, %v289_v7 }
  0xd6   : > { %5436 = vmatprep.subr.bf16.mxu1 %v9170_v20 }
  0xda   : > { %v3416_v35 = vpop.f32.mrf.mxu0  ;;  %5335 = vmatmul.mubr.bf16.vlgmr.msra.gmra.mxu0 %v1018_v22 }
  0xdb   : > { %5397 = vmatpush1.bf16.xpose.msra.mxu0 %v9167_v28  ;;  %5414 = vmatprep.mubr.bf16.mxu0 %v1039_v23  ;;  %v1130_v23 = vrot.slane %v1108_v13, %v9752_v5  ;;  %v1090_v28 = vcombine.high %v1074_v19, %v1074_v19  ;;  %v295_v13 = vld [vmem:[%s9762_s20 + $0x1f8] sm:$0xff] }
  0xdc   : > { %v3456_v36 = vpop.f32.mrf.mxu1  ;;  %5375 = vmatmul.mubr.bf16.vlgmr.msra.gmra.mxu1 %v1040_v25  ;;  %v3418_v39 = vpop.f32.mrf.mxu0  ;;  %5476 = vmatprep.subr.bf16.mxu0 %v9172_v33 }
  0xdd   : > { %v3457_v38 = vadd.f32 %v3456_v36, %v3416_v35  ;;  %5437 = vmatpush1.bf16.xpose.msra.mxu1 %v9169_v29  ;;  %5454 = vmatprep.mubr.bf16.mxu1 %v1043_v30  ;;  %v290_v29 = vld [vmem:[%s9762_s20 + $0x1d0] sm:$0xff]  ;;  %v291_v30 = vld [vmem:[%s9762_s20 + $0x1d8] sm:$0xff]  ;;  %v1140_v35 = vcombine.high %v1130_v23, %v1130_v23  ;;  %v1109_v36 = vcombine.high %v1107_v24, %v1107_v24 }
  0xde   : > { %v3458_v40 = vpop.f32.mrf.mxu1  ;;  %5516 = vmatprep.subr.bf16.mxu1 %v9174_v34  ;;  %v3419_v43 = vpop.f32.mrf.mxu0  ;;  %v212_v39 = vld [vmem:[%s9757_s17 + $0x78] sm:$0xff] }
  0xdf   : > { %v1137_v46 = vrot.slane %v1109_v36, %v9752_v5  ;;  %v1149_v47 = vrot.slane %v212_v39, %v9752_v5  ;;  %v297_v36 = vld [vmem:[%s9762_s20 + $0x208] sm:$0xff] }
  0xe0   : > { %v3459_v44 = vpop.f32.mrf.mxu1  ;;  %v3420_v50 = vpop.f32.mrf.mxu0 }
  0xe2   : > { %v3460_v51 = vpop.f32.mrf.mxu1  ;;  %v3496_v57 = vpop.f32.mrf.mxu0  ;;  %5415 = vmatmul.mubr.bf16.vlgmr.msra.gmra.mxu0 %v1025_v37  ;;  %v9184_v37 = vcombine.high %v290_v29, %v290_v29 }
  0xe3   : > { %v3497_v60 = vadd.f32 %v3496_v57, %v3457_v38  ;;  %5477 = vmatpush1.bf16.xpose.msra.mxu0 %v9171_v48  ;;  %5494 = vmatprep.mubr.bf16.mxu0 %v1081_v41  ;;  %v9186_v38 = vcombine.high %v291_v30, %v291_v30  ;;  %v1138_v51 = vcombine.high %v1116_v42, %v1116_v42 }
  0xe4   : > { %v3536_v58 = vpop.f32.mrf.mxu1  ;;  %5455 = vmatmul.mubr.bf16.vlgmr.msra.gmra.mxu1 %v1041_v45  ;;  %v3498_v61 = vpop.f32.mrf.mxu0  ;;  %5556 = vmatprep.subr.bf16.mxu0 %v9176_v54  ;;  %v9183_v54 = vcombine.low %v290_v29, %v290_v29 }
  0xe5   : > { %5517 = vmatpush1.bf16.xpose.msra.mxu1 %v9173_v49  ;;  %5534 = vmatprep.mubr.bf16.mxu1 %v1091_v52  ;;  %v3537_v1 = vadd.f32 %v3536_v58, %v3497_v60  ;;  %v292_v52 = vld [vmem:[%s9762_s20 + $0x1e0] sm:$0xff]  ;;  %v1141_v58 = vcombine.high %v1137_v46, %v1137_v46  ;;  %v1142_v60 = vcombine.high %v212_v39, %v212_v39 }
  0xe6   : > { %v3538_v62 = vpop.f32.mrf.mxu1  ;;  %5596 = vmatprep.subr.bf16.mxu1 %v9178_v55  ;;  %v3499_v2 = vpop.f32.mrf.mxu0  ;;  %v9185_v55 = vcombine.low %v291_v30, %v291_v30  ;;  %v9188_v61 = vcombine.high %v292_v52, %v292_v52  ;;  %v9187_v14 = vcombine.low %v292_v52, %v292_v52 }
  0xe7   : > { %v9190_v62 = vcombine.high %v293_v53, %v293_v53  ;;  %v1156_v7 = vrot.slane %v1142_v60, %v9752_v5 }
  0xe8   : > { %v3539_v3 = vpop.f32.mrf.mxu1  ;;  %v3500_v10 = vpop.f32.mrf.mxu0 }
  0xea   : > { %v3540_v11 = vpop.f32.mrf.mxu1  ;;  %v3576_v17 = vpop.f32.mrf.mxu0  ;;  %5495 = vmatmul.mubr.bf16.vlgmr.msra.gmra.mxu0 %v1067_v59  ;;  %v1157_v59 = vcombine.high %v1149_v47, %v1149_v47 }
  0xeb   : > { %v3577_v20 = vadd.f32 %v3576_v17, %v3537_v1  ;;  %5557 = vmatpush1.bf16.xpose.msra.mxu0 %v9175_v8  ;;  %5574 = vmatprep.mubr.bf16.mxu0 %v1088_v63  ;;  %v1123_v1 = vrot.slane %v1107_v24, %v9752_v5 }
  0xec   : > { %v3616_v18 = vpop.f32.mrf.mxu1  ;;  %5535 = vmatmul.mubr.bf16.vlgmr.msra.gmra.mxu1 %v1089_v4  ;;  %v3578_v21 = vpop.f32.mrf.mxu0  ;;  %5636 = vmatprep.subr.bf16.mxu0 %v9180_v15  ;;  %v1179_v6 = vrot.slane %v1157_v59, %v9752_v5  ;;  %v9189_v15 = vcombine.low %v293_v53, %v293_v53  ;;  %v299_v59 = vld [vmem:[%s9762_s20 + $0x218] sm:$0xff] }
  0xed   : > { %5597 = vmatpush1.bf16.xpose.msra.mxu1 %v9177_v9  ;;  %5614 = vmatprep.mubr.bf16.mxu1 %v1092_v12  ;;  %v3617_v25 = vadd.f32 %v3616_v18, %v3577_v20  ;;  %v1139_v11 = vcombine.high %v1123_v1, %v1123_v1  ;;  %v294_v12 = vld [vmem:[%s9762_s20 + $0x1f0] sm:$0xff]  ;;  %v9194_v21 = vcombine.high %v295_v13, %v295_v13 }
  0xee   : > { %v3618_v22 = vpop.f32.mrf.mxu1  ;;  %5676 = vmatprep.subr.bf16.mxu1 %v9182_v16  ;;  %v3579_v26 = vpop.f32.mrf.mxu0  ;;  %v1189_v18 = vcombine.high %v1179_v6, %v1179_v6  ;;  %v9192_v20 = vcombine.high %v294_v12, %v294_v12 }
  0xef   : > { %v213_v22 = vld [vmem:[%s9757_s17 + $0x80] sm:$0xff] }
  0xf0   : > { %v3619_v27 = vpop.f32.mrf.mxu1  ;;  %v3580_v33 = vpop.f32.mrf.mxu0  ;;  %v1198_v30 = vrot.slane %v213_v22, %v9752_v5 }
  0xf2   : > { %v3620_v34 = vpop.f32.mrf.mxu1  ;;  %v3656_v40 = vpop.f32.mrf.mxu0  ;;  %5575 = vmatmul.mubr.bf16.vlgmr.msra.gmra.mxu0 %v1074_v19  ;;  %v1158_v19 = vcombine.high %v1156_v7, %v1156_v7 }
  0xf3   : > { %v3657_v43 = vadd.f32 %v3656_v40, %v3617_v25  ;;  %5637 = vmatpush1.bf16.xpose.msra.mxu0 %v9179_v31  ;;  %5654 = vmatprep.mubr.bf16.mxu0 %v1130_v23  ;;  %v1165_v25 = vrot.slane %v1149_v47, %v9752_v5 }
  0xf4   : > { %v3696_v41 = vpop.f32.mrf.mxu1  ;;  %5615 = vmatmul.mubr.bf16.vlgmr.msra.gmra.mxu1 %v1090_v28  ;;  %v3658_v44 = vpop.f32.mrf.mxu0  ;;  %5716 = vmatprep.subr.bf16.mxu0 %v9184_v37  ;;  %v1186_v29 = vrot.slane %v1158_v19, %v9752_v5  ;;  %v9191_v37 = vcombine.low %v294_v12, %v294_v12  ;;  %v301_v19 = vld [vmem:[%s9762_s20 + $0x228] sm:$0xff] }
  0xf5   : > { %5677 = vmatpush1.bf16.xpose.msra.mxu1 %v9181_v32  ;;  %5694 = vmatprep.mubr.bf16.mxu1 %v1140_v35  ;;  %v3697_v48 = vadd.f32 %v3696_v41, %v3657_v43  ;;  %v1187_v34 = vcombine.high %v1165_v25, %v1165_v25  ;;  %v296_v35 = vld [vmem:[%s9762_s20 + $0x200] sm:$0xff]  ;;  %v1191_v43 = vcombine.high %v213_v22, %v213_v22 }
  0xf6   : > { %v3698_v45 = vpop.f32.mrf.mxu1  ;;  %5756 = vmatprep.subr.bf16.mxu1 %v9186_v38  ;;  %v3659_v49 = vpop.f32.mrf.mxu0  ;;  %v9193_v38 = vcombine.low %v295_v13, %v295_v13  ;;  %v1190_v41 = vcombine.high %v1186_v29, %v1186_v29  ;;  %v9196_v44 = vcombine.high %v296_v35, %v296_v35  ;;  %v9195_v60 = vcombine.low %v296_v35, %v296_v35 }
  0xf7   : > { %v9198_v45 = vcombine.high %v297_v36, %v297_v36  ;;  %v1205_v53 = vrot.slane %v1191_v43, %v9752_v5 }
  0xf8   : > { %v3699_v50 = vpop.f32.mrf.mxu1  ;;  %v3660_v56 = vpop.f32.mrf.mxu0 }
  0xfa   : > { %v3700_v57 = vpop.f32.mrf.mxu1  ;;  %v3736_v63 = vpop.f32.mrf.mxu0  ;;  %5655 = vmatmul.mubr.bf16.vlgmr.msra.gmra.mxu0 %v1116_v42  ;;  %v1206_v42 = vcombine.high %v1198_v30, %v1198_v30 }
  0xfb   : > { %v3737_v2 = vadd.f32 %v3736_v63, %v3697_v48  ;;  %5717 = vmatpush1.bf16.xpose.msra.mxu0 %v9183_v54  ;;  %5734 = vmatprep.mubr.bf16.mxu0 %v1137_v46  ;;  %v1172_v48 = vrot.slane %v1156_v7, %v9752_v5 }
  0xfc   : > { %v3776_v0 = vpop.f32.mrf.mxu1  ;;  %5695 = vmatmul.mubr.bf16.vlgmr.msra.gmra.mxu1 %v1138_v51  ;;  %v3738_v3 = vpop.f32.mrf.mxu0  ;;  %5796 = vmatprep.subr.bf16.mxu0 %v9188_v61  ;;  %v1228_v52 = vrot.slane %v1206_v42, %v9752_v5  ;;  %v9197_v61 = vcombine.low %v297_v36, %v297_v36  ;;  %v303_v42 = vld [vmem:[%s9762_s20 + $0x238] sm:$0xff] }
  0xfd   : > { %5757 = vmatpush1.bf16.xpose.msra.mxu1 %v9185_v55  ;;  %5774 = vmatprep.mubr.bf16.mxu1 %v1141_v58  ;;  %v3777_v8 = vadd.f32 %v3776_v0, %v3737_v2  ;;  %v1188_v57 = vcombine.high %v1172_v48, %v1172_v48  ;;  %v298_v58 = vld [vmem:[%s9762_s20 + $0x210] sm:$0xff]  ;;  %v9202_v3 = vcombine.high %v299_v59, %v299_v59 }
  0xfe   : > { %v3778_v4 = vpop.f32.mrf.mxu1  ;;  %5836 = vmatprep.subr.bf16.mxu1 %v9190_v62  ;;  %v3739_v9 = vpop.f32.mrf.mxu0  ;;  %v1238_v0 = vcombine.high %v1228_v52, %v1228_v52  ;;  %v9200_v2 = vcombine.high %v298_v58, %v298_v58 }
  0xff   : > { %v214_v4 = vld [vmem:[%s9757_s17 + $0x88] sm:$0xff] }
 0x100   : > { %v3779_v10 = vpop.f32.mrf.mxu1  ;;  %v3740_v16 = vpop.f32.mrf.mxu0  ;;  %v1247_v13 = vrot.slane %v214_v4, %v9752_v5 }
 0x102   : > { %v3780_v17 = vpop.f32.mrf.mxu1  ;;  %v3816_v23 = vpop.f32.mrf.mxu0  ;;  %5735 = vmatmul.mubr.bf16.vlgmr.msra.gmra.mxu0 %v1123_v1  ;;  %v1207_v1 = vcombine.high %v1205_v53, %v1205_v53 }
 0x103   : > { %v3817_v26 = vadd.f32 %v3816_v23, %v3777_v8  ;;  %5797 = vmatpush1.bf16.xpose.msra.mxu0 %v9187_v14  ;;  %5814 = vmatprep.mubr.bf16.mxu0 %v1179_v6  ;;  %v1214_v8 = vrot.slane %v1198_v30, %v9752_v5 }
 0x104   : > { %v3856_v24 = vpop.f32.mrf.mxu1  ;;  %5775 = vmatmul.mubr.bf16.vlgmr.msra.gmra.mxu1 %v1139_v11  ;;  %v3818_v27 = vpop.f32.mrf.mxu0  ;;  %5876 = vmatprep.subr.bf16.mxu0 %v9192_v20  ;;  %v1235_v12 = vrot.slane %v1207_v1, %v9752_v5  ;;  %v9199_v20 = vcombine.low %v298_v58, %v298_v58  ;;  %v305_v1 = vld [vmem:[%s9762_s20 + $0x248] sm:$0xff] }
 0x105   : > { %5837 = vmatpush1.bf16.xpose.msra.mxu1 %v9189_v15  ;;  %5854 = vmatprep.mubr.bf16.mxu1 %v1189_v18  ;;  %v3857_v31 = vadd.f32 %v3856_v24, %v3817_v26  ;;  %v1236_v17 = vcombine.high %v1214_v8, %v1214_v8  ;;  %v300_v18 = vld [vmem:[%s9762_s20 + $0x220] sm:$0xff]  ;;  %v1240_v26 = vcombine.high %v214_v4, %v214_v4 }
 0x106   : > { %v3858_v28 = vpop.f32.mrf.mxu1  ;;  %5916 = vmatprep.subr.bf16.mxu1 %v9194_v21  ;;  %v3819_v32 = vpop.f32.mrf.mxu0  ;;  %v9201_v21 = vcombine.low %v299_v59, %v299_v59  ;;  %v1239_v24 = vcombine.high %v1235_v12, %v1235_v12  ;;  %v9204_v27 = vcombine.high %v300_v18, %v300_v18  ;;  %v9203_v43 = vcombine.low %v300_v18, %v300_v18 }
 0x107   : > { %v9206_v28 = vcombine.high %v301_v19, %v301_v19  ;;  %v1254_v36 = vrot.slane %v1240_v26, %v9752_v5 }
 0x108   : > { %v3859_v33 = vpop.f32.mrf.mxu1  ;;  %v3820_v39 = vpop.f32.mrf.mxu0 }
 0x10a   : > { %v3860_v40 = vpop.f32.mrf.mxu1  ;;  %v3896_v46 = vpop.f32.mrf.mxu0  ;;  %5815 = vmatmul.mubr.bf16.vlgmr.msra.gmra.mxu0 %v1165_v25  ;;  %v1255_v25 = vcombine.high %v1247_v13, %v1247_v13 }
 0x10b   : > { %v3897_v49 = vadd.f32 %v3896_v46, %v3857_v31  ;;  %5877 = vmatpush1.bf16.xpose.msra.mxu0 %v9191_v37  ;;  %5894 = vmatprep.mubr.bf16.mxu0 %v1186_v29  ;;  %v1221_v31 = vrot.slane %v1205_v53, %v9752_v5 }
 0x10c   : > { %v3936_v47 = vpop.f32.mrf.mxu1  ;;  %5855 = vmatmul.mubr.bf16.vlgmr.msra.gmra.mxu1 %v1187_v34  ;;  %v3898_v50 = vpop.f32.mrf.mxu0  ;;  %5956 = vmatprep.subr.bf16.mxu0 %v9196_v44  ;;  %v1277_v35 = vrot.slane %v1255_v25, %v9752_v5  ;;  %v9205_v44 = vcombine.low %v301_v19, %v301_v19  ;;  %v307_v25 = vld [vmem:[%s9762_s20 + $0x258] sm:$0xff] }
 0x10d   : > { %5917 = vmatpush1.bf16.xpose.msra.mxu1 %v9193_v38  ;;  %5934 = vmatprep.mubr.bf16.mxu1 %v1190_v41  ;;  %v3937_v54 = vadd.f32 %v3936_v47, %v3897_v49  ;;  %v1237_v40 = vcombine.high %v1221_v31, %v1221_v31  ;;  %v302_v41 = vld [vmem:[%s9762_s20 + $0x230] sm:$0xff]  ;;  %v9210_v50 = vcombine.high %v303_v42, %v303_v42 }
 0x10e   : > { %v3938_v51 = vpop.f32.mrf.mxu1  ;;  %5996 = vmatprep.subr.bf16.mxu1 %v9198_v45  ;;  %v3899_v55 = vpop.f32.mrf.mxu0  ;;  %v1287_v47 = vcombine.high %v1277_v35, %v1277_v35  ;;  %v9208_v49 = vcombine.high %v302_v41, %v302_v41 }
 0x10f   : > { %v215_v51 = vld [vmem:[%s9757_s17 + $0x90] sm:$0xff] }
 0x110   : > { %v3939_v56 = vpop.f32.mrf.mxu1  ;;  %v3900_v62 = vpop.f32.mrf.mxu0  ;;  %v1296_v59 = vrot.slane %v215_v51, %v9752_v5 }
 0x112   : > { %v3940_v63 = vpop.f32.mrf.mxu1  ;;  %v3976_v6 = vpop.f32.mrf.mxu0  ;;  %5895 = vmatmul.mubr.bf16.vlgmr.msra.gmra.mxu0 %v1172_v48  ;;  %v1256_v48 = vcombine.high %v1254_v36, %v1254_v36 }
 0x113   : > { %v3977_v9 = vadd.f32 %v3976_v6, %v3937_v54  ;;  %5957 = vmatpush1.bf16.xpose.msra.mxu0 %v9195_v60  ;;  %5974 = vmatprep.mubr.bf16.mxu0 %v1228_v52  ;;  %v1263_v54 = vrot.slane %v1247_v13, %v9752_v5 }
 0x114   : > { %v4016_v7 = vpop.f32.mrf.mxu1  ;;  %5935 = vmatmul.mubr.bf16.vlgmr.msra.gmra.mxu1 %v1188_v57  ;;  %v3978_v10 = vpop.f32.mrf.mxu0  ;;  %6036 = vmatprep.subr.bf16.mxu0 %v9200_v2  ;;  %v1284_v58 = vrot.slane %v1256_v48, %v9752_v5  ;;  %v9207_v2 = vcombine.low %v302_v41, %v302_v41  ;;  %v309_v48 = vld [vmem:[%s9762_s20 + $0x268] sm:$0xff] }
 0x115   : > { %5997 = vmatpush1.bf16.xpose.msra.mxu1 %v9197_v61  ;;  %6014 = vmatprep.mubr.bf16.mxu1 %v1238_v0  ;;  %v4017_v14 = vadd.f32 %v4016_v7, %v3977_v9  ;;  %v1285_v63 = vcombine.high %v1263_v54, %v1263_v54  ;;  %v304_v0 = vld [vmem:[%s9762_s20 + $0x240] sm:$0xff]  ;;  %v1289_v9 = vcombine.high %v215_v51, %v215_v51 }
 0x116   : > { %v4018_v11 = vpop.f32.mrf.mxu1  ;;  %6076 = vmatprep.subr.bf16.mxu1 %v9202_v3  ;;  %v3979_v15 = vpop.f32.mrf.mxu0  ;;  %v9209_v3 = vcombine.low %v303_v42, %v303_v42  ;;  %v1288_v7 = vcombine.high %v1284_v58, %v1284_v58  ;;  %v9212_v10 = vcombine.high %v304_v0, %v304_v0  ;;  %v9211_v26 = vcombine.low %v304_v0, %v304_v0 }
 0x117   : > { %v9214_v11 = vcombine.high %v305_v1, %v305_v1  ;;  %v1303_v19 = vrot.slane %v1289_v9, %v9752_v5 }
 0x118   : > { %v4019_v16 = vpop.f32.mrf.mxu1  ;;  %v3980_v22 = vpop.f32.mrf.mxu0 }
 0x11a   : > { %v4020_v23 = vpop.f32.mrf.mxu1  ;;  %v4056_v29 = vpop.f32.mrf.mxu0  ;;  %5975 = vmatmul.mubr.bf16.vlgmr.msra.gmra.mxu0 %v1214_v8  ;;  %v1304_v8 = vcombine.high %v1296_v59, %v1296_v59 }
 0x11b   : > { %v4057_v32 = vadd.f32 %v4056_v29, %v4017_v14  ;;  %6037 = vmatpush1.bf16.xpose.msra.mxu0 %v9199_v20  ;;  %6054 = vmatprep.mubr.bf16.mxu0 %v1235_v12  ;;  %v1270_v14 = vrot.slane %v1254_v36, %v9752_v5 }
 0x11c   : > { %v4096_v30 = vpop.f32.mrf.mxu1  ;;  %6015 = vmatmul.mubr.bf16.vlgmr.msra.gmra.mxu1 %v1236_v17  ;;  %v4058_v33 = vpop.f32.mrf.mxu0  ;;  %6116 = vmatprep.subr.bf16.mxu0 %v9204_v27  ;;  %v1326_v18 = vrot.slane %v1304_v8, %v9752_v5  ;;  %v9213_v27 = vcombine.low %v305_v1, %v305_v1  ;;  %v311_v8 = vld [vmem:[%s9762_s20 + $0x278] sm:$0xff] }
 0x11d   : > { %6077 = vmatpush1.bf16.xpose.msra.mxu1 %v9201_v21  ;;  %6094 = vmatprep.mubr.bf16.mxu1 %v1239_v24  ;;  %v4097_v37 = vadd.f32 %v4096_v30, %v4057_v32  ;;  %v1286_v23 = vcombine.high %v1270_v14, %v1270_v14  ;;  %v306_v24 = vld [vmem:[%s9762_s20 + $0x250] sm:$0xff]  ;;  %v9218_v33 = vcombine.high %v307_v25, %v307_v25 }
 0x11e   : > { %v4098_v34 = vpop.f32.mrf.mxu1  ;;  %6156 = vmatprep.subr.bf16.mxu1 %v9206_v28  ;;  %v4059_v38 = vpop.f32.mrf.mxu0  ;;  %v1336_v30 = vcombine.high %v1326_v18, %v1326_v18  ;;  %v9216_v32 = vcombine.high %v306_v24, %v306_v24 }
 0x11f   : > { %v216_v34 = vld [vmem:[%s9757_s17 + $0x98] sm:$0xff] }
 0x120   : > { %v4099_v39 = vpop.f32.mrf.mxu1  ;;  %v4060_v45 = vpop.f32.mrf.mxu0  ;;  %v1345_v42 = vrot.slane %v216_v34, %v9752_v5 }
 0x122   : > { %v4100_v46 = vpop.f32.mrf.mxu1  ;;  %v4136_v52 = vpop.f32.mrf.mxu0  ;;  %6055 = vmatmul.mubr.bf16.vlgmr.msra.gmra.mxu0 %v1221_v31  ;;  %v1305_v31 = vcombine.high %v1303_v19, %v1303_v19 }
 0x123   : > { %v4137_v55 = vadd.f32 %v4136_v52, %v4097_v37  ;;  %6117 = vmatpush1.bf16.xpose.msra.mxu0 %v9203_v43  ;;  %6134 = vmatprep.mubr.bf16.mxu0 %v1277_v35  ;;  %v1312_v37 = vrot.slane %v1296_v59, %v9752_v5 }
 0x124   : > { %v4176_v53 = vpop.f32.mrf.mxu1  ;;  %6095 = vmatmul.mubr.bf16.vlgmr.msra.gmra.mxu1 %v1237_v40  ;;  %v4138_v56 = vpop.f32.mrf.mxu0  ;;  %6196 = vmatprep.subr.bf16.mxu0 %v9208_v49  ;;  %v1333_v41 = vrot.slane %v1305_v31, %v9752_v5  ;;  %v9215_v49 = vcombine.low %v306_v24, %v306_v24  ;;  %v313_v31 = vld [vmem:[%s9762_s20 + $0x288] sm:$0xff] }
 0x125   : > { %6157 = vmatpush1.bf16.xpose.msra.mxu1 %v9205_v44  ;;  %6174 = vmatprep.mubr.bf16.mxu1 %v1287_v47  ;;  %v4177_v60 = vadd.f32 %v4176_v53, %v4137_v55  ;;  %v1334_v46 = vcombine.high %v1312_v37, %v1312_v37  ;;  %v308_v47 = vld [vmem:[%s9762_s20 + $0x260] sm:$0xff]  ;;  %v1338_v55 = vcombine.high %v216_v34, %v216_v34 }
 0x126   : > { %v4178_v57 = vpop.f32.mrf.mxu1  ;;  %6236 = vmatprep.subr.bf16.mxu1 %v9210_v50  ;;  %v4139_v61 = vpop.f32.mrf.mxu0  ;;  %v9217_v50 = vcombine.low %v307_v25, %v307_v25  ;;  %v1337_v53 = vcombine.high %v1333_v41, %v1333_v41  ;;  %v9220_v56 = vcombine.high %v308_v47, %v308_v47  ;;  %v9219_v9 = vcombine.low %v308_v47, %v308_v47 }
 0x127   : > { %v9222_v57 = vcombine.high %v309_v48, %v309_v48  ;;  %v1352_v1 = vrot.slane %v1338_v55, %v9752_v5 }
 0x128   : > { %v4179_v62 = vpop.f32.mrf.mxu1  ;;  %v4140_v4 = vpop.f32.mrf.mxu0 }
 0x12a   : > { %v4180_v6 = vpop.f32.mrf.mxu1  ;;  %v4216_v12 = vpop.f32.mrf.mxu0  ;;  %6135 = vmatmul.mubr.bf16.vlgmr.msra.gmra.mxu0 %v1263_v54  ;;  %v1353_v54 = vcombine.high %v1345_v42, %v1345_v42 }
 0x12b   : > { %v4217_v15 = vadd.f32 %v4216_v12, %v4177_v60  ;;  %6197 = vmatpush1.bf16.xpose.msra.mxu0 %v9207_v2  ;;  %6214 = vmatprep.mubr.bf16.mxu0 %v1284_v58  ;;  %v1319_v60 = vrot.slane %v1303_v19, %v9752_v5 }
 0x12c   : > { %v4256_v13 = vpop.f32.mrf.mxu1  ;;  %6175 = vmatmul.mubr.bf16.vlgmr.msra.gmra.mxu1 %v1285_v63  ;;  %v4218_v16 = vpop.f32.mrf.mxu0  ;;  %6276 = vmatprep.subr.bf16.mxu0 %v9212_v10  ;;  %v1375_v0 = vrot.slane %v1353_v54, %v9752_v5  ;;  %v9221_v10 = vcombine.low %v309_v48, %v309_v48  ;;  %v315_v54 = vld [vmem:[%s9762_s20 + $0x298] sm:$0xff] }
 0x12d   : > { %6237 = vmatpush1.bf16.xpose.msra.mxu1 %v9209_v3  ;;  %6254 = vmatprep.mubr.bf16.mxu1 %v1288_v7  ;;  %v4257_v20 = vadd.f32 %v4256_v13, %v4217_v15  ;;  %v1335_v6 = vcombine.high %v1319_v60, %v1319_v60  ;;  %v310_v7 = vld [vmem:[%s9762_s20 + $0x270] sm:$0xff]  ;;  %v9226_v16 = vcombine.high %v311_v8, %v311_v8 }
 0x12e   : > { %v4258_v17 = vpop.f32.mrf.mxu1  ;;  %6316 = vmatprep.subr.bf16.mxu1 %v9214_v11  ;;  %v4219_v21 = vpop.f32.mrf.mxu0  ;;  %v1385_v13 = vcombine.high %v1375_v0, %v1375_v0  ;;  %v9224_v15 = vcombine.high %v310_v7, %v310_v7 }
 0x12f   : > { %v217_v17 = vld [vmem:[%s9757_s17 + $0xa0] sm:$0xff] }
 0x130   : > { %v4259_v22 = vpop.f32.mrf.mxu1  ;;  %v4220_v28 = vpop.f32.mrf.mxu0  ;;  %v1394_v25 = vrot.slane %v217_v17, %v9752_v5 }
 0x132   : > { %v4260_v29 = vpop.f32.mrf.mxu1  ;;  %v4296_v35 = vpop.f32.mrf.mxu0  ;;  %6215 = vmatmul.mubr.bf16.vlgmr.msra.gmra.mxu0 %v1270_v14  ;;  %v1354_v14 = vcombine.high %v1352_v1, %v1352_v1 }
 0x133   : > { %v4297_v38 = vadd.f32 %v4296_v35, %v4257_v20  ;;  %6277 = vmatpush1.bf16.xpose.msra.mxu0 %v9211_v26  ;;  %6294 = vmatprep.mubr.bf16.mxu0 %v1326_v18  ;;  %v1361_v20 = vrot.slane %v1345_v42, %v9752_v5 }
 0x134   : > { %v4336_v36 = vpop.f32.mrf.mxu1  ;;  %6255 = vmatmul.mubr.bf16.vlgmr.msra.gmra.mxu1 %v1286_v23  ;;  %v4298_v39 = vpop.f32.mrf.mxu0  ;;  %6356 = vmatprep.subr.bf16.mxu0 %v9216_v32  ;;  %v1382_v24 = vrot.slane %v1354_v14, %v9752_v5  ;;  %v9223_v32 = vcombine.low %v310_v7, %v310_v7  ;;  %v317_v14 = vld [vmem:[%s9762_s20 + $0x2a8] sm:$0xff] }
 0x135   : > { %6317 = vmatpush1.bf16.xpose.msra.mxu1 %v9213_v27  ;;  %6334 = vmatprep.mubr.bf16.mxu1 %v1336_v30  ;;  %v4337_v43 = vadd.f32 %v4336_v36, %v4297_v38  ;;  %v1383_v29 = vcombine.high %v1361_v20, %v1361_v20  ;;  %v312_v30 = vld [vmem:[%s9762_s20 + $0x280] sm:$0xff]  ;;  %v1387_v38 = vcombine.high %v217_v17, %v217_v17 }
 0x136   : > { %v4338_v40 = vpop.f32.mrf.mxu1  ;;  %6396 = vmatprep.subr.bf16.mxu1 %v9218_v33  ;;  %v4299_v44 = vpop.f32.mrf.mxu0  ;;  %v9225_v33 = vcombine.low %v311_v8, %v311_v8  ;;  %v1386_v36 = vcombine.high %v1382_v24, %v1382_v24  ;;  %v9228_v39 = vcombine.high %v312_v30, %v312_v30  ;;  %v9227_v55 = vcombine.low %v312_v30, %v312_v30 }
 0x137   : > { %v9230_v40 = vcombine.high %v313_v31, %v313_v31  ;;  %v1401_v48 = vrot.slane %v1387_v38, %v9752_v5 }
 0x138   : > { %v4339_v45 = vpop.f32.mrf.mxu1  ;;  %v4300_v51 = vpop.f32.mrf.mxu0 }
 0x13a   : > { %v4340_v52 = vpop.f32.mrf.mxu1  ;;  %v4376_v58 = vpop.f32.mrf.mxu0  ;;  %6295 = vmatmul.mubr.bf16.vlgmr.msra.gmra.mxu0 %v1312_v37  ;;  %v1402_v37 = vcombine.high %v1394_v25, %v1394_v25 }
 0x13b   : > { %v4377_v61 = vadd.f32 %v4376_v58, %v4337_v43  ;;  %6357 = vmatpush1.bf16.xpose.msra.mxu0 %v9215_v49  ;;  %6374 = vmatprep.mubr.bf16.mxu0 %v1333_v41  ;;  %v1368_v43 = vrot.slane %v1352_v1, %v9752_v5 }
 0x13c   : > { %v4416_v59 = vpop.f32.mrf.mxu1  ;;  %6335 = vmatmul.mubr.bf16.vlgmr.msra.gmra.mxu1 %v1334_v46  ;;  %v4378_v62 = vpop.f32.mrf.mxu0  ;;  %6436 = vmatprep.subr.bf16.mxu0 %v9220_v56  ;;  %v1424_v47 = vrot.slane %v1402_v37, %v9752_v5  ;;  %v9229_v56 = vcombine.low %v313_v31, %v313_v31  ;;  %v319_v37 = vld [vmem:[%s9762_s20 + $0x2b8] sm:$0xff] }
 0x13d   : > { %6397 = vmatpush1.bf16.xpose.msra.mxu1 %v9217_v50  ;;  %6414 = vmatprep.mubr.bf16.mxu1 %v1337_v53  ;;  %v4417_v2 = vadd.f32 %v4416_v59, %v4377_v61  ;;  %v1384_v52 = vcombine.high %v1368_v43, %v1368_v43  ;;  %v314_v53 = vld [vmem:[%s9762_s20 + $0x290] sm:$0xff]  ;;  %v9234_v62 = vcombine.high %v315_v54, %v315_v54 }
 0x13e   : > { %v4418_v63 = vpop.f32.mrf.mxu1  ;;  %6476 = vmatprep.subr.bf16.mxu1 %v9222_v57  ;;  %v4379_v3 = vpop.f32.mrf.mxu0  ;;  %v1434_v59 = vcombine.high %v1424_v47, %v1424_v47  ;;  %v9232_v61 = vcombine.high %v314_v53, %v314_v53 }
 0x13f   : > { %v218_v63 = vld [vmem:[%s9757_s17 + $0xa8] sm:$0xff] }
 0x140   : > { %v4419_v4 = vpop.f32.mrf.mxu1  ;;  %v4380_v11 = vpop.f32.mrf.mxu0  ;;  %v1443_v8 = vrot.slane %v218_v63, %v9752_v5 }
 0x142   : > { %v4420_v12 = vpop.f32.mrf.mxu1  ;;  %v4456_v18 = vpop.f32.mrf.mxu0  ;;  %6375 = vmatmul.mubr.bf16.vlgmr.msra.gmra.mxu0 %v1319_v60  ;;  %v1403_v60 = vcombine.high %v1401_v48, %v1401_v48 }
 0x143   : > { %v4457_v21 = vadd.f32 %v4456_v18, %v4417_v2  ;;  %6437 = vmatpush1.bf16.xpose.msra.mxu0 %v9219_v9  ;;  %6454 = vmatprep.mubr.bf16.mxu0 %v1375_v0  ;;  %v1410_v2 = vrot.slane %v1394_v25, %v9752_v5 }
 0x144   : > { %v4496_v19 = vpop.f32.mrf.mxu1  ;;  %6415 = vmatmul.mubr.bf16.vlgmr.msra.gmra.mxu1 %v1335_v6  ;;  %v4458_v22 = vpop.f32.mrf.mxu0  ;;  %6516 = vmatprep.subr.bf16.mxu0 %v9224_v15  ;;  %v1431_v7 = vrot.slane %v1403_v60, %v9752_v5  ;;  %v9231_v15 = vcombine.low %v314_v53, %v314_v53  ;;  %v321_v60 = vld [vmem:[%s9762_s20 + $0x2c8] sm:$0xff] }
 0x145   : > { %6477 = vmatpush1.bf16.xpose.msra.mxu1 %v9221_v10  ;;  %6494 = vmatprep.mubr.bf16.mxu1 %v1385_v13  ;;  %v4497_v26 = vadd.f32 %v4496_v19, %v4457_v21  ;;  %v1432_v12 = vcombine.high %v1410_v2, %v1410_v2  ;;  %v316_v13 = vld [vmem:[%s9762_s20 + $0x2a0] sm:$0xff]  ;;  %v1436_v21 = vcombine.high %v218_v63, %v218_v63 }
 0x146   : > { %v4498_v23 = vpop.f32.mrf.mxu1  ;;  %6556 = vmatprep.subr.bf16.mxu1 %v9226_v16  ;;  %v4459_v27 = vpop.f32.mrf.mxu0  ;;  %v9233_v16 = vcombine.low %v315_v54, %v315_v54  ;;  %v1435_v19 = vcombine.high %v1431_v7, %v1431_v7  ;;  %v9236_v22 = vcombine.high %v316_v13, %v316_v13  ;;  %v9235_v38 = vcombine.low %v316_v13, %v316_v13 }
 0x147   : > { %v9238_v23 = vcombine.high %v317_v14, %v317_v14  ;;  %v1450_v31 = vrot.slane %v1436_v21, %v9752_v5 }
 0x148   : > { %v4499_v28 = vpop.f32.mrf.mxu1  ;;  %v4460_v34 = vpop.f32.mrf.mxu0 }
 0x14a   : > { %v4500_v35 = vpop.f32.mrf.mxu1  ;;  %v4536_v41 = vpop.f32.mrf.mxu0  ;;  %6455 = vmatmul.mubr.bf16.vlgmr.msra.gmra.mxu0 %v1361_v20  ;;  %v1451_v20 = vcombine.high %v1443_v8, %v1443_v8 }
 0x14b   : > { %v4537_v44 = vadd.f32 %v4536_v41, %v4497_v26  ;;  %6517 = vmatpush1.bf16.xpose.msra.mxu0 %v9223_v32  ;;  %6534 = vmatprep.mubr.bf16.mxu0 %v1382_v24  ;;  %v1417_v26 = vrot.slane %v1401_v48, %v9752_v5 }
 0x14c   : > { %v4576_v42 = vpop.f32.mrf.mxu1  ;;  %6495 = vmatmul.mubr.bf16.vlgmr.msra.gmra.mxu1 %v1383_v29  ;;  %v4538_v45 = vpop.f32.mrf.mxu0  ;;  %6596 = vmatprep.subr.bf16.mxu0 %v9228_v39  ;;  %v1473_v30 = vrot.slane %v1451_v20, %v9752_v5  ;;  %v9237_v39 = vcombine.low %v317_v14, %v317_v14  ;;  %v323_v20 = vld [vmem:[%s9762_s20 + $0x2d8] sm:$0xff] }
 0x14d   : > { %6557 = vmatpush1.bf16.xpose.msra.mxu1 %v9225_v33  ;;  %6574 = vmatprep.mubr.bf16.mxu1 %v1386_v36  ;;  %v4577_v49 = vadd.f32 %v4576_v42, %v4537_v44  ;;  %v1433_v35 = vcombine.high %v1417_v26, %v1417_v26  ;;  %v318_v36 = vld [vmem:[%s9762_s20 + $0x2b0] sm:$0xff]  ;;  %v9242_v45 = vcombine.high %v319_v37, %v319_v37 }
 0x14e   : > { %v4578_v46 = vpop.f32.mrf.mxu1  ;;  %6636 = vmatprep.subr.bf16.mxu1 %v9230_v40  ;;  %v4539_v50 = vpop.f32.mrf.mxu0  ;;  %v1483_v42 = vcombine.high %v1473_v30, %v1473_v30  ;;  %v9240_v44 = vcombine.high %v318_v36, %v318_v36 }
 0x14f   : > { %v219_v46 = vld [vmem:[%s9757_s17 + $0xb0] sm:$0xff] }
 0x150   : > { %v4579_v51 = vpop.f32.mrf.mxu1  ;;  %v4540_v57 = vpop.f32.mrf.mxu0  ;;  %v1492_v54 = vrot.slane %v219_v46, %v9752_v5 }
 0x152   : > { %v4580_v58 = vpop.f32.mrf.mxu1  ;;  %v4616_v0 = vpop.f32.mrf.mxu0  ;;  %6535 = vmatmul.mubr.bf16.vlgmr.msra.gmra.mxu0 %v1368_v43  ;;  %v1452_v43 = vcombine.high %v1450_v31, %v1450_v31 }
 0x153   : > { %v4617_v3 = vadd.f32 %v4616_v0, %v4577_v49  ;;  %6597 = vmatpush1.bf16.xpose.msra.mxu0 %v9227_v55  ;;  %6614 = vmatprep.mubr.bf16.mxu0 %v1424_v47  ;;  %v1459_v49 = vrot.slane %v1443_v8, %v9752_v5 }
 0x154   : > { %v4656_v1 = vpop.f32.mrf.mxu1  ;;  %6575 = vmatmul.mubr.bf16.vlgmr.msra.gmra.mxu1 %v1384_v52  ;;  %v4618_v4 = vpop.f32.mrf.mxu0  ;;  %6676 = vmatprep.subr.bf16.mxu0 %v9232_v61  ;;  %v1480_v53 = vrot.slane %v1452_v43, %v9752_v5  ;;  %v9239_v61 = vcombine.low %v318_v36, %v318_v36  ;;  %v325_v43 = vld [vmem:[%s9762_s20 + $0x2e8] sm:$0xff] }
 0x155   : > { %6637 = vmatpush1.bf16.xpose.msra.mxu1 %v9229_v56  ;;  %6654 = vmatprep.mubr.bf16.mxu1 %v1434_v59  ;;  %v4657_v9 = vadd.f32 %v4656_v1, %v4617_v3  ;;  %v1481_v58 = vcombine.high %v1459_v49, %v1459_v49  ;;  %v320_v59 = vld [vmem:[%s9762_s20 + $0x2c0] sm:$0xff]  ;;  %v1485_v3 = vcombine.high %v219_v46, %v219_v46 }
 0x156   : > { %v4658_v6 = vpop.f32.mrf.mxu1  ;;  %6716 = vmatprep.subr.bf16.mxu1 %v9234_v62  ;;  %v4619_v10 = vpop.f32.mrf.mxu0  ;;  %v9241_v62 = vcombine.low %v319_v37, %v319_v37  ;;  %v1484_v1 = vcombine.high %v1480_v53, %v1480_v53  ;;  %v9244_v4 = vcombine.high %v320_v59, %v320_v59  ;;  %v9243_v21 = vcombine.low %v320_v59, %v320_v59 }
 0x157   : > { %v9246_v6 = vcombine.high %v321_v60, %v321_v60  ;;  %v1499_v14 = vrot.slane %v1485_v3, %v9752_v5 }
 0x158   : > { %v4659_v11 = vpop.f32.mrf.mxu1  ;;  %v4620_v17 = vpop.f32.mrf.mxu0 }
 0x15a   : > { %v4660_v18 = vpop.f32.mrf.mxu1  ;;  %v4696_v24 = vpop.f32.mrf.mxu0  ;;  %6615 = vmatmul.mubr.bf16.vlgmr.msra.gmra.mxu0 %v1410_v2  ;;  %v1500_v2 = vcombine.high %v1492_v54, %v1492_v54 }
 0x15b   : > { %v4697_v27 = vadd.f32 %v4696_v24, %v4657_v9  ;;  %6677 = vmatpush1.bf16.xpose.msra.mxu0 %v9231_v15  ;;  %6694 = vmatprep.mubr.bf16.mxu0 %v1431_v7  ;;  %v1466_v9 = vrot.slane %v1450_v31, %v9752_v5 }
 0x15c   : > { %v4736_v25 = vpop.f32.mrf.mxu1  ;;  %6655 = vmatmul.mubr.bf16.vlgmr.msra.gmra.mxu1 %v1432_v12  ;;  %v4698_v28 = vpop.f32.mrf.mxu0  ;;  %6756 = vmatprep.subr.bf16.mxu0 %v9236_v22  ;;  %v1522_v13 = vrot.slane %v1500_v2, %v9752_v5  ;;  %v9245_v22 = vcombine.low %v321_v60, %v321_v60  ;;  %v327_v2 = vld [vmem:[%s9762_s20 + $0x2f8] sm:$0xff] }
 0x15d   : > { %6717 = vmatpush1.bf16.xpose.msra.mxu1 %v9233_v16  ;;  %6734 = vmatprep.mubr.bf16.mxu1 %v1435_v19  ;;  %v4737_v32 = vadd.f32 %v4736_v25, %v4697_v27  ;;  %v1482_v18 = vcombine.high %v1466_v9, %v1466_v9  ;;  %v322_v19 = vld [vmem:[%s9762_s20 + $0x2d0] sm:$0xff]  ;;  %v9250_v28 = vcombine.high %v323_v20, %v323_v20 }
 0x15e   : > { %v4738_v29 = vpop.f32.mrf.mxu1  ;;  %6796 = vmatprep.subr.bf16.mxu1 %v9238_v23  ;;  %v4699_v33 = vpop.f32.mrf.mxu0  ;;  %v1532_v25 = vcombine.high %v1522_v13, %v1522_v13  ;;  %v9248_v27 = vcombine.high %v322_v19, %v322_v19 }
 0x15f   : > { %v220_v29 = vld [vmem:[%s9757_s17 + $0xb8] sm:$0xff] }
 0x160   : > { %v4739_v34 = vpop.f32.mrf.mxu1  ;;  %v4700_v40 = vpop.f32.mrf.mxu0  ;;  %v1541_v37 = vrot.slane %v220_v29, %v9752_v5 }
 0x162   : > { %v4740_v41 = vpop.f32.mrf.mxu1  ;;  %v4776_v47 = vpop.f32.mrf.mxu0  ;;  %6695 = vmatmul.mubr.bf16.vlgmr.msra.gmra.mxu0 %v1417_v26  ;;  %v1501_v26 = vcombine.high %v1499_v14, %v1499_v14 }
 0x163   : > { %v4777_v50 = vadd.f32 %v4776_v47, %v4737_v32  ;;  %6757 = vmatpush1.bf16.xpose.msra.mxu0 %v9235_v38  ;;  %6774 = vmatprep.mubr.bf16.mxu0 %v1473_v30  ;;  %v1508_v32 = vrot.slane %v1492_v54, %v9752_v5 }
 0x164   : > { %v4816_v48 = vpop.f32.mrf.mxu1  ;;  %6735 = vmatmul.mubr.bf16.vlgmr.msra.gmra.mxu1 %v1433_v35  ;;  %v4778_v51 = vpop.f32.mrf.mxu0  ;;  %6836 = vmatprep.subr.bf16.mxu0 %v9240_v44  ;;  %v1529_v36 = vrot.slane %v1501_v26, %v9752_v5  ;;  %v9247_v44 = vcombine.low %v322_v19, %v322_v19  ;;  %v329_v26 = vld [vmem:[%s9762_s20 + $0x308] sm:$0xff] }
 0x165   : > { %6797 = vmatpush1.bf16.xpose.msra.mxu1 %v9237_v39  ;;  %6814 = vmatprep.mubr.bf16.mxu1 %v1483_v42  ;;  %v4817_v55 = vadd.f32 %v4816_v48, %v4777_v50  ;;  %v1530_v41 = vcombine.high %v1508_v32, %v1508_v32  ;;  %v324_v42 = vld [vmem:[%s9762_s20 + $0x2e0] sm:$0xff]  ;;  %v1534_v50 = vcombine.high %v220_v29, %v220_v29 }
 0x166   : > { %v4818_v52 = vpop.f32.mrf.mxu1  ;;  %6876 = vmatprep.subr.bf16.mxu1 %v9242_v45  ;;  %v4779_v56 = vpop.f32.mrf.mxu0  ;;  %v9249_v45 = vcombine.low %v323_v20, %v323_v20  ;;  %v1533_v48 = vcombine.high %v1529_v36, %v1529_v36  ;;  %v9252_v51 = vcombine.high %v324_v42, %v324_v42  ;;  %v9251_v3 = vcombine.low %v324_v42, %v324_v42 }
 0x167   : > { %v9254_v52 = vcombine.high %v325_v43, %v325_v43  ;;  %v1548_v60 = vrot.slane %v1534_v50, %v9752_v5 }
 0x168   : > { %v4819_v57 = vpop.f32.mrf.mxu1  ;;  %v4780_v63 = vpop.f32.mrf.mxu0 }
 0x16a   : > { %v4820_v0 = vpop.f32.mrf.mxu1  ;;  %v4856_v7 = vpop.f32.mrf.mxu0  ;;  %6775 = vmatmul.mubr.bf16.vlgmr.msra.gmra.mxu0 %v1459_v49  ;;  %v1549_v49 = vcombine.high %v1541_v37, %v1541_v37 }
 0x16b   : > { %v4857_v10 = vadd.f32 %v4856_v7, %v4817_v55  ;;  %6837 = vmatpush1.bf16.xpose.msra.mxu0 %v9239_v61  ;;  %6854 = vmatprep.mubr.bf16.mxu0 %v1480_v53  ;;  %v1515_v55 = vrot.slane %v1499_v14, %v9752_v5 }
 0x16c   : > { %v4896_v8 = vpop.f32.mrf.mxu1  ;;  %6815 = vmatmul.mubr.bf16.vlgmr.msra.gmra.mxu1 %v1481_v58  ;;  %v4858_v11 = vpop.f32.mrf.mxu0  ;;  %6916 = vmatprep.subr.bf16.mxu0 %v9244_v4  ;;  %v1571_v59 = vrot.slane %v1549_v49, %v9752_v5  ;;  %v9253_v4 = vcombine.low %v325_v43, %v325_v43  ;;  %v331_v49 = vld [vmem:[%s9762_s20 + $0x318] sm:$0xff] }
 0x16d   : > { %6877 = vmatpush1.bf16.xpose.msra.mxu1 %v9241_v62  ;;  %6894 = vmatprep.mubr.bf16.mxu1 %v1484_v1  ;;  %v4897_v15 = vadd.f32 %v4896_v8, %v4857_v10  ;;  %v1531_v0 = vcombine.high %v1515_v55, %v1515_v55  ;;  %v326_v1 = vld [vmem:[%s9762_s20 + $0x2f0] sm:$0xff]  ;;  %v9258_v11 = vcombine.high %v327_v2, %v327_v2 }
 0x16e   : > { %v4898_v12 = vpop.f32.mrf.mxu1  ;;  %6956 = vmatprep.subr.bf16.mxu1 %v9246_v6  ;;  %v4859_v16 = vpop.f32.mrf.mxu0  ;;  %v1581_v8 = vcombine.high %v1571_v59, %v1571_v59  ;;  %v9256_v10 = vcombine.high %v326_v1, %v326_v1 }
 0x16f   : > { %v221_v12 = vld [vmem:[%s9757_s17 + $0xc0] sm:$0xff] }
 0x170   : > { %v4899_v17 = vpop.f32.mrf.mxu1  ;;  %v4860_v23 = vpop.f32.mrf.mxu0  ;;  %v1590_v20 = vrot.slane %v221_v12, %v9752_v5 }
 0x172   : > { %v4900_v24 = vpop.f32.mrf.mxu1  ;;  %v4936_v30 = vpop.f32.mrf.mxu0  ;;  %6855 = vmatmul.mubr.bf16.vlgmr.msra.gmra.mxu0 %v1466_v9  ;;  %v1550_v9 = vcombine.high %v1548_v60, %v1548_v60 }
 0x173   : > { %v4937_v33 = vadd.f32 %v4936_v30, %v4897_v15  ;;  %6917 = vmatpush1.bf16.xpose.msra.mxu0 %v9243_v21  ;;  %6934 = vmatprep.mubr.bf16.mxu0 %v1522_v13  ;;  %v1557_v15 = vrot.slane %v1541_v37, %v9752_v5 }
 0x174   : > { %v4976_v31 = vpop.f32.mrf.mxu1  ;;  %6895 = vmatmul.mubr.bf16.vlgmr.msra.gmra.mxu1 %v1482_v18  ;;  %v4938_v34 = vpop.f32.mrf.mxu0  ;;  %6996 = vmatprep.subr.bf16.mxu0 %v9248_v27  ;;  %v1578_v19 = vrot.slane %v1550_v9, %v9752_v5  ;;  %v9255_v27 = vcombine.low %v326_v1, %v326_v1  ;;  %v333_v9 = vld [vmem:[%s9762_s20 + $0x328] sm:$0xff] }
 0x175   : > { %6957 = vmatpush1.bf16.xpose.msra.mxu1 %v9245_v22  ;;  %6974 = vmatprep.mubr.bf16.mxu1 %v1532_v25  ;;  %v4977_v38 = vadd.f32 %v4976_v31, %v4937_v33  ;;  %v1579_v24 = vcombine.high %v1557_v15, %v1557_v15  ;;  %v328_v25 = vld [vmem:[%s9762_s20 + $0x300] sm:$0xff]  ;;  %v1583_v33 = vcombine.high %v221_v12, %v221_v12 }
 0x176   : > { %v4978_v35 = vpop.f32.mrf.mxu1  ;;  %7036 = vmatprep.subr.bf16.mxu1 %v9250_v28  ;;  %v4939_v39 = vpop.f32.mrf.mxu0  ;;  %v9257_v28 = vcombine.low %v327_v2, %v327_v2  ;;  %v1582_v31 = vcombine.high %v1578_v19, %v1578_v19  ;;  %v9260_v34 = vcombine.high %v328_v25, %v328_v25  ;;  %v9259_v50 = vcombine.low %v328_v25, %v328_v25 }
 0x177   : > { %v9262_v35 = vcombine.high %v329_v26, %v329_v26  ;;  %v1597_v43 = vrot.slane %v1583_v33, %v9752_v5 }
 0x178   : > { %v4979_v40 = vpop.f32.mrf.mxu1  ;;  %v4940_v46 = vpop.f32.mrf.mxu0 }
 0x17a   : > { %v4980_v47 = vpop.f32.mrf.mxu1  ;;  %v5016_v53 = vpop.f32.mrf.mxu0  ;;  %6935 = vmatmul.mubr.bf16.vlgmr.msra.gmra.mxu0 %v1508_v32  ;;  %v1598_v32 = vcombine.high %v1590_v20, %v1590_v20 }
 0x17b   : > { %v5017_v56 = vadd.f32 %v5016_v53, %v4977_v38  ;;  %6997 = vmatpush1.bf16.xpose.msra.mxu0 %v9247_v44  ;;  %7014 = vmatprep.mubr.bf16.mxu0 %v1529_v36  ;;  %v1564_v38 = vrot.slane %v1548_v60, %v9752_v5 }
 0x17c   : > { %v5056_v54 = vpop.f32.mrf.mxu1  ;;  %6975 = vmatmul.mubr.bf16.vlgmr.msra.gmra.mxu1 %v1530_v41  ;;  %v5018_v57 = vpop.f32.mrf.mxu0  ;;  %7076 = vmatprep.subr.bf16.mxu0 %v9252_v51  ;;  %v1620_v42 = vrot.slane %v1598_v32, %v9752_v5  ;;  %v9261_v51 = vcombine.low %v329_v26, %v329_v26  ;;  %v335_v32 = vld [vmem:[%s9762_s20 + $0x338] sm:$0xff] }
 0x17d   : > { %7037 = vmatpush1.bf16.xpose.msra.mxu1 %v9249_v45  ;;  %7054 = vmatprep.mubr.bf16.mxu1 %v1533_v48  ;;  %v5057_v61 = vadd.f32 %v5056_v54, %v5017_v56  ;;  %v1580_v47 = vcombine.high %v1564_v38, %v1564_v38  ;;  %v330_v48 = vld [vmem:[%s9762_s20 + $0x310] sm:$0xff]  ;;  %v9266_v57 = vcombine.high %v331_v49, %v331_v49 }
 0x17e   : > { %v5058_v58 = vpop.f32.mrf.mxu1  ;;  %7116 = vmatprep.subr.bf16.mxu1 %v9254_v52  ;;  %v5019_v62 = vpop.f32.mrf.mxu0  ;;  %v1630_v54 = vcombine.high %v1620_v42, %v1620_v42  ;;  %v9264_v56 = vcombine.high %v330_v48, %v330_v48 }
 0x17f   : > { %v222_v58 = vld [vmem:[%s9757_s17 + $0xc8] sm:$0xff] }
 0x180   : > { %v5059_v63 = vpop.f32.mrf.mxu1  ;;  %v5020_v6 = vpop.f32.mrf.mxu0  ;;  %v1639_v2 = vrot.slane %v222_v58, %v9752_v5 }
 0x182   : > { %v5060_v7 = vpop.f32.mrf.mxu1  ;;  %v5096_v13 = vpop.f32.mrf.mxu0  ;;  %7015 = vmatmul.mubr.bf16.vlgmr.msra.gmra.mxu0 %v1515_v55  ;;  %v1599_v55 = vcombine.high %v1597_v43, %v1597_v43 }
 0x183   : > { %v5097_v16 = vadd.f32 %v5096_v13, %v5057_v61  ;;  %7077 = vmatpush1.bf16.xpose.msra.mxu0 %v9251_v3  ;;  %7094 = vmatprep.mubr.bf16.mxu0 %v1571_v59  ;;  %v1606_v61 = vrot.slane %v1590_v20, %v9752_v5 }
 0x184   : > { %v5136_v14 = vpop.f32.mrf.mxu1  ;;  %7055 = vmatmul.mubr.bf16.vlgmr.msra.gmra.mxu1 %v1531_v0  ;;  %v5098_v17 = vpop.f32.mrf.mxu0  ;;  %7156 = vmatprep.subr.bf16.mxu0 %v9256_v10  ;;  %v1627_v1 = vrot.slane %v1599_v55, %v9752_v5  ;;  %v9263_v10 = vcombine.low %v330_v48, %v330_v48  ;;  %v337_v55 = vld [vmem:[%s9762_s20 + $0x348] sm:$0xff] }
 0x185   : > { %7117 = vmatpush1.bf16.xpose.msra.mxu1 %v9253_v4  ;;  %7134 = vmatprep.mubr.bf16.mxu1 %v1581_v8  ;;  %v5137_v21 = vadd.f32 %v5136_v14, %v5097_v16  ;;  %v1628_v7 = vcombine.high %v1606_v61, %v1606_v61  ;;  %v332_v8 = vld [vmem:[%s9762_s20 + $0x320] sm:$0xff]  ;;  %v1632_v16 = vcombine.high %v222_v58, %v222_v58 }
 0x186   : > { %v5138_v18 = vpop.f32.mrf.mxu1  ;;  %7196 = vmatprep.subr.bf16.mxu1 %v9258_v11  ;;  %v5099_v22 = vpop.f32.mrf.mxu0  ;;  %v9265_v11 = vcombine.low %v331_v49, %v331_v49  ;;  %v1631_v14 = vcombine.high %v1627_v1, %v1627_v1  ;;  %v9268_v17 = vcombine.high %v332_v8, %v332_v8  ;;  %v9267_v33 = vcombine.low %v332_v8, %v332_v8 }
 0x187   : > { %v9270_v18 = vcombine.high %v333_v9, %v333_v9  ;;  %v1646_v26 = vrot.slane %v1632_v16, %v9752_v5 }
 0x188   : > { %v5139_v23 = vpop.f32.mrf.mxu1  ;;  %v5100_v29 = vpop.f32.mrf.mxu0 }
 0x18a   : > { %v5140_v30 = vpop.f32.mrf.mxu1  ;;  %v5176_v36 = vpop.f32.mrf.mxu0  ;;  %7095 = vmatmul.mubr.bf16.vlgmr.msra.gmra.mxu0 %v1557_v15  ;;  %v1647_v15 = vcombine.high %v1639_v2, %v1639_v2 }
 0x18b   : > { %v5177_v39 = vadd.f32 %v5176_v36, %v5137_v21  ;;  %7157 = vmatpush1.bf16.xpose.msra.mxu0 %v9255_v27  ;;  %7174 = vmatprep.mubr.bf16.mxu0 %v1578_v19  ;;  %v1613_v21 = vrot.slane %v1597_v43, %v9752_v5 }
 0x18c   : > { %v5216_v37 = vpop.f32.mrf.mxu1  ;;  %7135 = vmatmul.mubr.bf16.vlgmr.msra.gmra.mxu1 %v1579_v24  ;;  %v5178_v40 = vpop.f32.mrf.mxu0  ;;  %7236 = vmatprep.subr.bf16.mxu0 %v9260_v34  ;;  %v1669_v25 = vrot.slane %v1647_v15, %v9752_v5  ;;  %v9269_v34 = vcombine.low %v333_v9, %v333_v9  ;;  %v339_v15 = vld [vmem:[%s9762_s20 + $0x358] sm:$0xff] }
 0x18d   : > { %7197 = vmatpush1.bf16.xpose.msra.mxu1 %v9257_v28  ;;  %7214 = vmatprep.mubr.bf16.mxu1 %v1582_v31  ;;  %v5217_v44 = vadd.f32 %v5216_v37, %v5177_v39  ;;  %v1629_v30 = vcombine.high %v1613_v21, %v1613_v21  ;;  %v334_v31 = vld [vmem:[%s9762_s20 + $0x330] sm:$0xff]  ;;  %v9274_v40 = vcombine.high %v335_v32, %v335_v32 }
 0x18e   : > { %v5218_v41 = vpop.f32.mrf.mxu1  ;;  %7276 = vmatprep.subr.bf16.mxu1 %v9262_v35  ;;  %v5179_v45 = vpop.f32.mrf.mxu0  ;;  %v1679_v37 = vcombine.high %v1669_v25, %v1669_v25  ;;  %v9272_v39 = vcombine.high %v334_v31, %v334_v31 }
 0x18f   : > { %v223_v41 = vld [vmem:[%s9757_s17 + $0xd0] sm:$0xff] }
 0x190   : > { %v5219_v46 = vpop.f32.mrf.mxu1  ;;  %v5180_v52 = vpop.f32.mrf.mxu0  ;;  %v1688_v49 = vrot.slane %v223_v41, %v9752_v5 }
 0x192   : > { %v5220_v53 = vpop.f32.mrf.mxu1  ;;  %v5256_v59 = vpop.f32.mrf.mxu0  ;;  %7175 = vmatmul.mubr.bf16.vlgmr.msra.gmra.mxu0 %v1564_v38  ;;  %v1648_v38 = vcombine.high %v1646_v26, %v1646_v26 }
 0x193   : > { %v5257_v62 = vadd.f32 %v5256_v59, %v5217_v44  ;;  %7237 = vmatpush1.bf16.xpose.msra.mxu0 %v9259_v50  ;;  %7254 = vmatprep.mubr.bf16.mxu0 %v1620_v42  ;;  %v1655_v44 = vrot.slane %v1639_v2, %v9752_v5 }
 0x194   : > { %v5296_v60 = vpop.f32.mrf.mxu1  ;;  %7215 = vmatmul.mubr.bf16.vlgmr.msra.gmra.mxu1 %v1580_v47  ;;  %v5258_v63 = vpop.f32.mrf.mxu0  ;;  %7316 = vmatprep.subr.bf16.mxu0 %v9264_v56  ;;  %v1676_v48 = vrot.slane %v1648_v38, %v9752_v5  ;;  %v9271_v56 = vcombine.low %v334_v31, %v334_v31  ;;  %v341_v38 = vld [vmem:[%s9762_s20 + $0x368] sm:$0xff] }
 0x195   : > { %7277 = vmatpush1.bf16.xpose.msra.mxu1 %v9261_v51  ;;  %7294 = vmatprep.mubr.bf16.mxu1 %v1630_v54  ;;  %v5297_v3 = vadd.f32 %v5296_v60, %v5257_v62  ;;  %v1677_v53 = vcombine.high %v1655_v44, %v1655_v44  ;;  %v336_v54 = vld [vmem:[%s9762_s20 + $0x340] sm:$0xff]  ;;  %v1681_v62 = vcombine.high %v223_v41, %v223_v41 }
 0x196   : > { %v5298_v0 = vpop.f32.mrf.mxu1  ;;  %7356 = vmatprep.subr.bf16.mxu1 %v9266_v57  ;;  %v5259_v4 = vpop.f32.mrf.mxu0  ;;  %v9273_v57 = vcombine.low %v335_v32, %v335_v32  ;;  %v1680_v60 = vcombine.high %v1676_v48, %v1676_v48  ;;  %v9276_v63 = vcombine.high %v336_v54, %v336_v54  ;;  %v9275_v16 = vcombine.low %v336_v54, %v336_v54 }
 0x197   : > { %v9278_v0 = vcombine.high %v337_v55, %v337_v55  ;;  %v1695_v9 = vrot.slane %v1681_v62, %v9752_v5 }
 0x198   : > { %v5299_v6 = vpop.f32.mrf.mxu1  ;;  %v5260_v12 = vpop.f32.mrf.mxu0 }
 0x19a   : > { %v5300_v13 = vpop.f32.mrf.mxu1  ;;  %v5336_v19 = vpop.f32.mrf.mxu0  ;;  %7255 = vmatmul.mubr.bf16.vlgmr.msra.gmra.mxu0 %v1606_v61  ;;  %v1696_v61 = vcombine.high %v1688_v49, %v1688_v49 }
 0x19b   : > { %v5337_v22 = vadd.f32 %v5336_v19, %v5297_v3  ;;  %7317 = vmatpush1.bf16.xpose.msra.mxu0 %v9263_v10  ;;  %7334 = vmatprep.mubr.bf16.mxu0 %v1627_v1  ;;  %v1662_v3 = vrot.slane %v1646_v26, %v9752_v5 }
 0x19c   : > { %v5376_v20 = vpop.f32.mrf.mxu1  ;;  %7295 = vmatmul.mubr.bf16.vlgmr.msra.gmra.mxu1 %v1628_v7  ;;  %v5338_v23 = vpop.f32.mrf.mxu0  ;;  %7396 = vmatprep.subr.bf16.mxu0 %v9268_v17  ;;  %v1718_v8 = vrot.slane %v1696_v61, %v9752_v5  ;;  %v9277_v17 = vcombine.low %v337_v55, %v337_v55  ;;  %v343_v61 = vld [vmem:[%s9762_s20 + $0x378] sm:$0xff] }
 0x19d   : > { %7357 = vmatpush1.bf16.xpose.msra.mxu1 %v9265_v11  ;;  %7374 = vmatprep.mubr.bf16.mxu1 %v1631_v14  ;;  %v5377_v27 = vadd.f32 %v5376_v20, %v5337_v22  ;;  %v1678_v13 = vcombine.high %v1662_v3, %v1662_v3  ;;  %v338_v14 = vld [vmem:[%s9762_s20 + $0x350] sm:$0xff]  ;;  %v9282_v23 = vcombine.high %v339_v15, %v339_v15 }
 0x19e   : > { %v5378_v24 = vpop.f32.mrf.mxu1  ;;  %7436 = vmatprep.subr.bf16.mxu1 %v9270_v18  ;;  %v5339_v28 = vpop.f32.mrf.mxu0  ;;  %v1728_v20 = vcombine.high %v1718_v8, %v1718_v8  ;;  %v9280_v22 = vcombine.high %v338_v14, %v338_v14 }
 0x19f   : > { %v224_v24 = vld [vmem:[%s9757_s17 + $0xd8] sm:$0xff] }
 0x1a0   : > { %v5379_v29 = vpop.f32.mrf.mxu1  ;;  %v5340_v35 = vpop.f32.mrf.mxu0  ;;  %v1737_v32 = vrot.slane %v224_v24, %v9752_v5 }
 0x1a2   : > { %v5380_v36 = vpop.f32.mrf.mxu1  ;;  %v5416_v42 = vpop.f32.mrf.mxu0  ;;  %7335 = vmatmul.mubr.bf16.vlgmr.msra.gmra.mxu0 %v1613_v21  ;;  %v1697_v21 = vcombine.high %v1695_v9, %v1695_v9 }
 0x1a3   : > { %v5417_v45 = vadd.f32 %v5416_v42, %v5377_v27  ;;  %7397 = vmatpush1.bf16.xpose.msra.mxu0 %v9267_v33  ;;  %7414 = vmatprep.mubr.bf16.mxu0 %v1669_v25  ;;  %v1704_v27 = vrot.slane %v1688_v49, %v9752_v5 }
 0x1a4   : > { %v5456_v43 = vpop.f32.mrf.mxu1  ;;  %7375 = vmatmul.mubr.bf16.vlgmr.msra.gmra.mxu1 %v1629_v30  ;;  %v5418_v46 = vpop.f32.mrf.mxu0  ;;  %7476 = vmatprep.subr.bf16.mxu0 %v9272_v39  ;;  %v1725_v31 = vrot.slane %v1697_v21, %v9752_v5  ;;  %v9279_v39 = vcombine.low %v338_v14, %v338_v14  ;;  %v345_v21 = vld [vmem:[%s9762_s20 + $0x388] sm:$0xff] }
 0x1a5   : > { %7437 = vmatpush1.bf16.xpose.msra.mxu1 %v9269_v34  ;;  %7454 = vmatprep.mubr.bf16.mxu1 %v1679_v37  ;;  %v5457_v50 = vadd.f32 %v5456_v43, %v5417_v45  ;;  %v1726_v36 = vcombine.high %v1704_v27, %v1704_v27  ;;  %v340_v37 = vld [vmem:[%s9762_s20 + $0x360] sm:$0xff]  ;;  %v1730_v45 = vcombine.high %v224_v24, %v224_v24 }
 0x1a6   : > { %v5458_v47 = vpop.f32.mrf.mxu1  ;;  %7516 = vmatprep.subr.bf16.mxu1 %v9274_v40  ;;  %v5419_v51 = vpop.f32.mrf.mxu0  ;;  %v9281_v40 = vcombine.low %v339_v15, %v339_v15  ;;  %v1729_v43 = vcombine.high %v1725_v31, %v1725_v31  ;;  %v9284_v46 = vcombine.high %v340_v37, %v340_v37  ;;  %v9283_v62 = vcombine.low %v340_v37, %v340_v37 }
 0x1a7   : > { %v9286_v47 = vcombine.high %v341_v38, %v341_v38  ;;  %v1744_v55 = vrot.slane %v1730_v45, %v9752_v5 }
 0x1a8   : > { %v5459_v52 = vpop.f32.mrf.mxu1  ;;  %v5420_v58 = vpop.f32.mrf.mxu0 }
 0x1aa   : > { %v5460_v59 = vpop.f32.mrf.mxu1  ;;  %v5496_v1 = vpop.f32.mrf.mxu0  ;;  %7415 = vmatmul.mubr.bf16.vlgmr.msra.gmra.mxu0 %v1655_v44  ;;  %v1745_v44 = vcombine.high %v1737_v32, %v1737_v32 }
 0x1ab   : > { %v5497_v4 = vadd.f32 %v5496_v1, %v5457_v50  ;;  %7477 = vmatpush1.bf16.xpose.msra.mxu0 %v9271_v56  ;;  %7494 = vmatprep.mubr.bf16.mxu0 %v1676_v48  ;;  %v1711_v50 = vrot.slane %v1695_v9, %v9752_v5 }
 0x1ac   : > { %v5536_v2 = vpop.f32.mrf.mxu1  ;;  %7455 = vmatmul.mubr.bf16.vlgmr.msra.gmra.mxu1 %v1677_v53  ;;  %v5498_v6 = vpop.f32.mrf.mxu0  ;;  %7556 = vmatprep.subr.bf16.mxu0 %v9276_v63  ;;  %v1767_v54 = vrot.slane %v1745_v44, %v9752_v5  ;;  %v9285_v63 = vcombine.low %v341_v38, %v341_v38  ;;  %v347_v44 = vld [vmem:[%s9762_s20 + $0x398] sm:$0xff] }
 0x1ad   : > { %7517 = vmatpush1.bf16.xpose.msra.mxu1 %v9273_v57  ;;  %7534 = vmatprep.mubr.bf16.mxu1 %v1680_v60  ;;  %v5537_v10 = vadd.f32 %v5536_v2, %v5497_v4  ;;  %v1727_v59 = vcombine.high %v1711_v50, %v1711_v50  ;;  %v342_v60 = vld [vmem:[%s9762_s20 + $0x370] sm:$0xff]  ;;  %v9290_v6 = vcombine.high %v343_v61, %v343_v61 }
 0x1ae   : > { %v5538_v7 = vpop.f32.mrf.mxu1  ;;  %7596 = vmatprep.subr.bf16.mxu1 %v9278_v0  ;;  %v5499_v11 = vpop.f32.mrf.mxu0  ;;  %v1777_v2 = vcombine.high %v1767_v54, %v1767_v54  ;;  %v9288_v4 = vcombine.high %v342_v60, %v342_v60 }
 0x1af   : > { %v225_v7 = vld [vmem:[%s9757_s17 + $0xe0] sm:$0xff] }
 0x1b0   : > { %v5539_v12 = vpop.f32.mrf.mxu1  ;;  %v5500_v18 = vpop.f32.mrf.mxu0  ;;  %v1786_v15 = vrot.slane %v225_v7, %v9752_v5 }
 0x1b2   : > { %v5540_v19 = vpop.f32.mrf.mxu1  ;;  %v5576_v25 = vpop.f32.mrf.mxu0  ;;  %7495 = vmatmul.mubr.bf16.vlgmr.msra.gmra.mxu0 %v1662_v3  ;;  %v1746_v3 = vcombine.high %v1744_v55, %v1744_v55 }
 0x1b3   : > { %v5577_v28 = vadd.f32 %v5576_v25, %v5537_v10  ;;  %7557 = vmatpush1.bf16.xpose.msra.mxu0 %v9275_v16  ;;  %7574 = vmatprep.mubr.bf16.mxu0 %v1718_v8  ;;  %v1753_v10 = vrot.slane %v1737_v32, %v9752_v5 }
 0x1b4   : > { %v5616_v26 = vpop.f32.mrf.mxu1  ;;  %7535 = vmatmul.mubr.bf16.vlgmr.msra.gmra.mxu1 %v1678_v13  ;;  %v5578_v29 = vpop.f32.mrf.mxu0  ;;  %7636 = vmatprep.subr.bf16.mxu0 %v9280_v22  ;;  %v1774_v14 = vrot.slane %v1746_v3, %v9752_v5  ;;  %v9287_v22 = vcombine.low %v342_v60, %v342_v60  ;;  %v349_v3 = vld [vmem:[%s9762_s20 + $0x3a8] sm:$0xff] }
 0x1b5   : > { %7597 = vmatpush1.bf16.xpose.msra.mxu1 %v9277_v17  ;;  %7614 = vmatprep.mubr.bf16.mxu1 %v1728_v20  ;;  %v5617_v33 = vadd.f32 %v5616_v26, %v5577_v28  ;;  %v1775_v19 = vcombine.high %v1753_v10, %v1753_v10  ;;  %v344_v20 = vld [vmem:[%s9762_s20 + $0x380] sm:$0xff]  ;;  %v1779_v28 = vcombine.high %v225_v7, %v225_v7 }
 0x1b6   : > { %v5618_v30 = vpop.f32.mrf.mxu1  ;;  %7676 = vmatprep.subr.bf16.mxu1 %v9282_v23  ;;  %v5579_v34 = vpop.f32.mrf.mxu0  ;;  %v9289_v23 = vcombine.low %v343_v61, %v343_v61  ;;  %v1778_v26 = vcombine.high %v1774_v14, %v1774_v14  ;;  %v9292_v29 = vcombine.high %v344_v20, %v344_v20  ;;  %v9291_v45 = vcombine.low %v344_v20, %v344_v20 }
 0x1b7   : > { %v9294_v30 = vcombine.high %v345_v21, %v345_v21  ;;  %v1793_v38 = vrot.slane %v1779_v28, %v9752_v5 }
 0x1b8   : > { %v5619_v35 = vpop.f32.mrf.mxu1  ;;  %v5580_v41 = vpop.f32.mrf.mxu0 }
 0x1ba   : > { %v5620_v42 = vpop.f32.mrf.mxu1  ;;  %v5656_v48 = vpop.f32.mrf.mxu0  ;;  %7575 = vmatmul.mubr.bf16.vlgmr.msra.gmra.mxu0 %v1704_v27  ;;  %v1794_v27 = vcombine.high %v1786_v15, %v1786_v15 }
 0x1bb   : > { %v5657_v51 = vadd.f32 %v5656_v48, %v5617_v33  ;;  %7637 = vmatpush1.bf16.xpose.msra.mxu0 %v9279_v39  ;;  %7654 = vmatprep.mubr.bf16.mxu0 %v1725_v31  ;;  %v1760_v33 = vrot.slane %v1744_v55, %v9752_v5 }
 0x1bc   : > { %v5696_v49 = vpop.f32.mrf.mxu1  ;;  %7615 = vmatmul.mubr.bf16.vlgmr.msra.gmra.mxu1 %v1726_v36  ;;  %v5658_v52 = vpop.f32.mrf.mxu0  ;;  %7716 = vmatprep.subr.bf16.mxu0 %v9284_v46  ;;  %v1816_v37 = vrot.slane %v1794_v27, %v9752_v5  ;;  %v9293_v46 = vcombine.low %v345_v21, %v345_v21  ;;  %v351_v27 = vld [vmem:[%s9762_s20 + $0x3b8] sm:$0xff] }
 0x1bd   : > { %7677 = vmatpush1.bf16.xpose.msra.mxu1 %v9281_v40  ;;  %7694 = vmatprep.mubr.bf16.mxu1 %v1729_v43  ;;  %v5697_v56 = vadd.f32 %v5696_v49, %v5657_v51  ;;  %v1776_v42 = vcombine.high %v1760_v33, %v1760_v33  ;;  %v346_v43 = vld [vmem:[%s9762_s20 + $0x390] sm:$0xff]  ;;  %v9298_v52 = vcombine.high %v347_v44, %v347_v44 }
 0x1be   : > { %v5698_v53 = vpop.f32.mrf.mxu1  ;;  %7756 = vmatprep.subr.bf16.mxu1 %v9286_v47  ;;  %v5659_v57 = vpop.f32.mrf.mxu0  ;;  %v1826_v49 = vcombine.high %v1816_v37, %v1816_v37  ;;  %v9296_v51 = vcombine.high %v346_v43, %v346_v43 }
 0x1bf   : > { %v226_v53 = vld [vmem:[%s9757_s17 + $0xe8] sm:$0xff] }
 0x1c0   : > { %v5699_v58 = vpop.f32.mrf.mxu1  ;;  %v5660_v0 = vpop.f32.mrf.mxu0  ;;  %v1835_v61 = vrot.slane %v226_v53, %v9752_v5 }
 0x1c2   : > { %v5700_v1 = vpop.f32.mrf.mxu1  ;;  %v5736_v8 = vpop.f32.mrf.mxu0  ;;  %7655 = vmatmul.mubr.bf16.vlgmr.msra.gmra.mxu0 %v1711_v50  ;;  %v1795_v50 = vcombine.high %v1793_v38, %v1793_v38 }
 0x1c3   : > { %v5737_v11 = vadd.f32 %v5736_v8, %v5697_v56  ;;  %7717 = vmatpush1.bf16.xpose.msra.mxu0 %v9283_v62  ;;  %7734 = vmatprep.mubr.bf16.mxu0 %v1767_v54  ;;  %v1802_v56 = vrot.slane %v1786_v15, %v9752_v5 }
 0x1c4   : > { %v5776_v9 = vpop.f32.mrf.mxu1  ;;  %7695 = vmatmul.mubr.bf16.vlgmr.msra.gmra.mxu1 %v1727_v59  ;;  %v5738_v12 = vpop.f32.mrf.mxu0  ;;  %7796 = vmatprep.subr.bf16.mxu0 %v9288_v4  ;;  %v1823_v60 = vrot.slane %v1795_v50, %v9752_v5  ;;  %v9295_v4 = vcombine.low %v346_v43, %v346_v43  ;;  %v353_v50 = vld [vmem:[%s9762_s20 + $0x3c8] sm:$0xff] }
 0x1c5   : > { %7757 = vmatpush1.bf16.xpose.msra.mxu1 %v9285_v63  ;;  %7774 = vmatprep.mubr.bf16.mxu1 %v1777_v2  ;;  %v5777_v16 = vadd.f32 %v5776_v9, %v5737_v11  ;;  %v1824_v1 = vcombine.high %v1802_v56, %v1802_v56  ;;  %v348_v2 = vld [vmem:[%s9762_s20 + $0x3a0] sm:$0xff]  ;;  %v1828_v11 = vcombine.high %v226_v53, %v226_v53 }
 0x1c6   : > { %v5778_v13 = vpop.f32.mrf.mxu1  ;;  %7836 = vmatprep.subr.bf16.mxu1 %v9290_v6  ;;  %v5739_v17 = vpop.f32.mrf.mxu0  ;;  %v9297_v6 = vcombine.low %v347_v44, %v347_v44  ;;  %v1827_v9 = vcombine.high %v1823_v60, %v1823_v60  ;;  %v9300_v12 = vcombine.high %v348_v2, %v348_v2  ;;  %v9299_v28 = vcombine.low %v348_v2, %v348_v2 }
 0x1c7   : > { %v9302_v13 = vcombine.high %v349_v3, %v349_v3  ;;  %v1842_v21 = vrot.slane %v1828_v11, %v9752_v5 }
 0x1c8   : > { %v5779_v18 = vpop.f32.mrf.mxu1  ;;  %v5740_v24 = vpop.f32.mrf.mxu0 }
 0x1ca   : > { %v5780_v25 = vpop.f32.mrf.mxu1  ;;  %v5816_v31 = vpop.f32.mrf.mxu0  ;;  %7735 = vmatmul.mubr.bf16.vlgmr.msra.gmra.mxu0 %v1753_v10  ;;  %v1843_v10 = vcombine.high %v1835_v61, %v1835_v61 }
 0x1cb   : > { %v5817_v34 = vadd.f32 %v5816_v31, %v5777_v16  ;;  %7797 = vmatpush1.bf16.xpose.msra.mxu0 %v9287_v22  ;;  %7814 = vmatprep.mubr.bf16.mxu0 %v1774_v14  ;;  %v1809_v16 = vrot.slane %v1793_v38, %v9752_v5 }
 0x1cc   : > { %v5856_v32 = vpop.f32.mrf.mxu1  ;;  %7775 = vmatmul.mubr.bf16.vlgmr.msra.gmra.mxu1 %v1775_v19  ;;  %v5818_v35 = vpop.f32.mrf.mxu0  ;;  %7876 = vmatprep.subr.bf16.mxu0 %v9292_v29  ;;  %v1865_v20 = vrot.slane %v1843_v10, %v9752_v5  ;;  %v9301_v29 = vcombine.low %v349_v3, %v349_v3  ;;  %v355_v10 = vld [vmem:[%s9762_s20 + $0x3d8] sm:$0xff] }
 0x1cd   : > { %7837 = vmatpush1.bf16.xpose.msra.mxu1 %v9289_v23  ;;  %7854 = vmatprep.mubr.bf16.mxu1 %v1778_v26  ;;  %v5857_v39 = vadd.f32 %v5856_v32, %v5817_v34  ;;  %v1825_v25 = vcombine.high %v1809_v16, %v1809_v16  ;;  %v350_v26 = vld [vmem:[%s9762_s20 + $0x3b0] sm:$0xff]  ;;  %v9306_v35 = vcombine.high %v351_v27, %v351_v27 }
 0x1ce   : > { %v5858_v36 = vpop.f32.mrf.mxu1  ;;  %7916 = vmatprep.subr.bf16.mxu1 %v9294_v30  ;;  %v5819_v40 = vpop.f32.mrf.mxu0  ;;  %v1875_v32 = vcombine.high %v1865_v20, %v1865_v20  ;;  %v9304_v34 = vcombine.high %v350_v26, %v350_v26 }
 0x1cf   : > { %v227_v36 = vld [vmem:[%s9757_s17 + $0xf0] sm:$0xff] }
 0x1d0   : > { %v5859_v41 = vpop.f32.mrf.mxu1  ;;  %v5820_v47 = vpop.f32.mrf.mxu0  ;;  %v1884_v44 = vrot.slane %v227_v36, %v9752_v5 }
 0x1d2   : > { %v5860_v48 = vpop.f32.mrf.mxu1  ;;  %v5896_v54 = vpop.f32.mrf.mxu0  ;;  %7815 = vmatmul.mubr.bf16.vlgmr.msra.gmra.mxu0 %v1760_v33  ;;  %v1844_v33 = vcombine.high %v1842_v21, %v1842_v21 }
 0x1d3   : > { %v5897_v57 = vadd.f32 %v5896_v54, %v5857_v39  ;;  %7877 = vmatpush1.bf16.xpose.msra.mxu0 %v9291_v45  ;;  %7894 = vmatprep.mubr.bf16.mxu0 %v1816_v37  ;;  %v1851_v39 = vrot.slane %v1835_v61, %v9752_v5 }
 0x1d4   : > { %v5936_v55 = vpop.f32.mrf.mxu1  ;;  %7855 = vmatmul.mubr.bf16.vlgmr.msra.gmra.mxu1 %v1776_v42  ;;  %v5898_v58 = vpop.f32.mrf.mxu0  ;;  %7956 = vmatprep.subr.bf16.mxu0 %v9296_v51  ;;  %v1872_v43 = vrot.slane %v1844_v33, %v9752_v5  ;;  %v9303_v51 = vcombine.low %v350_v26, %v350_v26  ;;  %v357_v33 = vld [vmem:[%s9762_s20 + $0x3e8] sm:$0xff] }
 0x1d5   : > { %7917 = vmatpush1.bf16.xpose.msra.mxu1 %v9293_v46  ;;  %7934 = vmatprep.mubr.bf16.mxu1 %v1826_v49  ;;  %v5937_v62 = vadd.f32 %v5936_v55, %v5897_v57  ;;  %v1873_v48 = vcombine.high %v1851_v39, %v1851_v39  ;;  %v352_v49 = vld [vmem:[%s9762_s20 + $0x3c0] sm:$0xff]  ;;  %v1877_v57 = vcombine.high %v227_v36, %v227_v36 }
 0x1d6   : > { %v5938_v59 = vpop.f32.mrf.mxu1  ;;  %7996 = vmatprep.subr.bf16.mxu1 %v9298_v52  ;;  %v5899_v63 = vpop.f32.mrf.mxu0  ;;  %v9305_v52 = vcombine.low %v351_v27, %v351_v27  ;;  %v1876_v55 = vcombine.high %v1872_v43, %v1872_v43  ;;  %v9308_v58 = vcombine.high %v352_v49, %v352_v49  ;;  %v9307_v11 = vcombine.low %v352_v49, %v352_v49 }
 0x1d7   : > { %v9310_v59 = vcombine.high %v353_v50, %v353_v50  ;;  %v1891_v3 = vrot.slane %v1877_v57, %v9752_v5 }
 0x1d8   : > { %v5939_v0 = vpop.f32.mrf.mxu1  ;;  %v5900_v7 = vpop.f32.mrf.mxu0 }
 0x1da   : > { %v5940_v8 = vpop.f32.mrf.mxu1  ;;  %v5976_v14 = vpop.f32.mrf.mxu0  ;;  %7895 = vmatmul.mubr.bf16.vlgmr.msra.gmra.mxu0 %v1802_v56  ;;  %v1892_v56 = vcombine.high %v1884_v44, %v1884_v44 }
 0x1db   : > { %v5977_v17 = vadd.f32 %v5976_v14, %v5937_v62  ;;  %7957 = vmatpush1.bf16.xpose.msra.mxu0 %v9295_v4  ;;  %7974 = vmatprep.mubr.bf16.mxu0 %v1823_v60  ;;  %v1858_v62 = vrot.slane %v1842_v21, %v9752_v5 }
 0x1dc   : > { %v6016_v15 = vpop.f32.mrf.mxu1  ;;  %7935 = vmatmul.mubr.bf16.vlgmr.msra.gmra.mxu1 %v1824_v1  ;;  %v5978_v18 = vpop.f32.mrf.mxu0  ;;  %8036 = vmatprep.subr.bf16.mxu0 %v9300_v12  ;;  %v1914_v2 = vrot.slane %v1892_v56, %v9752_v5  ;;  %v9309_v12 = vcombine.low %v353_v50, %v353_v50  ;;  %v359_v56 = vld [vmem:[%s9762_s20 + $0x3f8] sm:$0xff] }
 0x1dd   : > { %7997 = vmatpush1.bf16.xpose.msra.mxu1 %v9297_v6  ;;  %8014 = vmatprep.mubr.bf16.mxu1 %v1827_v9  ;;  %v6017_v22 = vadd.f32 %v6016_v15, %v5977_v17  ;;  %v1874_v8 = vcombine.high %v1858_v62, %v1858_v62  ;;  %v354_v9 = vld [vmem:[%s9762_s20 + $0x3d0] sm:$0xff]  ;;  %v9314_v18 = vcombine.high %v355_v10, %v355_v10 }
 0x1de   : > { %v6018_v19 = vpop.f32.mrf.mxu1  ;;  %8076 = vmatprep.subr.bf16.mxu1 %v9302_v13  ;;  %v5979_v23 = vpop.f32.mrf.mxu0  ;;  %v1924_v15 = vcombine.high %v1914_v2, %v1914_v2  ;;  %v9312_v17 = vcombine.high %v354_v9, %v354_v9 }
 0x1df   : > { %v228_v19 = vld [vmem:[%s9757_s17 + $0xf8] sm:$0xff] }
 0x1e0   : > { %v6019_v24 = vpop.f32.mrf.mxu1  ;;  %v5980_v30 = vpop.f32.mrf.mxu0  ;;  %v1933_v27 = vrot.slane %v228_v19, %v9752_v5 }
 0x1e2   : > { %v6020_v31 = vpop.f32.mrf.mxu1  ;;  %v6056_v37 = vpop.f32.mrf.mxu0  ;;  %7975 = vmatmul.mubr.bf16.vlgmr.msra.gmra.mxu0 %v1809_v16  ;;  %v1893_v16 = vcombine.high %v1891_v3, %v1891_v3 }
 0x1e3   : > { %v6057_v40 = vadd.f32 %v6056_v37, %v6017_v22  ;;  %8037 = vmatpush1.bf16.xpose.msra.mxu0 %v9299_v28  ;;  %8054 = vmatprep.mubr.bf16.mxu0 %v1865_v20  ;;  %v1900_v22 = vrot.slane %v1884_v44, %v9752_v5 }
 0x1e4   : > { %v6096_v38 = vpop.f32.mrf.mxu1  ;;  %8015 = vmatmul.mubr.bf16.vlgmr.msra.gmra.mxu1 %v1825_v25  ;;  %v6058_v41 = vpop.f32.mrf.mxu0  ;;  %8116 = vmatprep.subr.bf16.mxu0 %v9304_v34  ;;  %v1921_v26 = vrot.slane %v1893_v16, %v9752_v5  ;;  %v9311_v34 = vcombine.low %v354_v9, %v354_v9  ;;  %v361_v16 = vld [vmem:[%s9762_s20 + $0x408] sm:$0xff] }
 0x1e5   : > { %8077 = vmatpush1.bf16.xpose.msra.mxu1 %v9301_v29  ;;  %8094 = vmatprep.mubr.bf16.mxu1 %v1875_v32  ;;  %v6097_v45 = vadd.f32 %v6096_v38, %v6057_v40  ;;  %v1922_v31 = vcombine.high %v1900_v22, %v1900_v22  ;;  %v356_v32 = vld [vmem:[%s9762_s20 + $0x3e0] sm:$0xff]  ;;  %v1926_v40 = vcombine.high %v228_v19, %v228_v19 }
 0x1e6   : > { %v6098_v42 = vpop.f32.mrf.mxu1  ;;  %8156 = vmatprep.subr.bf16.mxu1 %v9306_v35  ;;  %v6059_v46 = vpop.f32.mrf.mxu0  ;;  %v9313_v35 = vcombine.low %v355_v10, %v355_v10  ;;  %v1925_v38 = vcombine.high %v1921_v26, %v1921_v26  ;;  %v9316_v41 = vcombine.high %v356_v32, %v356_v32  ;;  %v9315_v57 = vcombine.low %v356_v32, %v356_v32 }
 0x1e7   : > { %v9318_v42 = vcombine.high %v357_v33, %v357_v33  ;;  %v1940_v50 = vrot.slane %v1926_v40, %v9752_v5 }
 0x1e8   : > { %v6099_v47 = vpop.f32.mrf.mxu1  ;;  %v6060_v53 = vpop.f32.mrf.mxu0 }
 0x1ea   : > { %v6100_v54 = vpop.f32.mrf.mxu1  ;;  %v6136_v60 = vpop.f32.mrf.mxu0  ;;  %8055 = vmatmul.mubr.bf16.vlgmr.msra.gmra.mxu0 %v1851_v39  ;;  %v1941_v39 = vcombine.high %v1933_v27, %v1933_v27 }
 0x1eb   : > { %v6137_v63 = vadd.f32 %v6136_v60, %v6097_v45  ;;  %8117 = vmatpush1.bf16.xpose.msra.mxu0 %v9303_v51  ;;  %8134 = vmatprep.mubr.bf16.mxu0 %v1872_v43  ;;  %v1907_v45 = vrot.slane %v1891_v3, %v9752_v5 }
 0x1ec   : > { %v6176_v61 = vpop.f32.mrf.mxu1  ;;  %8095 = vmatmul.mubr.bf16.vlgmr.msra.gmra.mxu1 %v1873_v48  ;;  %v6138_v0 = vpop.f32.mrf.mxu0  ;;  %8196 = vmatprep.subr.bf16.mxu0 %v9308_v58  ;;  %v1963_v49 = vrot.slane %v1941_v39, %v9752_v5  ;;  %v9317_v58 = vcombine.low %v357_v33, %v357_v33  ;;  %v363_v39 = vld [vmem:[%s9762_s20 + $0x418] sm:$0xff] }
 0x1ed   : > { %8157 = vmatpush1.bf16.xpose.msra.mxu1 %v9305_v52  ;;  %8174 = vmatprep.mubr.bf16.mxu1 %v1876_v55  ;;  %v6177_v4 = vadd.f32 %v6176_v61, %v6137_v63  ;;  %v1923_v54 = vcombine.high %v1907_v45, %v1907_v45  ;;  %v358_v55 = vld [vmem:[%s9762_s20 + $0x3f0] sm:$0xff]  ;;  %v9322_v0 = vcombine.high %v359_v56, %v359_v56 }
 0x1ee   : > { %v6178_v1 = vpop.f32.mrf.mxu1  ;;  %8236 = vmatprep.subr.bf16.mxu1 %v9310_v59  ;;  %v6139_v6 = vpop.f32.mrf.mxu0  ;;  %v1973_v61 = vcombine.high %v1963_v49, %v1963_v49  ;;  %v9320_v63 = vcombine.high %v358_v55, %v358_v55 }
 0x1ef   : > { %v229_v1 = vld [vmem:[%s9757_s17 + $0x100] sm:$0xff] }
 0x1f0   : > { %v6179_v7 = vpop.f32.mrf.mxu1  ;;  %v6140_v13 = vpop.f32.mrf.mxu0  ;;  %v1982_v10 = vrot.slane %v229_v1, %v9752_v5 }
 0x1f2   : > { %v6180_v14 = vpop.f32.mrf.mxu1  ;;  %v6216_v20 = vpop.f32.mrf.mxu0  ;;  %8135 = vmatmul.mubr.bf16.vlgmr.msra.gmra.mxu0 %v1858_v62  ;;  %v1942_v62 = vcombine.high %v1940_v50, %v1940_v50 }
 0x1f3   : > { %v6217_v23 = vadd.f32 %v6216_v20, %v6177_v4  ;;  %8197 = vmatpush1.bf16.xpose.msra.mxu0 %v9307_v11  ;;  %8214 = vmatprep.mubr.bf16.mxu0 %v1914_v2  ;;  %v1949_v4 = vrot.slane %v1933_v27, %v9752_v5 }
 0x1f4   : > { %v6256_v21 = vpop.f32.mrf.mxu1  ;;  %8175 = vmatmul.mubr.bf16.vlgmr.msra.gmra.mxu1 %v1874_v8  ;;  %v6218_v24 = vpop.f32.mrf.mxu0  ;;  %8276 = vmatprep.subr.bf16.mxu0 %v9312_v17  ;;  %v1970_v9 = vrot.slane %v1942_v62, %v9752_v5  ;;  %v9319_v17 = vcombine.low %v358_v55, %v358_v55  ;;  %v365_v62 = vld [vmem:[%s9762_s20 + $0x428] sm:$0xff] }
 0x1f5   : > { %8237 = vmatpush1.bf16.xpose.msra.mxu1 %v9309_v12  ;;  %8254 = vmatprep.mubr.bf16.mxu1 %v1924_v15  ;;  %v6257_v28 = vadd.f32 %v6256_v21, %v6217_v23  ;;  %v1971_v14 = vcombine.high %v1949_v4, %v1949_v4  ;;  %v360_v15 = vld [vmem:[%s9762_s20 + $0x400] sm:$0xff]  ;;  %v1975_v23 = vcombine.high %v229_v1, %v229_v1 }
 0x1f6   : > { %v6258_v25 = vpop.f32.mrf.mxu1  ;;  %8316 = vmatprep.subr.bf16.mxu1 %v9314_v18  ;;  %v6219_v29 = vpop.f32.mrf.mxu0  ;;  %v9321_v18 = vcombine.low %v359_v56, %v359_v56  ;;  %v1974_v21 = vcombine.high %v1970_v9, %v1970_v9  ;;  %v9324_v24 = vcombine.high %v360_v15, %v360_v15  ;;  %v9323_v40 = vcombine.low %v360_v15, %v360_v15 }
 0x1f7   : > { %v9326_v25 = vcombine.high %v361_v16, %v361_v16  ;;  %v1989_v33 = vrot.slane %v1975_v23, %v9752_v5 }
 0x1f8   : > { %v6259_v30 = vpop.f32.mrf.mxu1  ;;  %v6220_v36 = vpop.f32.mrf.mxu0 }
 0x1fa   : > { %v6260_v37 = vpop.f32.mrf.mxu1  ;;  %v6296_v43 = vpop.f32.mrf.mxu0  ;;  %8215 = vmatmul.mubr.bf16.vlgmr.msra.gmra.mxu0 %v1900_v22  ;;  %v1990_v22 = vcombine.high %v1982_v10, %v1982_v10 }
 0x1fb   : > { %v6297_v46 = vadd.f32 %v6296_v43, %v6257_v28  ;;  %8277 = vmatpush1.bf16.xpose.msra.mxu0 %v9311_v34  ;;  %8294 = vmatprep.mubr.bf16.mxu0 %v1921_v26  ;;  %v1956_v28 = vrot.slane %v1940_v50, %v9752_v5 }
 0x1fc   : > { %v6336_v44 = vpop.f32.mrf.mxu1  ;;  %8255 = vmatmul.mubr.bf16.vlgmr.msra.gmra.mxu1 %v1922_v31  ;;  %v6298_v47 = vpop.f32.mrf.mxu0  ;;  %8356 = vmatprep.subr.bf16.mxu0 %v9316_v41  ;;  %v2012_v32 = vrot.slane %v1990_v22, %v9752_v5  ;;  %v9325_v41 = vcombine.low %v361_v16, %v361_v16  ;;  %v367_v22 = vld [vmem:[%s9762_s20 + $0x438] sm:$0xff] }
 0x1fd   : > { %8317 = vmatpush1.bf16.xpose.msra.mxu1 %v9313_v35  ;;  %8334 = vmatprep.mubr.bf16.mxu1 %v1925_v38  ;;  %v6337_v51 = vadd.f32 %v6336_v44, %v6297_v46  ;;  %v1972_v37 = vcombine.high %v1956_v28, %v1956_v28  ;;  %v362_v38 = vld [vmem:[%s9762_s20 + $0x410] sm:$0xff]  ;;  %v9330_v47 = vcombine.high %v363_v39, %v363_v39 }
 0x1fe   : > { %v6338_v48 = vpop.f32.mrf.mxu1  ;;  %8396 = vmatprep.subr.bf16.mxu1 %v9318_v42  ;;  %v6299_v52 = vpop.f32.mrf.mxu0  ;;  %v2022_v44 = vcombine.high %v2012_v32, %v2012_v32  ;;  %v9328_v46 = vcombine.high %v362_v38, %v362_v38 }
 0x1ff   : > { %v230_v48 = vld [vmem:[%s9757_s17 + $0x108] sm:$0xff] }
 0x200   : > { %v6339_v53 = vpop.f32.mrf.mxu1  ;;  %v6300_v59 = vpop.f32.mrf.mxu0  ;;  %v2031_v56 = vrot.slane %v230_v48, %v9752_v5 }
 0x202   : > { %v6340_v60 = vpop.f32.mrf.mxu1  ;;  %v6376_v2 = vpop.f32.mrf.mxu0  ;;  %8295 = vmatmul.mubr.bf16.vlgmr.msra.gmra.mxu0 %v1907_v45  ;;  %v1991_v45 = vcombine.high %v1989_v33, %v1989_v33 }
 0x203   : > { %v6377_v6 = vadd.f32 %v6376_v2, %v6337_v51  ;;  %8357 = vmatpush1.bf16.xpose.msra.mxu0 %v9315_v57  ;;  %8374 = vmatprep.mubr.bf16.mxu0 %v1963_v49  ;;  %v1998_v51 = vrot.slane %v1982_v10, %v9752_v5 }
 0x204   : > { %v6416_v3 = vpop.f32.mrf.mxu1  ;;  %8335 = vmatmul.mubr.bf16.vlgmr.msra.gmra.mxu1 %v1923_v54  ;;  %v6378_v7 = vpop.f32.mrf.mxu0  ;;  %8436 = vmatprep.subr.bf16.mxu0 %v9320_v63  ;;  %v2019_v55 = vrot.slane %v1991_v45, %v9752_v5  ;;  %v9327_v63 = vcombine.low %v362_v38, %v362_v38  ;;  %v369_v45 = vld [vmem:[%s9762_s20 + $0x448] sm:$0xff] }
 0x205   : > { %8397 = vmatpush1.bf16.xpose.msra.mxu1 %v9317_v58  ;;  %8414 = vmatprep.mubr.bf16.mxu1 %v1973_v61  ;;  %v6417_v11 = vadd.f32 %v6416_v3, %v6377_v6  ;;  %v2020_v60 = vcombine.high %v1998_v51, %v1998_v51  ;;  %v364_v61 = vld [vmem:[%s9762_s20 + $0x420] sm:$0xff]  ;;  %v2024_v6 = vcombine.high %v230_v48, %v230_v48 }
 0x206   : > { %v6418_v8 = vpop.f32.mrf.mxu1  ;;  %8476 = vmatprep.subr.bf16.mxu1 %v9322_v0  ;;  %v6379_v12 = vpop.f32.mrf.mxu0  ;;  %v9329_v0 = vcombine.low %v363_v39, %v363_v39  ;;  %v2023_v3 = vcombine.high %v2019_v55, %v2019_v55  ;;  %v9332_v7 = vcombine.high %v364_v61, %v364_v61  ;;  %v9331_v23 = vcombine.low %v364_v61, %v364_v61 }
 0x207   : > { %v9334_v8 = vcombine.high %v365_v62, %v365_v62  ;;  %v2038_v16 = vrot.slane %v2024_v6, %v9752_v5 }
 0x208   : > { %v6419_v13 = vpop.f32.mrf.mxu1  ;;  %v6380_v19 = vpop.f32.mrf.mxu0 }
 0x20a   : > { %v6420_v20 = vpop.f32.mrf.mxu1  ;;  %v6456_v26 = vpop.f32.mrf.mxu0  ;;  %8375 = vmatmul.mubr.bf16.vlgmr.msra.gmra.mxu0 %v1949_v4  ;;  %v2039_v4 = vcombine.high %v2031_v56, %v2031_v56 }
 0x20b   : > { %v6457_v29 = vadd.f32 %v6456_v26, %v6417_v11  ;;  %8437 = vmatpush1.bf16.xpose.msra.mxu0 %v9319_v17  ;;  %8454 = vmatprep.mubr.bf16.mxu0 %v1970_v9  ;;  %v2005_v11 = vrot.slane %v1989_v33, %v9752_v5 }
 0x20c   : > { %v6496_v27 = vpop.f32.mrf.mxu1  ;;  %8415 = vmatmul.mubr.bf16.vlgmr.msra.gmra.mxu1 %v1971_v14  ;;  %v6458_v30 = vpop.f32.mrf.mxu0  ;;  %8516 = vmatprep.subr.bf16.mxu0 %v9324_v24  ;;  %v2061_v15 = vrot.slane %v2039_v4, %v9752_v5  ;;  %v9333_v24 = vcombine.low %v365_v62, %v365_v62  ;;  %v371_v4 = vld [vmem:[%s9762_s20 + $0x458] sm:$0xff] }
 0x20d   : > { %8477 = vmatpush1.bf16.xpose.msra.mxu1 %v9321_v18  ;;  %8494 = vmatprep.mubr.bf16.mxu1 %v1974_v21  ;;  %v6497_v34 = vadd.f32 %v6496_v27, %v6457_v29  ;;  %v2021_v20 = vcombine.high %v2005_v11, %v2005_v11  ;;  %v366_v21 = vld [vmem:[%s9762_s20 + $0x430] sm:$0xff]  ;;  %v9338_v30 = vcombine.high %v367_v22, %v367_v22 }
 0x20e   : > { %v6498_v31 = vpop.f32.mrf.mxu1  ;;  %8556 = vmatprep.subr.bf16.mxu1 %v9326_v25  ;;  %v6459_v35 = vpop.f32.mrf.mxu0  ;;  %v2071_v27 = vcombine.high %v2061_v15, %v2061_v15  ;;  %v9336_v29 = vcombine.high %v366_v21, %v366_v21 }
 0x20f   : > { %v231_v31 = vld [vmem:[%s9757_s17 + $0x110] sm:$0xff] }
 0x210   : > { %v6499_v36 = vpop.f32.mrf.mxu1  ;;  %v6460_v42 = vpop.f32.mrf.mxu0  ;;  %v2080_v39 = vrot.slane %v231_v31, %v9752_v5 }
 0x212   : > { %v6500_v43 = vpop.f32.mrf.mxu1  ;;  %v6536_v49 = vpop.f32.mrf.mxu0  ;;  %8455 = vmatmul.mubr.bf16.vlgmr.msra.gmra.mxu0 %v1956_v28  ;;  %v2040_v28 = vcombine.high %v2038_v16, %v2038_v16 }
 0x213   : > { %v6537_v52 = vadd.f32 %v6536_v49, %v6497_v34  ;;  %8517 = vmatpush1.bf16.xpose.msra.mxu0 %v9323_v40  ;;  %8534 = vmatprep.mubr.bf16.mxu0 %v2012_v32  ;;  %v2047_v34 = vrot.slane %v2031_v56, %v9752_v5 }
 0x214   : > { %v6576_v50 = vpop.f32.mrf.mxu1  ;;  %8495 = vmatmul.mubr.bf16.vlgmr.msra.gmra.mxu1 %v1972_v37  ;;  %v6538_v53 = vpop.f32.mrf.mxu0  ;;  %8596 = vmatprep.subr.bf16.mxu0 %v9328_v46  ;;  %v2068_v38 = vrot.slane %v2040_v28, %v9752_v5  ;;  %v9335_v46 = vcombine.low %v366_v21, %v366_v21 }
 0x215   : > { %8557 = vmatpush1.bf16.xpose.msra.mxu1 %v9325_v41  ;;  %8574 = vmatprep.mubr.bf16.mxu1 %v2022_v44  ;;  %v6577_v57 = vadd.f32 %v6576_v50, %v6537_v52  ;;  %v2069_v43 = vcombine.high %v2047_v34, %v2047_v34  ;;  %v368_v44 = vld [vmem:[%s9762_s20 + $0x440] sm:$0xff]  ;;  %v2073_v52 = vcombine.high %v231_v31, %v231_v31 }
 0x216   : > { %v6578_v54 = vpop.f32.mrf.mxu1  ;;  %8636 = vmatprep.subr.bf16.mxu1 %v9330_v47  ;;  %v6539_v58 = vpop.f32.mrf.mxu0  ;;  %v9337_v47 = vcombine.low %v367_v22, %v367_v22  ;;  %v2072_v50 = vcombine.high %v2068_v38, %v2068_v38  ;;  %v9340_v53 = vcombine.high %v368_v44, %v368_v44  ;;  %v9339_v6 = vcombine.low %v368_v44, %v368_v44 }
 0x217   : > { %v9342_v54 = vcombine.high %v369_v45, %v369_v45  ;;  %v2087_v62 = vrot.slane %v2073_v52, %v9752_v5 }
 0x218   : > { %v6579_v59 = vpop.f32.mrf.mxu1  ;;  %v6540_v1 = vpop.f32.mrf.mxu0 }
 0x21a   : > { %v6580_v2 = vpop.f32.mrf.mxu1  ;;  %v6616_v9 = vpop.f32.mrf.mxu0  ;;  %8535 = vmatmul.mubr.bf16.vlgmr.msra.gmra.mxu0 %v1998_v51  ;;  %v2088_v51 = vcombine.high %v2080_v39, %v2080_v39 }
 0x21b   : > { %v6617_v12 = vadd.f32 %v6616_v9, %v6577_v57  ;;  %8597 = vmatpush1.bf16.xpose.msra.mxu0 %v9327_v63  ;;  %8614 = vmatprep.mubr.bf16.mxu0 %v2019_v55  ;;  %v2054_v57 = vrot.slane %v2038_v16, %v9752_v5  ;;  %v2096_v16 = vrot.slane %v2080_v39, %v9752_v5 }
 0x21c   : > { %v6656_v10 = vpop.f32.mrf.mxu1  ;;  %8575 = vmatmul.mubr.bf16.vlgmr.msra.gmra.mxu1 %v2020_v60  ;;  %v6618_v13 = vpop.f32.mrf.mxu0  ;;  %8676 = vmatprep.subr.bf16.mxu0 %v9332_v7  ;;  %v2110_v61 = vrot.slane %v2088_v51, %v9752_v5  ;;  %v9341_v7 = vcombine.low %v369_v45, %v369_v45 }
 0x21d   : > { %8637 = vmatpush1.bf16.xpose.msra.mxu1 %v9329_v0  ;;  %8654 = vmatprep.mubr.bf16.mxu1 %v2023_v3  ;;  %v6657_v17 = vadd.f32 %v6656_v10, %v6617_v12  ;;  %v2070_v2 = vcombine.high %v2054_v57, %v2054_v57  ;;  %v370_v3 = vld [vmem:[%s9762_s20 + $0x450] sm:$0xff]  ;;  %v9346_v13 = vcombine.high %v371_v4, %v371_v4 }
 0x21e   : > { %v6658_v14 = vpop.f32.mrf.mxu1  ;;  %8716 = vmatprep.subr.bf16.mxu1 %v9334_v8  ;;  %v6619_v18 = vpop.f32.mrf.mxu0  ;;  %v2120_v10 = vcombine.high %v2110_v61, %v2110_v61  ;;  %v9344_v12 = vcombine.high %v370_v3, %v370_v3 }
 0x220   : > { %v6659_v19 = vpop.f32.mrf.mxu1  ;;  %v6620_v25 = vpop.f32.mrf.mxu0 }
 0x221   : > { %v9343_v25 = vcombine.low %v370_v3, %v370_v3 }
 0x222   : > { %v6660_v26 = vpop.f32.mrf.mxu1  ;;  %v6696_v32 = vpop.f32.mrf.mxu0  ;;  %8615 = vmatmul.mubr.bf16.vlgmr.msra.gmra.mxu0 %v2005_v11  ;;  %v2089_v11 = vcombine.high %v2087_v62, %v2087_v62 }
 0x223   : > { %v6697_v35 = vadd.f32 %v6696_v32, %v6657_v17  ;;  %8677 = vmatpush1.bf16.xpose.msra.mxu0 %v9331_v23  ;;  %8694 = vmatprep.mubr.bf16.mxu0 %v2061_v15  ;;  %v9345_v26 = vcombine.low %v371_v4, %v371_v4  ;;  %v2103_v32 = vrot.slane %v2087_v62, %v9752_v5 }
 0x224   : > { %v6736_v33 = vpop.f32.mrf.mxu1  ;;  %8655 = vmatmul.mubr.bf16.vlgmr.msra.gmra.mxu1 %v2021_v20  ;;  %v6698_v36 = vpop.f32.mrf.mxu0  ;;  %8756 = vmatprep.subr.bf16.mxu0 %v9336_v29  ;;  %v2117_v20 = vrot.slane %v2089_v11, %v9752_v5 }
 0x225   : > { %8717 = vmatpush1.bf16.xpose.msra.mxu1 %v9333_v24  ;;  %8734 = vmatprep.mubr.bf16.mxu1 %v2071_v27  ;;  %v6737_v40 = vadd.f32 %v6736_v33, %v6697_v35  ;;  %v2118_v24 = vcombine.high %v2096_v16, %v2096_v16  ;;  %v2119_v39 = vcombine.high %v2103_v32, %v2103_v32 }
 0x226   : > { %v6738_v37 = vpop.f32.mrf.mxu1  ;;  %8796 = vmatprep.subr.bf16.mxu1 %v9338_v30  ;;  %v6699_v41 = vpop.f32.mrf.mxu0  ;;  %v2121_v29 = vcombine.high %v2117_v20, %v2117_v20 }
 0x228   : > { %v6739_v42 = vpop.f32.mrf.mxu1  ;;  %v6700_v48 = vpop.f32.mrf.mxu0 }
 0x22a   : > { %v6740_v49 = vpop.f32.mrf.mxu1  ;;  %v6776_v55 = vpop.f32.mrf.mxu0  ;;  %8695 = vmatmul.mubr.bf16.vlgmr.msra.gmra.mxu0 %v2047_v34 }
 0x22b   : > { %v6777_v58 = vadd.f32 %v6776_v55, %v6737_v40  ;;  %8757 = vmatpush1.bf16.xpose.msra.mxu0 %v9335_v46  ;;  %8774 = vmatprep.mubr.bf16.mxu0 %v2068_v38 }
 0x22c   : > { %v6816_v56 = vpop.f32.mrf.mxu1  ;;  %8735 = vmatmul.mubr.bf16.vlgmr.msra.gmra.mxu1 %v2069_v43  ;;  %v6778_v59 = vpop.f32.mrf.mxu0  ;;  %8836 = vmatprep.subr.bf16.mxu0 %v9340_v53 }
 0x22d   : > { %8797 = vmatpush1.bf16.xpose.msra.mxu1 %v9337_v47  ;;  %8814 = vmatprep.mubr.bf16.mxu1 %v2072_v50  ;;  %v6817_v63 = vadd.f32 %v6816_v56, %v6777_v58 }
 0x22e   : > { %v6818_v60 = vpop.f32.mrf.mxu1  ;;  %8876 = vmatprep.subr.bf16.mxu1 %v9342_v54  ;;  %v6779_v0 = vpop.f32.mrf.mxu0 }
 0x230   : > { %v6819_v1 = vpop.f32.mrf.mxu1  ;;  %v6780_v8 = vpop.f32.mrf.mxu0 }
 0x232   : > { %v6820_v9 = vpop.f32.mrf.mxu1  ;;  %v6856_v14 = vpop.f32.mrf.mxu0  ;;  %8775 = vmatmul.mubr.bf16.vlgmr.msra.gmra.mxu0 %v2054_v57 }
 0x233   : > { %v6857_v17 = vadd.f32 %v6856_v14, %v6817_v63  ;;  %8837 = vmatpush1.bf16.xpose.msra.mxu0 %v9339_v6  ;;  %8854 = vmatprep.mubr.bf16.mxu0 %v2110_v61 }
 0x234   : > { %v6896_v15 = vpop.f32.mrf.mxu1  ;;  %8815 = vmatmul.mubr.bf16.vlgmr.msra.gmra.mxu1 %v2070_v2  ;;  %v6858_v18 = vpop.f32.mrf.mxu0  ;;  %8916 = vmatprep.subr.bf16.mxu0 %v9344_v12 }
 0x235   : > { %8877 = vmatpush1.bf16.xpose.msra.mxu1 %v9341_v7  ;;  %8894 = vmatprep.mubr.bf16.mxu1 %v2120_v10  ;;  %v6897_v21 = vadd.f32 %v6896_v15, %v6857_v17 }
 0x236   : > { %v6898_v19 = vpop.f32.mrf.mxu1  ;;  %8956 = vmatprep.subr.bf16.mxu1 %v9346_v13  ;;  %v6859_v22 = vpop.f32.mrf.mxu0 }
 0x238   : > { %v6899_v23 = vpop.f32.mrf.mxu1  ;;  %v6860_v27 = vpop.f32.mrf.mxu0 }
 0x23a   : > { %v6900_v28 = vpop.f32.mrf.mxu1  ;;  %v6936_v30 = vpop.f32.mrf.mxu0  ;;  %8855 = vmatmul.mubr.bf16.vlgmr.msra.gmra.mxu0 %v2096_v16 }
 0x23b   : > { %v6937_v33 = vadd.f32 %v6936_v30, %v6897_v21  ;;  %8917 = vmatpush1.bf16.xpose.msra.mxu0 %v9343_v25  ;;  %8934 = vmatprep.mubr.bf16.mxu0 %v2117_v20 }
 0x23c   : > { %v6976_v31 = vpop.f32.mrf.mxu1  ;;  %8895 = vmatmul.mubr.bf16.vlgmr.msra.gmra.mxu1 %v2118_v24  ;;  %v6938_v34 = vpop.f32.mrf.mxu0 }
 0x23d   : > { %8957 = vmatpush1.bf16.xpose.msra.mxu1 %v9345_v26  ;;  %8974 = vmatprep.mubr.bf16.mxu1 %v2121_v29  ;;  %v6977_v36 = vadd.f32 %v6976_v31, %v6937_v33 }
 0x23e   : > { %v6978_v35 = vpop.f32.mrf.mxu1  ;;  %v6939_v37 = vpop.f32.mrf.mxu0 }
 0x240   : > { %v6979_v38 = vpop.f32.mrf.mxu1  ;;  %v6940_v40 = vpop.f32.mrf.mxu0 }
 0x242   : > { %v6980_v41 = vpop.f32.mrf.mxu1  ;;  %v7016_v42 = vpop.f32.mrf.mxu0  ;;  %8935 = vmatmul.mubr.bf16.vlgmr.msra.gmra.mxu0 %v2103_v32 }
 0x243   : > { %v7017_v44 = vadd.f32 %v7016_v42, %v6977_v36 }
 0x244   : > { %v7056_v43 = vpop.f32.mrf.mxu1  ;;  %8975 = vmatmul.mubr.bf16.vlgmr.msra.gmra.mxu1 %v2119_v39  ;;  %v7018_v45 = vpop.f32.mrf.mxu0 }
 0x245   : > { %v7057_v46 = vadd.f32 %v7056_v43, %v7017_v44 }
 0x246   : > { %v7058_v5 = vpop.f32.mrf.mxu1  ;;  %v7019_v47 = vpop.f32.mrf.mxu0 }
 0x248   : > { %v7059_v48 = vpop.f32.mrf.mxu1  ;;  %v7020_v49 = vpop.f32.mrf.mxu0 }
 0x24a   : > { %v7060_v50 = vpop.f32.mrf.mxu1  ;;  %v7096_v51 = vpop.f32.mrf.mxu0 }
 0x24b   : > { %v7097_v53 = vadd.f32 %v7096_v51, %v7057_v46 }
 0x24c   : > { %v7136_v52 = vpop.f32.mrf.mxu1  ;;  %v7098_v54 = vpop.f32.mrf.mxu0 }
 0x24d   : > { %v7137_v56 = vadd.f32 %v7136_v52, %v7097_v53 }
 0x24e   : > { %v7138_v55 = vpop.f32.mrf.mxu1  ;;  %v7099_v57 = vpop.f32.mrf.mxu0 }
 0x24f   : > { %v9715_v55 = vmov 0.0  }
 0x250   : > { %v7139_v58 = vpop.f32.mrf.mxu1  ;;  %v7100_v59 = vpop.f32.mrf.mxu0  ;;  %195 = vst.msk [vmem:[#allocation2] sm:$0x3] %vm194_vm0, %v9715_v55 }
 0x252   : > { %v7140_v60 = vpop.f32.mrf.mxu1  ;;  %v7176_v61 = vpop.f32.mrf.mxu0 }
 0x253   : > { %v7177_v63 = vadd.f32 %v7176_v61, %v7137_v56 }
 0x254   : > { %v7216_v62 = vpop.f32.mrf.mxu1  ;;  %v7178_v0 = vpop.f32.mrf.mxu0 }
 0x255   : > { %v7217_v2 = vadd.f32 %v7216_v62, %v7177_v63 }
 0x256   : > { %v7218_v1 = vpop.f32.mrf.mxu1  ;;  %v7179_v3 = vpop.f32.mrf.mxu0 }
 0x258   : > { %v7219_v4 = vpop.f32.mrf.mxu1  ;;  %v7180_v6 = vpop.f32.mrf.mxu0 }
 0x25a   : > { %v7220_v7 = vpop.f32.mrf.mxu1  ;;  %v7256_v8 = vpop.f32.mrf.mxu0 }
 0x25b   : > { %v7257_v10 = vadd.f32 %v7256_v8, %v7217_v2 }
 0x25c   : > { %v7296_v9 = vpop.f32.mrf.mxu1  ;;  %v7258_v11 = vpop.f32.mrf.mxu0 }
 0x25d   : > { %v7297_v13 = vadd.f32 %v7296_v9, %v7257_v10 }
 0x25e   : > { %v7298_v12 = vpop.f32.mrf.mxu1  ;;  %v7259_v14 = vpop.f32.mrf.mxu0 }
 0x260   : > { %v7299_v15 = vpop.f32.mrf.mxu1  ;;  %v7260_v16 = vpop.f32.mrf.mxu0 }
 0x262   : > { %v7300_v17 = vpop.f32.mrf.mxu1  ;;  %v7336_v18 = vpop.f32.mrf.mxu0 }
 0x263   : > { %v7337_v20 = vadd.f32 %v7336_v18, %v7297_v13 }
 0x264   : > { %v7376_v19 = vpop.f32.mrf.mxu1  ;;  %v7338_v21 = vpop.f32.mrf.mxu0 }
 0x265   : > { %v7377_v23 = vadd.f32 %v7376_v19, %v7337_v20 }
 0x266   : > { %v7378_v22 = vpop.f32.mrf.mxu1  ;;  %v7339_v24 = vpop.f32.mrf.mxu0 }
 0x268   : > { %v7379_v25 = vpop.f32.mrf.mxu1  ;;  %v7340_v26 = vpop.f32.mrf.mxu0 }
 0x26a   : > { %v7380_v27 = vpop.f32.mrf.mxu1  ;;  %v7416_v28 = vpop.f32.mrf.mxu0 }
 0x26b   : > { %v7417_v30 = vadd.f32 %v7416_v28, %v7377_v23 }
 0x26c   : > { %v7456_v29 = vpop.f32.mrf.mxu1  ;;  %v7418_v31 = vpop.f32.mrf.mxu0 }
 0x26d   : > { %v7457_v33 = vadd.f32 %v7456_v29, %v7417_v30 }
 0x26e   : > { %v7458_v32 = vpop.f32.mrf.mxu1  ;;  %v7419_v34 = vpop.f32.mrf.mxu0 }
 0x270   : > { %v7459_v35 = vpop.f32.mrf.mxu1  ;;  %v7420_v36 = vpop.f32.mrf.mxu0 }
 0x272   : > { %v7460_v37 = vpop.f32.mrf.mxu1  ;;  %v7496_v38 = vpop.f32.mrf.mxu0 }
 0x273   : > { %v7497_v40 = vadd.f32 %v7496_v38, %v7457_v33 }
 0x274   : > { %v7536_v39 = vpop.f32.mrf.mxu1  ;;  %v7498_v41 = vpop.f32.mrf.mxu0 }
 0x275   : > { %v7537_v43 = vadd.f32 %v7536_v39, %v7497_v40 }
 0x276   : > { %v7538_v42 = vpop.f32.mrf.mxu1  ;;  %v7499_v44 = vpop.f32.mrf.mxu0 }
 0x278   : > { %v7539_v45 = vpop.f32.mrf.mxu1  ;;  %v7500_v5 = vpop.f32.mrf.mxu0 }
 0x27a   : > { %v7540_v46 = vpop.f32.mrf.mxu1  ;;  %v7576_v47 = vpop.f32.mrf.mxu0 }
 0x27b   : > { %v7577_v49 = vadd.f32 %v7576_v47, %v7537_v43 }
 0x27c   : > { %v7616_v48 = vpop.f32.mrf.mxu1  ;;  %v7578_v50 = vpop.f32.mrf.mxu0 }
 0x27d   : > { %v7617_v52 = vadd.f32 %v7616_v48, %v7577_v49 }
 0x27e   : > { %v7618_v51 = vpop.f32.mrf.mxu1  ;;  %v7579_v53 = vpop.f32.mrf.mxu0 }
 0x280   : > { %v7619_v54 = vpop.f32.mrf.mxu1  ;;  %v7580_v56 = vpop.f32.mrf.mxu0 }
 0x282   : > { %v7620_v57 = vpop.f32.mrf.mxu1  ;;  %v7656_v58 = vpop.f32.mrf.mxu0 }
 0x283   : > { %v7657_v60 = vadd.f32 %v7656_v58, %v7617_v52 }
 0x284   : > { %v7696_v59 = vpop.f32.mrf.mxu1  ;;  %v7658_v61 = vpop.f32.mrf.mxu0 }
 0x285   : > { %v7697_v63 = vadd.f32 %v7696_v59, %v7657_v60 }
 0x286   : > { %v7698_v62 = vpop.f32.mrf.mxu1  ;;  %v7659_v0 = vpop.f32.mrf.mxu0 }
 0x288   : > { %v7699_v1 = vpop.f32.mrf.mxu1  ;;  %v7660_v2 = vpop.f32.mrf.mxu0 }
 0x28a   : > { %v7700_v3 = vpop.f32.mrf.mxu1  ;;  %v7736_v4 = vpop.f32.mrf.mxu0 }
 0x28b   : > { %v7737_v37 = vadd.f32 %v7736_v4, %v7697_v63 }
 0x28c   : > { %v7776_v6 = vpop.f32.mrf.mxu1  ;;  %v7738_v7 = vpop.f32.mrf.mxu0 }
 0x28d   : > { %v7777_v42 = vadd.f32 %v7776_v6, %v7737_v37 }
 0x28e   : > { %v7778_v8 = vpop.f32.mrf.mxu1  ;;  %v7739_v9 = vpop.f32.mrf.mxu0 }
 0x290   : > { %v7779_v10 = vpop.f32.mrf.mxu1  ;;  %v7740_v11 = vpop.f32.mrf.mxu0 }
 0x292   : > { %v7780_v12 = vpop.f32.mrf.mxu1  ;;  %v7816_v13 = vpop.f32.mrf.mxu0 }
 0x293   : > { %v7817_v45 = vadd.f32 %v7816_v13, %v7777_v42 }
 0x294   : > { %v7856_v14 = vpop.f32.mrf.mxu1  ;;  %v7818_v15 = vpop.f32.mrf.mxu0 }
 0x295   : > { %v7857_v49 = vadd.f32 %v7856_v14, %v7817_v45 }
 0x296   : > { %v7858_v16 = vpop.f32.mrf.mxu1  ;;  %v7819_v17 = vpop.f32.mrf.mxu0 }
 0x298   : > { %v7859_v18 = vpop.f32.mrf.mxu1  ;;  %v7820_v19 = vpop.f32.mrf.mxu0 }
 0x29a   : > { %v7860_v20 = vpop.f32.mrf.mxu1  ;;  %v7896_v21 = vpop.f32.mrf.mxu0 }
 0x29b   : > { %v7897_v52 = vadd.f32 %v7896_v21, %v7857_v49 }
 0x29c   : > { %v7936_v22 = vpop.f32.mrf.mxu1  ;;  %v7898_v23 = vpop.f32.mrf.mxu0 }
 0x29d   : > { %v7937_v57 = vadd.f32 %v7936_v22, %v7897_v52 }
 0x29e   : > { %v7938_v24 = vpop.f32.mrf.mxu1  ;;  %v7899_v25 = vpop.f32.mrf.mxu0 }
 0x2a0   : > { %v7939_v26 = vpop.f32.mrf.mxu1  ;;  %v7900_v27 = vpop.f32.mrf.mxu0 }
 0x2a2   : > { %v7940_v28 = vpop.f32.mrf.mxu1  ;;  %v7976_v29 = vpop.f32.mrf.mxu0 }
 0x2a3   : > { %v7977_v60 = vadd.f32 %v7976_v29, %v7937_v57 }
 0x2a4   : > { %v8016_v30 = vpop.f32.mrf.mxu1  ;;  %v7978_v31 = vpop.f32.mrf.mxu0 }
 0x2a5   : > { %v8017_v1 = vadd.f32 %v8016_v30, %v7977_v60 }
 0x2a6   : > { %v8018_v32 = vpop.f32.mrf.mxu1  ;;  %v7979_v33 = vpop.f32.mrf.mxu0 }
 0x2a8   : > { %v8019_v34 = vpop.f32.mrf.mxu1  ;;  %v7980_v35 = vpop.f32.mrf.mxu0 }
 0x2aa   : > { %v8020_v36 = vpop.f32.mrf.mxu1  ;;  %v8056_v38 = vpop.f32.mrf.mxu0 }
 0x2ab   : > { %v8057_v4 = vadd.f32 %v8056_v38, %v8017_v1 }
 0x2ac   : > { %v8096_v39 = vpop.f32.mrf.mxu1  ;;  %v8058_v40 = vpop.f32.mrf.mxu0 }
 0x2ad   : > { %v8097_v10 = vadd.f32 %v8096_v39, %v8057_v4 }
 0x2ae   : > { %v8098_v41 = vpop.f32.mrf.mxu1  ;;  %v8059_v43 = vpop.f32.mrf.mxu0 }
 0x2b0   : > { %v8099_v44 = vpop.f32.mrf.mxu1  ;;  %v8060_v5 = vpop.f32.mrf.mxu0 }
 0x2b2   : > { %v8100_v46 = vpop.f32.mrf.mxu1  ;;  %v8136_v47 = vpop.f32.mrf.mxu0 }
 0x2b3   : > { %v8137_v13 = vadd.f32 %v8136_v47, %v8097_v10 }
 0x2b4   : > { %v8176_v48 = vpop.f32.mrf.mxu1  ;;  %v8138_v50 = vpop.f32.mrf.mxu0 }
 0x2b5   : > { %v8177_v18 = vadd.f32 %v8176_v48, %v8137_v13 }
 0x2b6   : > { %v8178_v51 = vpop.f32.mrf.mxu1  ;;  %v8139_v53 = vpop.f32.mrf.mxu0 }
 0x2b8   : > { %v8179_v54 = vpop.f32.mrf.mxu1  ;;  %v8140_v55 = vpop.f32.mrf.mxu0 }
 0x2ba   : > { %v8180_v56 = vpop.f32.mrf.mxu1  ;;  %v8216_v58 = vpop.f32.mrf.mxu0 }
 0x2bb   : > { %v8217_v21 = vadd.f32 %v8216_v58, %v8177_v18 }
 0x2bc   : > { %v8256_v59 = vpop.f32.mrf.mxu1  ;;  %v8218_v61 = vpop.f32.mrf.mxu0 }
 0x2bd   : > { %v8257_v26 = vadd.f32 %v8256_v59, %v8217_v21 }
 0x2be   : > { %v8258_v62 = vpop.f32.mrf.mxu1  ;;  %v8219_v63 = vpop.f32.mrf.mxu0 }
 0x2c0   : > { %v8259_v0 = vpop.f32.mrf.mxu1  ;;  %v8220_v2 = vpop.f32.mrf.mxu0 }
 0x2c2   : > { %v8260_v3 = vpop.f32.mrf.mxu1  ;;  %v8296_v6 = vpop.f32.mrf.mxu0 }
 0x2c3   : > { %v8297_v29 = vadd.f32 %v8296_v6, %v8257_v26 }
 0x2c4   : > { %v8336_v7 = vpop.f32.mrf.mxu1  ;;  %v8298_v8 = vpop.f32.mrf.mxu0 }
 0x2c5   : > { %v8337_v34 = vadd.f32 %v8336_v7, %v8297_v29 }
 0x2c6   : > { %v8338_v9 = vpop.f32.mrf.mxu1  ;;  %v8299_v11 = vpop.f32.mrf.mxu0 }
 0x2c8   : > { %v8339_v12 = vpop.f32.mrf.mxu1  ;;  %v8300_v14 = vpop.f32.mrf.mxu0 }
 0x2ca   : > { %v8340_v15 = vpop.f32.mrf.mxu1  ;;  %v8376_v16 = vpop.f32.mrf.mxu0 }
 0x2cb   : > { %v8377_v37 = vadd.f32 %v8376_v16, %v8337_v34 }
 0x2cc   : > { %v8416_v17 = vpop.f32.mrf.mxu1  ;;  %v8378_v19 = vpop.f32.mrf.mxu0 }
 0x2cd   : > { %v8417_v42 = vadd.f32 %v8416_v17, %v8377_v37 }
 0x2ce   : > { %v8418_v20 = vpop.f32.mrf.mxu1  ;;  %v8379_v22 = vpop.f32.mrf.mxu0 }
 0x2d0   : > { %v8419_v23 = vpop.f32.mrf.mxu1  ;;  %v8380_v24 = vpop.f32.mrf.mxu0 }
 0x2d2   : > { %v8420_v25 = vpop.f32.mrf.mxu1  ;;  %v8456_v27 = vpop.f32.mrf.mxu0 }
 0x2d3   : > { %v8457_v45 = vadd.f32 %v8456_v27, %v8417_v42 }
 0x2d4   : > { %v8496_v28 = vpop.f32.mrf.mxu1  ;;  %v8458_v30 = vpop.f32.mrf.mxu0 }
 0x2d5   : > { %v8497_v49 = vadd.f32 %v8496_v28, %v8457_v45  ;;  %v196_v30 = vld [vmem:[#allocation2] sm:$0x3] }
 0x2d6   : > { %v8498_v31 = vpop.f32.mrf.mxu1  ;;  %v8459_v32 = vpop.f32.mrf.mxu0 }
 0x2d8   : > { %v8499_v33 = vpop.f32.mrf.mxu1  ;;  %v8460_v35 = vpop.f32.mrf.mxu0 }
 0x2da   : > { %v8500_v36 = vpop.f32.mrf.mxu1  ;;  %v8536_v38 = vpop.f32.mrf.mxu0 }
 0x2db   : > { %v8537_v52 = vadd.f32 %v8536_v38, %v8497_v49 }
 0x2dc   : > { %v8576_v39 = vpop.f32.mrf.mxu1  ;;  %v8538_v40 = vpop.f32.mrf.mxu0 }
 0x2dd   : > { %v8577_v57 = vadd.f32 %v8576_v39, %v8537_v52 }
 0x2de   : > { %v8578_v41 = vpop.f32.mrf.mxu1  ;;  %v8539_v43 = vpop.f32.mrf.mxu0 }
 0x2e0   : > { %v8579_v44 = vpop.f32.mrf.mxu1  ;;  %v8540_v5 = vpop.f32.mrf.mxu0 }
 0x2e2   : > { %v8580_v46 = vpop.f32.mrf.mxu1  ;;  %v8616_v47 = vpop.f32.mrf.mxu0 }
 0x2e3   : > { %v8617_v60 = vadd.f32 %v8616_v47, %v8577_v57 }
 0x2e4   : > { %v8656_v48 = vpop.f32.mrf.mxu1  ;;  %v8618_v50 = vpop.f32.mrf.mxu0 }
 0x2e5   : > { %v8657_v1 = vadd.f32 %v8656_v48, %v8617_v60 }
 0x2e6   : > { %v8658_v51 = vpop.f32.mrf.mxu1  ;;  %v8619_v53 = vpop.f32.mrf.mxu0 }
 0x2e8   : > { %v8659_v54 = vpop.f32.mrf.mxu1  ;;  %v8620_v55 = vpop.f32.mrf.mxu0 }
 0x2ea   : > { %v8660_v56 = vpop.f32.mrf.mxu1  ;;  %v8696_v58 = vpop.f32.mrf.mxu0 }
 0x2eb   : > { %v8697_v4 = vadd.f32 %v8696_v58, %v8657_v1 }
 0x2ec   : > { %v8736_v59 = vpop.f32.mrf.mxu1  ;;  %v8698_v61 = vpop.f32.mrf.mxu0 }
 0x2ed   : > { %v8737_v10 = vadd.f32 %v8736_v59, %v8697_v4 }
 0x2ee   : > { %v8738_v62 = vpop.f32.mrf.mxu1  ;;  %v8699_v63 = vpop.f32.mrf.mxu0 }
 0x2f0   : > { %v8739_v0 = vpop.f32.mrf.mxu1  ;;  %v8700_v2 = vpop.f32.mrf.mxu0 }
 0x2f2   : > { %v8740_v3 = vpop.f32.mrf.mxu1  ;;  %v8776_v6 = vpop.f32.mrf.mxu0 }
 0x2f3   : > { %v8777_v13 = vadd.f32 %v8776_v6, %v8737_v10 }
 0x2f4   : > { %v8816_v7 = vpop.f32.mrf.mxu1  ;;  %v8778_v8 = vpop.f32.mrf.mxu0 }
 0x2f5   : > { %v8817_v18 = vadd.f32 %v8816_v7, %v8777_v13 }
 0x2f6   : > { %v8818_v9 = vpop.f32.mrf.mxu1  ;;  %v8779_v11 = vpop.f32.mrf.mxu0 }
 0x2f8   : > { %v8819_v12 = vpop.f32.mrf.mxu1  ;;  %v8780_v14 = vpop.f32.mrf.mxu0 }
 0x2fa   : > { %v8820_v15 = vpop.f32.mrf.mxu1  ;;  %v8856_v16 = vpop.f32.mrf.mxu0 }
 0x2fb   : > { %v8857_v21 = vadd.f32 %v8856_v16, %v8817_v18 }
 0x2fc   : > { %v8896_v17 = vpop.f32.mrf.mxu1  ;;  %v8858_v19 = vpop.f32.mrf.mxu0 }
 0x2fd   : > { %v8897_v26 = vadd.f32 %v8896_v17, %v8857_v21 }
 0x2fe   : > { %v8898_v20 = vpop.f32.mrf.mxu1  ;;  %v8859_v22 = vpop.f32.mrf.mxu0 }
 0x300   : > { %v8899_v23 = vpop.f32.mrf.mxu1  ;;  %v8860_v24 = vpop.f32.mrf.mxu0 }
 0x302   : > { %v8900_v25 = vpop.f32.mrf.mxu1  ;;  %v8936_v27 = vpop.f32.mrf.mxu0 }
 0x303   : > { %v8937_v29 = vadd.f32 %v8936_v27, %v8897_v26 }
 0x304   : > { %v8976_v28 = vpop.f32.mrf.mxu1  ;;  %v8938_v31 = vpop.f32.mrf.mxu0 }
 0x305   : > { %v8977_v33 = vadd.f32 %v8976_v28, %v8937_v29 }
 0x306   : > { %v8978_v32 = vpop.f32.mrf.mxu1  ;;  %v8939_v34 = vpop.f32.mrf.mxu0 }
 0x307   : > { %v8982_v36 = vadd.f32 %v8977_v33, %v196_v30 }
 0x308   : > { %v8979_v35 = vpop.f32.mrf.mxu1  ;;  %v8940_v37 = vpop.f32.mrf.mxu0 }
 0x309   : > { %8984 = vst.msk [vmem:[#allocation2] sm:$0x3] %vm194_vm0, %v8982_v36 }
 0x30a   : > { %v8980_v38 = vpop.f32.mrf.mxu1 }
 0x310   : > { %v8988_v39 = vld [vmem:[#allocation2] sm:$0x3] }
 0x311   : > { %8989 = vst.msk [vmem:[%s188_s24] sm:$0x3] %vm194_vm0, %v8988_v39 }
 0x312 PF: > { %s12_s11 = sadd.s32 1, %s9712_s11   ;;  %s10169_s9 = smov %s9708_s10 }
 0x313   : > { %p9_p6 = scmp.ge.s32.totalorder %s12_s11, 4   ;;  %s10170_s10 = smov %s10172_s12 }
 0x315   :  { %11 = sbr.rel (!%p9_p6) target bundleno = 2 (0x2), region = 69 }

</bundles_post_ra>
